<compile_context>
chip_gen: v5e
topology: v5e:2x2
jax: 0.10.0
libtpu: 0.0.40
codegen_flags: <defaults>
</compile_context>

<pallas_src>
import functools

import jax
import jax.numpy as jnp
from jax import lax
from jax.experimental import pallas as pl
from jax.experimental.pallas import tpu as pltpu

BN_EPS = 1e-5


# --------------------------- helpers -----------------------------------------

def _pick_tile(n, cap=256):
    """Largest row tile <= cap that divides n and is a multiple of 8 (else full n)."""
    if n <= cap:
        return n
    t = cap - (cap % 8)
    while t >= 8:
        if n % t == 0:
            return t
        t -= 8
    return n


# --------------------------- Pallas kernels ----------------------------------

def _gemm_fused_kernel(*refs, act, in_affine, relu_in, emit_stats):
    a_ref, b_ref, bias_ref = refs[0], refs[1], refs[2]
    pos = 3
    if in_affine:
        isc_ref, ish_ref = refs[3], refs[4]
        pos = 5
    o_ref = refs[pos]
    stat_ref = refs[pos + 1] if emit_stats else None

    a = a_ref[...]
    if in_affine:
        # Previous layer's BatchNorm scale/shift fused into this GEMM's input.
        a = a.astype(jnp.float32) * isc_ref[...] + ish_ref[...]
    if relu_in:
        a = jnp.maximum(a, 0.0)
    acc = jnp.dot(a.astype(jnp.bfloat16), b_ref[...],
                  preferred_element_type=jnp.float32)
    y = acc + bias_ref[...]                       # conv bias in the epilogue
    if emit_stats:
        # Partial BatchNorm statistics of the conv output (incl. bias), pre-act.
        s1 = jnp.sum(y, axis=0, keepdims=True)
        s2 = jnp.sum(y * y, axis=0, keepdims=True)
        stat_ref[...] = jnp.concatenate([s1, s2], axis=0)[None]
    if act == "relu":
        y = jnp.maximum(y, 0.0)
    elif act == "tanh":
        y = jnp.tanh(y)
    o_ref[...] = y


def gemm_fused(a, w, bias, *, act="none", in_scale=None, in_shift=None,
               relu_in=False, emit_stats=False):
    """(M,K) @ (K,N) + bias with fused input-affine / ReLU / act / BN stats."""
    M, K = a.shape
    N = w.shape[1]
    tm = _pick_tile(M, 256)
    grid_m = M // tm

    in_specs = [
        pl.BlockSpec((tm, K), lambda i: (i, 0)),
        pl.BlockSpec((K, N), lambda i: (0, 0)),
        pl.BlockSpec((1, N), lambda i: (0, 0)),
    ]
    args = [a, w, bias.reshape(1, N)]
    in_affine = in_scale is not None
    if in_affine:
        in_specs += [pl.BlockSpec((1, K), lambda i: (0, 0)),
                     pl.BlockSpec((1, K), lambda i: (0, 0))]
        args += [in_scale.reshape(1, K), in_shift.reshape(1, K)]

    if emit_stats:
        out_shape = (jax.ShapeDtypeStruct((M, N), jnp.float32),
                     jax.ShapeDtypeStruct((grid_m, 2, N), jnp.float32))
        out_specs = (pl.BlockSpec((tm, N), lambda i: (i, 0)),
                     pl.BlockSpec((1, 2, N), lambda i: (i, 0, 0)))
    else:
        out_shape = jax.ShapeDtypeStruct((M, N), jnp.float32)
        out_specs = pl.BlockSpec((tm, N), lambda i: (i, 0))

    kern = functools.partial(_gemm_fused_kernel, act=act, in_affine=in_affine,
                             relu_in=relu_in, emit_stats=emit_stats)
    return pl.pallas_call(
        kern, out_shape=out_shape, grid=(grid_m,),
        in_specs=in_specs, out_specs=out_specs,
        compiler_params=pltpu.CompilerParams(dimension_semantics=("parallel",)),
    )(*args)


def _affine_act_res_kernel(*refs, act, has_res, relu_res):
    y_ref, sc_ref, sh_ref = refs[0], refs[1], refs[2]
    r_ref = refs[3] if has_res else None
    o_ref = refs[-1]
    v = y_ref[...] * sc_ref[...] + sh_ref[...]
    if act == "relu":
        v = jnp.maximum(v, 0.0)
    elif act == "tanh":
        v = jnp.tanh(v)
    if has_res:
        r = r_ref[...]
        if relu_res:
            r = jnp.maximum(r, 0.0)
        v = v + r
    o_ref[...] = v


def affine_act(y2d, scale, shift, *, act="none", residual=None, relu_res=False):
    """Fused per-channel affine + activation (+ residual) on a lane-dense slab."""
    M, N = y2d.shape
    if N < 128 and 128 % N == 0 and M % (128 // N) == 0:
        # Pack 128//N channel rows into one 128-lane row -> unmasked vector stores.
        rep = 128 // N
        R, L = M // rep, 128
        y = y2d.reshape(R, L)
        sc, sh = jnp.tile(scale, rep), jnp.tile(shift, rep)
        res = None if residual is None else residual.reshape(R, L)
    else:
        R, L = M, N
        y, sc, sh, res = y2d, scale, shift, residual

    tr = _pick_tile(R, 512)
    grid_r = R // tr
    in_specs = [pl.BlockSpec((tr, L), lambda i: (i, 0)),
                pl.BlockSpec((1, L), lambda i: (0, 0)),
                pl.BlockSpec((1, L), lambda i: (0, 0))]
    args = [y, sc.reshape(1, L), sh.reshape(1, L)]
    if res is not None:
        in_specs.append(pl.BlockSpec((tr, L), lambda i: (i, 0)))
        args.append(res)
    kern = functools.partial(_affine_act_res_kernel, act=act,
                             has_res=res is not None, relu_res=relu_res)
    out = pl.pallas_call(
        kern, out_shape=jax.ShapeDtypeStruct((R, L), jnp.float32),
        grid=(grid_r,), in_specs=in_specs,
        out_specs=pl.BlockSpec((tr, L), lambda i: (i, 0)),
        compiler_params=pltpu.CompilerParams(dimension_semantics=("parallel",)),
    )(*args)
    return out.reshape(M, N)


def _vq_kernel(x_ref, cb_ref, cbsq_ref, q_ref, idx_ref, sq_ref):
    x = x_ref[...]                                   # (tn, D)
    cb = cb_ref[...]                                 # (K, D)
    K = cb.shape[0]
    # x @ cb.T on the MXU without materializing a transpose.
    dots = lax.dot_general(x, cb, (((1,), (1,)), ((), ())),
                           preferred_element_type=jnp.float32)      # (tn, K)
    x_sq = jnp.sum(x * x, axis=-1, keepdims=True)
    dist = x_sq - 2.0 * dots + cbsq_ref[...]         # same argmin as torch.cdist
    iota = lax.broadcasted_iota(jnp.int32, dist.shape, 1)
    min_d = jnp.min(dist, axis=-1, keepdims=True)
    idx = jnp.min(jnp.where(dist <= min_d, iota, K), axis=-1, keepdims=True)
    idx_ref[...] = idx
    onehot = (iota == idx).astype(jnp.float32)
    quant = jnp.dot(onehot, cb, preferred_element_type=jnp.float32)  # gather
    q_ref[...] = quant
    d = quant - x
    sq_ref[...] = jnp.sum(d * d, axis=-1, keepdims=True)             # per-row SSE


def vq_quantize(x2d, codebook):
    N, D = x2d.shape
    K = codebook.shape[0]
    cb_sq = jnp.sum(codebook * codebook, axis=1).reshape(1, K)
    tn = _pick_tile(N, 256)          # keeps the (tn, K) distance block small (v7x VMEM)
    grid_n = N // tn
    q, idx, sq = pl.pallas_call(
        _vq_kernel,
        out_shape=(jax.ShapeDtypeStruct((N, D), jnp.float32),
                   jax.ShapeDtypeStruct((N, 1), jnp.int32),
                   jax.ShapeDtypeStruct((N, 1), jnp.float32)),
        grid=(grid_n,),
        in_specs=[pl.BlockSpec((tn, D), lambda i: (i, 0)),
                  pl.BlockSpec((K, D), lambda i: (0, 0)),
                  pl.BlockSpec((1, K), lambda i: (0, 0))],
        out_specs=(pl.BlockSpec((tn, D), lambda i: (i, 0)),
                   pl.BlockSpec((tn, 1), lambda i: (i, 0)),
                   pl.BlockSpec((tn, 1), lambda i: (i, 0))),
        compiler_params=pltpu.CompilerParams(dimension_semantics=("parallel",)),
    )(x2d, codebook, cb_sq)
    loss = jnp.sum(sq) / (N * D)
    return q, idx[:, 0], loss


# --------------------------- conv / BN glue -----------------------------------

def _im2col(x, kh, kw, stride, pad):
    # TODO(synk): im2col patches are still materialized in HBM by XLA glue; folding
    # the kh*kw taps into the GEMM grid (VMEM accumulator + sliding index_map)
    # would remove this traffic entirely.
    B, H, W, C = x.shape
    if pad:
        x = jnp.pad(x, ((0, 0), (pad, pad), (pad, pad), (0, 0)))
    Ho = (H + 2 * pad - kh) // stride + 1
    Wo = (W + 2 * pad - kw) // stride + 1
    cols = []
    for i in range(kh):
        for j in range(kw):
            cols.append(x[:, i:i + stride * Ho:stride, j:j + stride * Wo:stride, :])
    patches = jnp.concatenate(cols, axis=-1)
    return patches.reshape(B * Ho * Wo, kh * kw * C), Ho, Wo


def _conv_w(w):
    # PyTorch Conv2d weight (Cout, Cin, kh, kw) -> (kh*kw*Cin, Cout) bf16 matrix.
    Cout, Cin, kh, kw = w.shape
    return jnp.transpose(w, (2, 3, 1, 0)).reshape(kh * kw * Cin, Cout).astype(jnp.bfloat16)


def _convt_subpixel_w(wt):
    # PyTorch ConvTranspose2d weight (Cin, Cout, 4, 4) with stride=2, padding=1 ->
    # sub-pixel GEMM matrix (9*Cin, 4*Cout).  A single 3x3/pad1/stride1 GEMM over
    # the input resolution produces all four (2x upsampling) output phases.
    Cin, Cout, kh, kw = wt.shape
    taps = []
    for pr in range(3):
        for pc in range(3):
            phases = []
            for a in range(2):
                for b in range(2):
                    u, v = 2 * pr - a, 2 * pc - b
                    if 0 <= u < kh and 0 <= v < kw:
                        phases.append(wt[:, :, kh - 1 - u, kw - 1 - v])  # (Cin, Cout)
                    else:
                        phases.append(jnp.zeros((Cin, Cout), wt.dtype))
            taps.append(jnp.concatenate(phases, axis=1))                 # (Cin, 4*Cout)
    w = jnp.stack(taps, axis=0).reshape(9 * Cin, 4 * Cout)
    return w.astype(jnp.bfloat16)


def _subpixel_reorder(y2d, B, H, W, Cout):
    # (B*H*W, 4*Cout) phase-major layout -> (B, 2H, 2W, Cout) NHWC.
    y = y2d.reshape(B, H, W, 2, 2, Cout)
    return jnp.transpose(y, (0, 1, 3, 2, 4, 5)).reshape(B, 2 * H, 2 * W, Cout)


def _bn_from_stats(stats2, count, gamma, beta):
    # stats2: (2, C) = [sum, sum-of-squares] of the conv output (incl. bias).
    mean = stats2[0] / count
    var = stats2[1] / count - mean * mean      # biased var, as PyTorch normalizes with
    scale = gamma * lax.rsqrt(var + BN_EPS)
    shift = beta - mean * scale
    return scale, shift


def resblock(x_nhwc, rp):
    # PyTorch: x + Sequential(ReLU(inplace=True), Conv3x3, BN, ReLU, Conv1x1, BN)(x).
    # NOTE: the in-place ReLU mutates the tensor bound to `x`, so the value added on
    # the skip path is relu(x); we reproduce that faithfully (relu_res=True).
    B, H, W, C = x_nhwc.shape
    M = B * H * W
    x2 = x_nhwc.reshape(M, C)

    # Conv3x3 with the leading ReLU fused on the GEMM input; BN1 stats from epilogue.
    a, _, _ = _im2col(x_nhwc, 3, 3, 1, 1)
    h1, st1 = gemm_fused(a.astype(jnp.bfloat16), _conv_w(rp["w1"]), rp["b1"],
                         relu_in=True, emit_stats=True)
    sc1, sh1 = _bn_from_stats(st1.sum(axis=0), M, rp["bn1_g"], rp["bn1_b"])

    # Conv1x1 with BN1 affine + ReLU fused into its input (no padding -> exact);
    # BN2 stats from the epilogue.
    h2, st2 = gemm_fused(h1, _conv_w(rp["w2"]), rp["b2"],
                         in_scale=sc1, in_shift=sh1, relu_in=True, emit_stats=True)
    sc2, sh2 = _bn_from_stats(st2.sum(axis=0), M, rp["bn2_g"], rp["bn2_b"])

    # BN2 affine + residual add (relu'd skip) in one lane-dense elementwise kernel.
    out = affine_act(h2, sc2, sh2, act="none", residual=x2, relu_res=True)
    return out.reshape(B, H, W, C)


# --------------------------- model forward ------------------------------------

def vqvae_forward(params, x_nchw):
    p = params
    x = jnp.transpose(x_nchw, (0, 2, 3, 1)).astype(jnp.float32)   # NCHW -> NHWC
    B = x.shape[0]
    C = p["enc_b1"].shape[0]

    # ---------------- encoder ----------------
    # Conv 4x4/s2 + BatchNorm + ReLU (stats ride on the GEMM epilogue).
    a, H1, W1 = _im2col(x, 4, 4, 2, 1)
    h, st = gemm_fused(a.astype(jnp.bfloat16), _conv_w(p["enc_w1"]), p["enc_b1"],
                       emit_stats=True)
    sc, sh = _bn_from_stats(st.sum(axis=0), B * H1 * W1, p["enc_bn_g"], p["enc_bn_b"])
    h = affine_act(h, sc, sh, act="relu").reshape(B, H1, W1, C)

    # Conv 4x4/s2 (no BN / activation before the first ResBlock).
    a, H2, W2 = _im2col(h, 4, 4, 2, 1)
    h = gemm_fused(a.astype(jnp.bfloat16), _conv_w(p["enc_w2"]), p["enc_b2"])
    h = h.reshape(B, H2, W2, C)

    h = resblock(h, p["enc_res1"])
    h = resblock(h, p["enc_res2"])

    # ---------------- pre-codebook 1x1 conv + vector quantization ----------------
    z = gemm_fused(h.reshape(B * H2 * W2, C), _conv_w(p["pre_w"]), p["pre_b"])
    quant, idx, loss = vq_quantize(z, p["codebook"])
    # codebook_loss and commitment_loss are numerically identical in the forward
    # pass (detach() only changes gradients); straight-through output == quant.
    quantize_losses = {"codebook_loss": loss, "commitment_loss": loss}
    min_encoding_indices = idx.reshape(B, H2, W2)

    # ---------------- decoder ----------------
    d = gemm_fused(quant, _conv_w(p["post_w"]), p["post_b"]).reshape(B, H2, W2, C)
    d = resblock(d, p["dec_res1"])
    d = resblock(d, p["dec_res2"])

    # ConvTranspose 4x4/s2 (sub-pixel GEMM, lane-dense 4*C columns) + BN + ReLU.
    a, _, _ = _im2col(d, 3, 3, 1, 1)
    y, st = gemm_fused(a.astype(jnp.bfloat16), _convt_subpixel_w(p["dec_wt1"]),
                       jnp.tile(p["dec_bt1"], 4), emit_stats=True)
    stc = st.sum(axis=0).reshape(2, 4, C).sum(axis=1)        # fold the 4 phases
    sc, sh = _bn_from_stats(stc, B * H2 * W2 * 4, p["dec_bn_g"], p["dec_bn_b"])
    y = affine_act(y, jnp.tile(sc, 4), jnp.tile(sh, 4), act="relu")
    d = _subpixel_reorder(y, B, H2, W2, C)                   # (B, 2*H2, 2*W2, C)

    # ConvTranspose 4x4/s2 (sub-pixel) with Tanh fused in the GEMM epilogue.
    Cout = p["dec_bt2"].shape[0]
    a, _, _ = _im2col(d, 3, 3, 1, 1)
    y = gemm_fused(a.astype(jnp.bfloat16), _convt_subpixel_w(p["dec_wt2"]),
                   jnp.tile(p["dec_bt2"], 4), act="tanh")
    x_hat = _subpixel_reorder(y, B, 2 * H2, 2 * W2, Cout)
    x_hat = jnp.transpose(x_hat, (0, 3, 1, 2))               # NHWC -> NCHW
    return x_hat, quantize_losses, min_encoding_indices


# --------------------------- parameter init ------------------------------------

def init_params(key, input_dim, dim, K):
    keys = iter(jax.random.split(key, 64))

    def nrm(shape, fan_in):
        return jax.random.normal(next(keys), shape, jnp.float32) / jnp.sqrt(
            jnp.float32(fan_in)
        )

    def res_params():
        return {
            "w1": nrm((dim, dim, 3, 3), dim * 9),
            "b1": jnp.zeros((dim,), jnp.float32),
            "bn1_g": jnp.ones((dim,), jnp.float32),
            "bn1_b": jnp.zeros((dim,), jnp.float32),
            "w2": nrm((dim, dim, 1, 1), dim),
            "b2": jnp.zeros((dim,), jnp.float32),
            "bn2_g": jnp.ones((dim,), jnp.float32),
            "bn2_b": jnp.zeros((dim,), jnp.float32),
        }

    return {
        "enc_w1": nrm((dim, input_dim, 4, 4), input_dim * 16),
        "enc_b1": jnp.zeros((dim,), jnp.float32),
        "enc_bn_g": jnp.ones((dim,), jnp.float32),
        "enc_bn_b": jnp.zeros((dim,), jnp.float32),
        "enc_w2": nrm((dim, dim, 4, 4), dim * 16),
        "enc_b2": jnp.zeros((dim,), jnp.float32),
        "enc_res1": res_params(),
        "enc_res2": res_params(),
        "pre_w": nrm((dim, dim, 1, 1), dim),
        "pre_b": jnp.zeros((dim,), jnp.float32),
        "codebook": jax.random.uniform(
            next(keys), (K, dim), jnp.float32, minval=-1.0 / K, maxval=1.0 / K
        ),
        "post_w": nrm((dim, dim, 1, 1), dim),
        "post_b": jnp.zeros((dim,), jnp.float32),
        "dec_res1": res_params(),
        "dec_res2": res_params(),
        "dec_wt1": nrm((dim, dim, 4, 4), dim * 16),   # ConvTranspose2d: (Cin, Cout, k, k)
        "dec_bt1": jnp.zeros((dim,), jnp.float32),
        "dec_bn_g": jnp.ones((dim,), jnp.float32),
        "dec_bn_b": jnp.zeros((dim,), jnp.float32),
        "dec_wt2": nrm((dim, input_dim, 4, 4), dim * 16),
        "dec_bt2": jnp.zeros((input_dim,), jnp.float32),
    }


# --------------------------- main -----------------------------------------------

if __name__ == "__main__":
    input_dim, dim, K = 4, 32, 512
    B, H, W = 2, 16, 16

    key = jax.random.PRNGKey(0)
    pkey, xkey = jax.random.split(key)
    params = init_params(pkey, input_dim, dim, K)
    x = jax.random.normal(xkey, (B, input_dim, H, W), jnp.float32)  # NCHW input

    fwd = jax.jit(functools.partial(vqvae_forward, params))
    x_hat, losses, indices = fwd(x)
    jax.block_until_ready((x_hat, losses, indices))

    assert x_hat.shape == (B, input_dim, H, W)
    assert x_hat.dtype == jnp.float32
    assert indices.shape == (B, H // 4, W // 4)
    assert indices.dtype == jnp.int32
    assert losses["codebook_loss"].shape == ()
    assert losses["commitment_loss"].shape == ()

    print("KERNEL_OK")
</pallas_src>

<mosaic_0001>
module attributes {stable_mosaic.version = 11 : i64} {
  func.func @_gemm_fused_kernel(%arg0: i32, %arg1: memref<128x64xbf16, #tpu.memory_space<vmem>>, %arg2: memref<64x32xbf16, #tpu.memory_space<vmem>>, %arg3: memref<1x32xf32, #tpu.memory_space<vmem>>, %arg4: memref<128x32xf32, #tpu.memory_space<vmem>>, %arg5: memref<1x2x32xf32, #tpu.memory_space<vmem>>) attributes {dimension_semantics = [#tpu.dimension_semantics<parallel>], iteration_bounds = array<i64: 1>, scalar_prefetch = 0 : i64, scratch_operands = 0 : i64, tpu.core_type = #tpu.core_type<tc>, window_params = [{transform_indices = @transform_0, window_bounds = array<i64: 128, 64>}, {pipeline_mode = #tpu.pipeline_mode<synchronous>, transform_indices = @transform_1, window_bounds = array<i64: 64, 32>}, {pipeline_mode = #tpu.pipeline_mode<synchronous>, transform_indices = @transform_2, window_bounds = array<i64: 1, 32>}, {transform_indices = @transform_3, window_bounds = array<i64: 128, 32>}, {transform_indices = @transform_4, window_bounds = array<i64: 1, 2, 32>}]} {
    %c0 = arith.constant 0 : index
    %c0_0 = arith.constant 0 : index
    %0 = vector.load %arg1[%c0, %c0_0] : memref<128x64xbf16, #tpu.memory_space<vmem>>, vector<128x64xbf16>
    %c0_1 = arith.constant 0 : index
    %c0_2 = arith.constant 0 : index
    %1 = vector.load %arg2[%c0_1, %c0_2] : memref<64x32xbf16, #tpu.memory_space<vmem>>, vector<64x32xbf16>
    %cst = arith.constant dense<0.000000e+00> : vector<128x32xf32>
    %2 = tpu.matmul %0, %1, %cst {dimension_numbers = #tpu.dot_dimension_numbers<[1], [0], [0], [1], [0, 0, 1, 1], [], []>} : vector<128x64xbf16>, vector<64x32xbf16>, vector<128x32xf32> -> vector<128x32xf32>
    %c0_3 = arith.constant 0 : index
    %c0_4 = arith.constant 0 : index
    %3 = vector.load %arg3[%c0_3, %c0_4] : memref<1x32xf32, #tpu.memory_space<vmem>>, vector<1x32xf32>
    %4 = vector.broadcast %3 : vector<1x32xf32> to vector<128x32xf32>
    %5 = arith.addf %2, %4 : vector<128x32xf32>
    %cst_5 = arith.constant dense<0.000000e+00> : vector<32xf32>
    %6 = vector.multi_reduction <add>, %5, %cst_5 [0] : vector<128x32xf32> to vector<32xf32>
    %7 = vector.shape_cast %6 : vector<32xf32> to vector<1x32xf32>
    %8 = arith.mulf %5, %5 : vector<128x32xf32>
    %cst_6 = arith.constant dense<0.000000e+00> : vector<32xf32>
    %9 = vector.multi_reduction <add>, %8, %cst_6 [0] : vector<128x32xf32> to vector<32xf32>
    %10 = vector.shape_cast %9 : vector<32xf32> to vector<1x32xf32>
    %11 = tpu.concatenate %7, %10 in 0 : vector<1x32xf32>, vector<1x32xf32> -> vector<2x32xf32>
    %12 = vector.shape_cast %11 : vector<2x32xf32> to vector<1x2x32xf32>
    %c0_7 = arith.constant 0 : index
    %c0_8 = arith.constant 0 : index
    %c0_9 = arith.constant 0 : index
    %13 = vector.load %arg5[%c0_7, %c0_8, %c0_9] : memref<1x2x32xf32, #tpu.memory_space<vmem>>, vector<1x2x32xf32>
    tpu.vector_store %arg5[%c0_7, %c0_8, %c0_9], %12 {strides = array<i32>} : memref<1x2x32xf32, #tpu.memory_space<vmem>>, vector<1x2x32xf32>,
    %c0_10 = arith.constant 0 : index
    %c0_11 = arith.constant 0 : index
    %14 = vector.load %arg4[%c0_10, %c0_11] : memref<128x32xf32, #tpu.memory_space<vmem>>, vector<128x32xf32>
    tpu.vector_store %arg4[%c0_10, %c0_11], %5 {strides = array<i32>} : memref<128x32xf32, #tpu.memory_space<vmem>>, vector<128x32xf32>,
    return
  }
  func.func @transform_0(%arg0: i32) -> (i32, i32) {
    %c0_i32 = arith.constant 0 : i32
    %c0_i32_0 = arith.constant 0 : i32
    return %arg0, %c0_i32 : i32, i32
  }
  func.func @transform_1(%arg0: i32) -> (i32, i32) {
    %c0_i32 = arith.constant 0 : i32
    %c0_i32_0 = arith.constant 0 : i32
    %c0_i32_1 = arith.constant 0 : i32
    return %c0_i32, %c0_i32_0 : i32, i32
  }
  func.func @transform_2(%arg0: i32) -> (i32, i32) {
    %c0_i32 = arith.constant 0 : i32
    %c0_i32_0 = arith.constant 0 : i32
    %c0_i32_1 = arith.constant 0 : i32
    return %c0_i32, %c0_i32_0 : i32, i32
  }
  func.func @transform_3(%arg0: i32) -> (i32, i32) {
    %c0_i32 = arith.constant 0 : i32
    %c0_i32_0 = arith.constant 0 : i32
    return %arg0, %c0_i32 : i32, i32
  }
  func.func @transform_4(%arg0: i32) -> (i32, i32, i32) {
    %c0_i32 = arith.constant 0 : i32
    %c0_i32_0 = arith.constant 0 : i32
    %c0_i32_1 = arith.constant 0 : i32
    return %arg0, %c0_i32, %c0_i32_0 : i32, i32, i32
  }
}

module attributes {stable_mosaic.version = 11 : i64} {
  func.func @_affine_act_res_kernel(%arg0: i32, %arg1: memref<32x128xf32, #tpu.memory_space<vmem>>, %arg2: memref<1x128xf32, #tpu.memory_space<vmem>>, %arg3: memref<1x128xf32, #tpu.memory_space<vmem>>, %arg4: memref<32x128xf32, #tpu.memory_space<vmem>>) attributes {dimension_semantics = [#tpu.dimension_semantics<parallel>], iteration_bounds = array<i64: 1>, scalar_prefetch = 0 : i64, scratch_operands = 0 : i64, tpu.core_type = #tpu.core_type<tc>, window_params = [{transform_indices = @transform_0, window_bounds = array<i64: 32, 128>}, {pipeline_mode = #tpu.pipeline_mode<synchronous>, transform_indices = @transform_1, window_bounds = array<i64: 1, 128>}, {pipeline_mode = #tpu.pipeline_mode<synchronous>, transform_indices = @transform_2, window_bounds = array<i64: 1, 128>}, {transform_indices = @transform_3, window_bounds = array<i64: 32, 128>}]} {
    %c0 = arith.constant 0 : index
    %c0_0 = arith.constant 0 : index
    %0 = vector.load %arg1[%c0, %c0_0] : memref<32x128xf32, #tpu.memory_space<vmem>>, vector<32x128xf32>
    %c0_1 = arith.constant 0 : index
    %c0_2 = arith.constant 0 : index
    %1 = vector.load %arg2[%c0_1, %c0_2] : memref<1x128xf32, #tpu.memory_space<vmem>>, vector<1x128xf32>
    %2 = vector.broadcast %1 : vector<1x128xf32> to vector<32x128xf32>
    %3 = arith.mulf %0, %2 : vector<32x128xf32>
    %c0_3 = arith.constant 0 : index
    %c0_4 = arith.constant 0 : index
    %4 = vector.load %arg3[%c0_3, %c0_4] : memref<1x128xf32, #tpu.memory_space<vmem>>, vector<1x128xf32>
    %5 = vector.broadcast %4 : vector<1x128xf32> to vector<32x128xf32>
    %6 = arith.addf %3, %5 : vector<32x128xf32>
    %cst = arith.constant 0.000000e+00 : f32
    %7 = vector.broadcast %cst : f32 to vector<32x128xf32>
    %8 = arith.maximumf %6, %7 : vector<32x128xf32>
    %c0_5 = arith.constant 0 : index
    %c0_6 = arith.constant 0 : index
    %9 = vector.load %arg4[%c0_5, %c0_6] : memref<32x128xf32, #tpu.memory_space<vmem>>, vector<32x128xf32>
    tpu.vector_store %arg4[%c0_5, %c0_6], %8 {strides = array<i32>} : memref<32x128xf32, #tpu.memory_space<vmem>>, vector<32x128xf32>,
    return
  }
  func.func @transform_0(%arg0: i32) -> (i32, i32) {
    %c0_i32 = arith.constant 0 : i32
    %c0_i32_0 = arith.constant 0 : i32
    return %arg0, %c0_i32 : i32, i32
  }
  func.func @transform_1(%arg0: i32) -> (i32, i32) {
    %c0_i32 = arith.constant 0 : i32
    %c0_i32_0 = arith.constant 0 : i32
    %c0_i32_1 = arith.constant 0 : i32
    return %c0_i32, %c0_i32_0 : i32, i32
  }
  func.func @transform_2(%arg0: i32) -> (i32, i32) {
    %c0_i32 = arith.constant 0 : i32
    %c0_i32_0 = arith.constant 0 : i32
    %c0_i32_1 = arith.constant 0 : i32
    return %c0_i32, %c0_i32_0 : i32, i32
  }
  func.func @transform_3(%arg0: i32) -> (i32, i32) {
    %c0_i32 = arith.constant 0 : i32
    %c0_i32_0 = arith.constant 0 : i32
    return %arg0, %c0_i32 : i32, i32
  }
}

module attributes {stable_mosaic.version = 11 : i64} {
  func.func @_gemm_fused_kernel(%arg0: i32, %arg1: memref<32x512xbf16, #tpu.memory_space<vmem>>, %arg2: memref<512x32xbf16, #tpu.memory_space<vmem>>, %arg3: memref<1x32xf32, #tpu.memory_space<vmem>>, %arg4: memref<32x32xf32, #tpu.memory_space<vmem>>) attributes {dimension_semantics = [#tpu.dimension_semantics<parallel>], iteration_bounds = array<i64: 1>, scalar_prefetch = 0 : i64, scratch_operands = 0 : i64, tpu.core_type = #tpu.core_type<tc>, window_params = [{transform_indices = @transform_0, window_bounds = array<i64: 32, 512>}, {pipeline_mode = #tpu.pipeline_mode<synchronous>, transform_indices = @transform_1, window_bounds = array<i64: 512, 32>}, {pipeline_mode = #tpu.pipeline_mode<synchronous>, transform_indices = @transform_2, window_bounds = array<i64: 1, 32>}, {transform_indices = @transform_3, window_bounds = array<i64: 32, 32>}]} {
    %c0 = arith.constant 0 : index
    %c0_0 = arith.constant 0 : index
    %0 = vector.load %arg1[%c0, %c0_0] : memref<32x512xbf16, #tpu.memory_space<vmem>>, vector<32x512xbf16>
    %c0_1 = arith.constant 0 : index
    %c0_2 = arith.constant 0 : index
    %1 = vector.load %arg2[%c0_1, %c0_2] : memref<512x32xbf16, #tpu.memory_space<vmem>>, vector<512x32xbf16>
    %cst = arith.constant dense<0.000000e+00> : vector<32x32xf32>
    %2 = tpu.matmul %0, %1, %cst {dimension_numbers = #tpu.dot_dimension_numbers<[1], [0], [0], [1], [0, 0, 1, 1], [], []>} : vector<32x512xbf16>, vector<512x32xbf16>, vector<32x32xf32> -> vector<32x32xf32>
    %c0_3 = arith.constant 0 : index
    %c0_4 = arith.constant 0 : index
    %3 = vector.load %arg3[%c0_3, %c0_4] : memref<1x32xf32, #tpu.memory_space<vmem>>, vector<1x32xf32>
    %4 = vector.broadcast %3 : vector<1x32xf32> to vector<32x32xf32>
    %5 = arith.addf %2, %4 : vector<32x32xf32>
    %c0_5 = arith.constant 0 : index
    %c0_6 = arith.constant 0 : index
    %6 = vector.load %arg4[%c0_5, %c0_6] : memref<32x32xf32, #tpu.memory_space<vmem>>, vector<32x32xf32>
    tpu.vector_store %arg4[%c0_5, %c0_6], %5 {strides = array<i32>} : memref<32x32xf32, #tpu.memory_space<vmem>>, vector<32x32xf32>,
    return
  }
  func.func @transform_0(%arg0: i32) -> (i32, i32) {
    %c0_i32 = arith.constant 0 : i32
    %c0_i32_0 = arith.constant 0 : i32
    return %arg0, %c0_i32 : i32, i32
  }
  func.func @transform_1(%arg0: i32) -> (i32, i32) {
    %c0_i32 = arith.constant 0 : i32
    %c0_i32_0 = arith.constant 0 : i32
    %c0_i32_1 = arith.constant 0 : i32
    return %c0_i32, %c0_i32_0 : i32, i32
  }
  func.func @transform_2(%arg0: i32) -> (i32, i32) {
    %c0_i32 = arith.constant 0 : i32
    %c0_i32_0 = arith.constant 0 : i32
    %c0_i32_1 = arith.constant 0 : i32
    return %c0_i32, %c0_i32_0 : i32, i32
  }
  func.func @transform_3(%arg0: i32) -> (i32, i32) {
    %c0_i32 = arith.constant 0 : i32
    %c0_i32_0 = arith.constant 0 : i32
    return %arg0, %c0_i32 : i32, i32
  }
}

module attributes {stable_mosaic.version = 11 : i64} {
  func.func @_gemm_fused_kernel(%arg0: i32, %arg1: memref<32x32xf32, #tpu.memory_space<vmem>>, %arg2: memref<32x32xbf16, #tpu.memory_space<vmem>>, %arg3: memref<1x32xf32, #tpu.memory_space<vmem>>, %arg4: memref<1x32xf32, #tpu.memory_space<vmem>>, %arg5: memref<1x32xf32, #tpu.memory_space<vmem>>, %arg6: memref<32x32xf32, #tpu.memory_space<vmem>>, %arg7: memref<1x2x32xf32, #tpu.memory_space<vmem>>) attributes {dimension_semantics = [#tpu.dimension_semantics<parallel>], iteration_bounds = array<i64: 1>, scalar_prefetch = 0 : i64, scratch_operands = 0 : i64, tpu.core_type = #tpu.core_type<tc>, window_params = [{transform_indices = @transform_0, window_bounds = array<i64: 32, 32>}, {pipeline_mode = #tpu.pipeline_mode<synchronous>, transform_indices = @transform_1, window_bounds = array<i64: 32, 32>}, {pipeline_mode = #tpu.pipeline_mode<synchronous>, transform_indices = @transform_2, window_bounds = array<i64: 1, 32>}, {pipeline_mode = #tpu.pipeline_mode<synchronous>, transform_indices = @transform_3, window_bounds = array<i64: 1, 32>}, {pipeline_mode = #tpu.pipeline_mode<synchronous>, transform_indices = @transform_4, window_bounds = array<i64: 1, 32>}, {transform_indices = @transform_5, window_bounds = array<i64: 32, 32>}, {transform_indices = @transform_6, window_bounds = array<i64: 1, 2, 32>}]} {
    %c0 = arith.constant 0 : index
    %c0_0 = arith.constant 0 : index
    %0 = vector.load %arg1[%c0, %c0_0] : memref<32x32xf32, #tpu.memory_space<vmem>>, vector<32x32xf32>
    %c0_1 = arith.constant 0 : index
    %c0_2 = arith.constant 0 : index
    %1 = vector.load %arg4[%c0_1, %c0_2] : memref<1x32xf32, #tpu.memory_space<vmem>>, vector<1x32xf32>
    %2 = vector.broadcast %1 : vector<1x32xf32> to vector<32x32xf32>
    %3 = arith.mulf %0, %2 : vector<32x32xf32>
    %c0_3 = arith.constant 0 : index
    %c0_4 = arith.constant 0 : index
    %4 = vector.load %arg5[%c0_3, %c0_4] : memref<1x32xf32, #tpu.memory_space<vmem>>, vector<1x32xf32>
    %5 = vector.broadcast %4 : vector<1x32xf32> to vector<32x32xf32>
    %6 = arith.addf %3, %5 : vector<32x32xf32>
    %cst = arith.constant 0.000000e+00 : f32
    %7 = vector.broadcast %cst : f32 to vector<32x32xf32>
    %8 = arith.maximumf %6, %7 : vector<32x32xf32>
    %9 = arith.truncf %8 : vector<32x32xf32> to vector<32x32xbf16>
    %c0_5 = arith.constant 0 : index
    %c0_6 = arith.constant 0 : index
    %10 = vector.load %arg2[%c0_5, %c0_6] : memref<32x32xbf16, #tpu.memory_space<vmem>>, vector<32x32xbf16>
    %cst_7 = arith.constant dense<0.000000e+00> : vector<32x32xf32>
    %11 = tpu.matmul %9, %10, %cst_7 {dimension_numbers = #tpu.dot_dimension_numbers<[1], [0], [0], [1], [0, 0, 1, 1], [], []>} : vector<32x32xbf16>, vector<32x32xbf16>, vector<32x32xf32> -> vector<32x32xf32>
    %c0_8 = arith.constant 0 : index
    %c0_9 = arith.constant 0 : index
    %12 = vector.load %arg3[%c0_8, %c0_9] : memref<1x32xf32, #tpu.memory_space<vmem>>, vector<1x32xf32>
    %13 = vector.broadcast %12 : vector<1x32xf32> to vector<32x32xf32>
    %14 = arith.addf %11, %13 : vector<32x32xf32>
    %cst_10 = arith.constant dense<0.000000e+00> : vector<32xf32>
    %15 = vector.multi_reduction <add>, %14, %cst_10 [0] : vector<32x32xf32> to vector<32xf32>
    %16 = vector.shape_cast %15 : vector<32xf32> to vector<1x32xf32>
    %17 = arith.mulf %14, %14 : vector<32x32xf32>
    %cst_11 = arith.constant dense<0.000000e+00> : vector<32xf32>
    %18 = vector.multi_reduction <add>, %17, %cst_11 [0] : vector<32x32xf32> to vector<32xf32>
    %19 = vector.shape_cast %18 : vector<32xf32> to vector<1x32xf32>
    %20 = tpu.concatenate %16, %19 in 0 : vector<1x32xf32>, vector<1x32xf32> -> vector<2x32xf32>
    %21 = vector.shape_cast %20 : vector<2x32xf32> to vector<1x2x32xf32>
    %c0_12 = arith.constant 0 : index
    %c0_13 = arith.constant 0 : index
    %c0_14 = arith.constant 0 : index
    %22 = vector.load %arg7[%c0_12, %c0_13, %c0_14] : memref<1x2x32xf32, #tpu.memory_space<vmem>>, vector<1x2x32xf32>
    tpu.vector_store %arg7[%c0_12, %c0_13, %c0_14], %21 {strides = array<i32>} : memref<1x2x32xf32, #tpu.memory_space<vmem>>, vector<1x2x32xf32>,
    %c0_15 = arith.constant 0 : index
    %c0_16 = arith.constant 0 : index
    %23 = vector.load %arg6[%c0_15, %c0_16] : memref<32x32xf32, #tpu.memory_space<vmem>>, vector<32x32xf32>
    tpu.vector_store %arg6[%c0_15, %c0_16], %14 {strides = array<i32>} : memref<32x32xf32, #tpu.memory_space<vmem>>, vector<32x32xf32>,
    return
  }
  func.func @transform_0(%arg0: i32) -> (i32, i32) {
    %c0_i32 = arith.constant 0 : i32
    %c0_i32_0 = arith.constant 0 : i32
    return %arg0, %c0_i32 : i32, i32
  }
  func.func @transform_1(%arg0: i32) -> (i32, i32) {
    %c0_i32 = arith.constant 0 : i32
    %c0_i32_0 = arith.constant 0 : i32
    %c0_i32_1 = arith.constant 0 : i32
    return %c0_i32, %c0_i32_0 : i32, i32
  }
  func.func @transform_2(%arg0: i32) -> (i32, i32) {
    %c0_i32 = arith.constant 0 : i32
    %c0_i32_0 = arith.constant 0 : i32
    %c0_i32_1 = arith.constant 0 : i32
    return %c0_i32, %c0_i32_0 : i32, i32
  }
  func.func @transform_3(%arg0: i32) -> (i32, i32) {
    %c0_i32 = arith.constant 0 : i32
    %c0_i32_0 = arith.constant 0 : i32
    %c0_i32_1 = arith.constant 0 : i32
    return %c0_i32, %c0_i32_0 : i32, i32
  }
  func.func @transform_4(%arg0: i32) -> (i32, i32) {
    %c0_i32 = arith.constant 0 : i32
    %c0_i32_0 = arith.constant 0 : i32
    %c0_i32_1 = arith.constant 0 : i32
    return %c0_i32, %c0_i32_0 : i32, i32
  }
  func.func @transform_5(%arg0: i32) -> (i32, i32) {
    %c0_i32 = arith.constant 0 : i32
    %c0_i32_0 = arith.constant 0 : i32
    return %arg0, %c0_i32 : i32, i32
  }
  func.func @transform_6(%arg0: i32) -> (i32, i32, i32) {
    %c0_i32 = arith.constant 0 : i32
    %c0_i32_0 = arith.constant 0 : i32
    %c0_i32_1 = arith.constant 0 : i32
    return %arg0, %c0_i32, %c0_i32_0 : i32, i32, i32
  }
}

module attributes {stable_mosaic.version = 11 : i64} {
  func.func @_gemm_fused_kernel(%arg0: i32, %arg1: memref<32x288xbf16, #tpu.memory_space<vmem>>, %arg2: memref<288x32xbf16, #tpu.memory_space<vmem>>, %arg3: memref<1x32xf32, #tpu.memory_space<vmem>>, %arg4: memref<32x32xf32, #tpu.memory_space<vmem>>, %arg5: memref<1x2x32xf32, #tpu.memory_space<vmem>>) attributes {dimension_semantics = [#tpu.dimension_semantics<parallel>], iteration_bounds = array<i64: 1>, scalar_prefetch = 0 : i64, scratch_operands = 0 : i64, tpu.core_type = #tpu.core_type<tc>, window_params = [{transform_indices = @transform_0, window_bounds = array<i64: 32, 288>}, {pipeline_mode = #tpu.pipeline_mode<synchronous>, transform_indices = @transform_1, window_bounds = array<i64: 288, 32>}, {pipeline_mode = #tpu.pipeline_mode<synchronous>, transform_indices = @transform_2, window_bounds = array<i64: 1, 32>}, {transform_indices = @transform_3, window_bounds = array<i64: 32, 32>}, {transform_indices = @transform_4, window_bounds = array<i64: 1, 2, 32>}]} {
    %c0 = arith.constant 0 : index
    %c0_0 = arith.constant 0 : index
    %0 = vector.load %arg1[%c0, %c0_0] : memref<32x288xbf16, #tpu.memory_space<vmem>>, vector<32x288xbf16>
    %cst = arith.constant 0.000000e+00 : bf16
    %1 = vector.broadcast %cst : bf16 to vector<32x288xbf16>
    %2 = arith.maximumf %0, %1 : vector<32x288xbf16>
    %c0_1 = arith.constant 0 : index
    %c0_2 = arith.constant 0 : index
    %3 = vector.load %arg2[%c0_1, %c0_2] : memref<288x32xbf16, #tpu.memory_space<vmem>>, vector<288x32xbf16>
    %cst_3 = arith.constant dense<0.000000e+00> : vector<32x32xf32>
    %4 = tpu.matmul %2, %3, %cst_3 {dimension_numbers = #tpu.dot_dimension_numbers<[1], [0], [0], [1], [0, 0, 1, 1], [], []>} : vector<32x288xbf16>, vector<288x32xbf16>, vector<32x32xf32> -> vector<32x32xf32>
    %c0_4 = arith.constant 0 : index
    %c0_5 = arith.constant 0 : index
    %5 = vector.load %arg3[%c0_4, %c0_5] : memref<1x32xf32, #tpu.memory_space<vmem>>, vector<1x32xf32>
    %6 = vector.broadcast %5 : vector<1x32xf32> to vector<32x32xf32>
    %7 = arith.addf %4, %6 : vector<32x32xf32>
    %cst_6 = arith.constant dense<0.000000e+00> : vector<32xf32>
    %8 = vector.multi_reduction <add>, %7, %cst_6 [0] : vector<32x32xf32> to vector<32xf32>
    %9 = vector.shape_cast %8 : vector<32xf32> to vector<1x32xf32>
    %10 = arith.mulf %7, %7 : vector<32x32xf32>
    %cst_7 = arith.constant dense<0.000000e+00> : vector<32xf32>
    %11 = vector.multi_reduction <add>, %10, %cst_7 [0] : vector<32x32xf32> to vector<32xf32>
    %12 = vector.shape_cast %11 : vector<32xf32> to vector<1x32xf32>
    %13 = tpu.concatenate %9, %12 in 0 : vector<1x32xf32>, vector<1x32xf32> -> vector<2x32xf32>
    %14 = vector.shape_cast %13 : vector<2x32xf32> to vector<1x2x32xf32>
    %c0_8 = arith.constant 0 : index
    %c0_9 = arith.constant 0 : index
    %c0_10 = arith.constant 0 : index
    %15 = vector.load %arg5[%c0_8, %c0_9, %c0_10] : memref<1x2x32xf32, #tpu.memory_space<vmem>>, vector<1x2x32xf32>
    tpu.vector_store %arg5[%c0_8, %c0_9, %c0_10], %14 {strides = array<i32>} : memref<1x2x32xf32, #tpu.memory_space<vmem>>, vector<1x2x32xf32>,
    %c0_11 = arith.constant 0 : index
    %c0_12 = arith.constant 0 : index
    %16 = vector.load %arg4[%c0_11, %c0_12] : memref<32x32xf32, #tpu.memory_space<vmem>>, vector<32x32xf32>
    tpu.vector_store %arg4[%c0_11, %c0_12], %7 {strides = array<i32>} : memref<32x32xf32, #tpu.memory_space<vmem>>, vector<32x32xf32>,
    return
  }
  func.func @transform_0(%arg0: i32) -> (i32, i32) {
    %c0_i32 = arith.constant 0 : i32
    %c0_i32_0 = arith.constant 0 : i32
    return %arg0, %c0_i32 : i32, i32
  }
  func.func @transform_1(%arg0: i32) -> (i32, i32) {
    %c0_i32 = arith.constant 0 : i32
    %c0_i32_0 = arith.constant 0 : i32
    %c0_i32_1 = arith.constant 0 : i32
    return %c0_i32, %c0_i32_0 : i32, i32
  }
  func.func @transform_2(%arg0: i32) -> (i32, i32) {
    %c0_i32 = arith.constant 0 : i32
    %c0_i32_0 = arith.constant 0 : i32
    %c0_i32_1 = arith.constant 0 : i32
    return %c0_i32, %c0_i32_0 : i32, i32
  }
  func.func @transform_3(%arg0: i32) -> (i32, i32) {
    %c0_i32 = arith.constant 0 : i32
    %c0_i32_0 = arith.constant 0 : i32
    return %arg0, %c0_i32 : i32, i32
  }
  func.func @transform_4(%arg0: i32) -> (i32, i32, i32) {
    %c0_i32 = arith.constant 0 : i32
    %c0_i32_0 = arith.constant 0 : i32
    %c0_i32_1 = arith.constant 0 : i32
    return %arg0, %c0_i32, %c0_i32_0 : i32, i32, i32
  }
}

module attributes {stable_mosaic.version = 11 : i64} {
  func.func @_affine_act_res_kernel(%arg0: i32, %arg1: memref<8x128xf32, #tpu.memory_space<vmem>>, %arg2: memref<1x128xf32, #tpu.memory_space<vmem>>, %arg3: memref<1x128xf32, #tpu.memory_space<vmem>>, %arg4: memref<8x128xf32, #tpu.memory_space<vmem>>, %arg5: memref<8x128xf32, #tpu.memory_space<vmem>>) attributes {dimension_semantics = [#tpu.dimension_semantics<parallel>], iteration_bounds = array<i64: 1>, scalar_prefetch = 0 : i64, scratch_operands = 0 : i64, tpu.core_type = #tpu.core_type<tc>, window_params = [{transform_indices = @transform_0, window_bounds = array<i64: 8, 128>}, {pipeline_mode = #tpu.pipeline_mode<synchronous>, transform_indices = @transform_1, window_bounds = array<i64: 1, 128>}, {pipeline_mode = #tpu.pipeline_mode<synchronous>, transform_indices = @transform_2, window_bounds = array<i64: 1, 128>}, {transform_indices = @transform_3, window_bounds = array<i64: 8, 128>}, {transform_indices = @transform_4, window_bounds = array<i64: 8, 128>}]} {
    %c0 = arith.constant 0 : index
    %c0_0 = arith.constant 0 : index
    %0 = vector.load %arg1[%c0, %c0_0] : memref<8x128xf32, #tpu.memory_space<vmem>>, vector<8x128xf32>
    %c0_1 = arith.constant 0 : index
    %c0_2 = arith.constant 0 : index
    %1 = vector.load %arg2[%c0_1, %c0_2] : memref<1x128xf32, #tpu.memory_space<vmem>>, vector<1x128xf32>
    %2 = vector.broadcast %1 : vector<1x128xf32> to vector<8x128xf32>
    %3 = arith.mulf %0, %2 : vector<8x128xf32>
    %c0_3 = arith.constant 0 : index
    %c0_4 = arith.constant 0 : index
    %4 = vector.load %arg3[%c0_3, %c0_4] : memref<1x128xf32, #tpu.memory_space<vmem>>, vector<1x128xf32>
    %5 = vector.broadcast %4 : vector<1x128xf32> to vector<8x128xf32>
    %6 = arith.addf %3, %5 : vector<8x128xf32>
    %c0_5 = arith.constant 0 : index
    %c0_6 = arith.constant 0 : index
    %7 = vector.load %arg4[%c0_5, %c0_6] : memref<8x128xf32, #tpu.memory_space<vmem>>, vector<8x128xf32>
    %cst = arith.constant 0.000000e+00 : f32
    %8 = vector.broadcast %cst : f32 to vector<8x128xf32>
    %9 = arith.maximumf %7, %8 : vector<8x128xf32>
    %10 = arith.addf %6, %9 : vector<8x128xf32>
    %c0_7 = arith.constant 0 : index
    %c0_8 = arith.constant 0 : index
    %11 = vector.load %arg5[%c0_7, %c0_8] : memref<8x128xf32, #tpu.memory_space<vmem>>, vector<8x128xf32>
    tpu.vector_store %arg5[%c0_7, %c0_8], %10 {strides = array<i32>} : memref<8x128xf32, #tpu.memory_space<vmem>>, vector<8x128xf32>,
    return
  }
  func.func @transform_0(%arg0: i32) -> (i32, i32) {
    %c0_i32 = arith.constant 0 : i32
    %c0_i32_0 = arith.constant 0 : i32
    return %arg0, %c0_i32 : i32, i32
  }
  func.func @transform_1(%arg0: i32) -> (i32, i32) {
    %c0_i32 = arith.constant 0 : i32
    %c0_i32_0 = arith.constant 0 : i32
    %c0_i32_1 = arith.constant 0 : i32
    return %c0_i32, %c0_i32_0 : i32, i32
  }
  func.func @transform_2(%arg0: i32) -> (i32, i32) {
    %c0_i32 = arith.constant 0 : i32
    %c0_i32_0 = arith.constant 0 : i32
    %c0_i32_1 = arith.constant 0 : i32
    return %c0_i32, %c0_i32_0 : i32, i32
  }
  func.func @transform_3(%arg0: i32) -> (i32, i32) {
    %c0_i32 = arith.constant 0 : i32
    %c0_i32_0 = arith.constant 0 : i32
    return %arg0, %c0_i32 : i32, i32
  }
  func.func @transform_4(%arg0: i32) -> (i32, i32) {
    %c0_i32 = arith.constant 0 : i32
    %c0_i32_0 = arith.constant 0 : i32
    return %arg0, %c0_i32 : i32, i32
  }
}

module attributes {stable_mosaic.version = 11 : i64} {
  func.func @_gemm_fused_kernel(%arg0: i32, %arg1: memref<32x32xf32, #tpu.memory_space<vmem>>, %arg2: memref<32x32xbf16, #tpu.memory_space<vmem>>, %arg3: memref<1x32xf32, #tpu.memory_space<vmem>>, %arg4: memref<32x32xf32, #tpu.memory_space<vmem>>) attributes {dimension_semantics = [#tpu.dimension_semantics<parallel>], iteration_bounds = array<i64: 1>, scalar_prefetch = 0 : i64, scratch_operands = 0 : i64, tpu.core_type = #tpu.core_type<tc>, window_params = [{transform_indices = @transform_0, window_bounds = array<i64: 32, 32>}, {pipeline_mode = #tpu.pipeline_mode<synchronous>, transform_indices = @transform_1, window_bounds = array<i64: 32, 32>}, {pipeline_mode = #tpu.pipeline_mode<synchronous>, transform_indices = @transform_2, window_bounds = array<i64: 1, 32>}, {transform_indices = @transform_3, window_bounds = array<i64: 32, 32>}]} {
    %c0 = arith.constant 0 : index
    %c0_0 = arith.constant 0 : index
    %0 = vector.load %arg1[%c0, %c0_0] : memref<32x32xf32, #tpu.memory_space<vmem>>, vector<32x32xf32>
    %1 = arith.truncf %0 : vector<32x32xf32> to vector<32x32xbf16>
    %c0_1 = arith.constant 0 : index
    %c0_2 = arith.constant 0 : index
    %2 = vector.load %arg2[%c0_1, %c0_2] : memref<32x32xbf16, #tpu.memory_space<vmem>>, vector<32x32xbf16>
    %cst = arith.constant dense<0.000000e+00> : vector<32x32xf32>
    %3 = tpu.matmul %1, %2, %cst {dimension_numbers = #tpu.dot_dimension_numbers<[1], [0], [0], [1], [0, 0, 1, 1], [], []>} : vector<32x32xbf16>, vector<32x32xbf16>, vector<32x32xf32> -> vector<32x32xf32>
    %c0_3 = arith.constant 0 : index
    %c0_4 = arith.constant 0 : index
    %4 = vector.load %arg3[%c0_3, %c0_4] : memref<1x32xf32, #tpu.memory_space<vmem>>, vector<1x32xf32>
    %5 = vector.broadcast %4 : vector<1x32xf32> to vector<32x32xf32>
    %6 = arith.addf %3, %5 : vector<32x32xf32>
    %c0_5 = arith.constant 0 : index
    %c0_6 = arith.constant 0 : index
    %7 = vector.load %arg4[%c0_5, %c0_6] : memref<32x32xf32, #tpu.memory_space<vmem>>, vector<32x32xf32>
    tpu.vector_store %arg4[%c0_5, %c0_6], %6 {strides = array<i32>} : memref<32x32xf32, #tpu.memory_space<vmem>>, vector<32x32xf32>,
    return
  }
  func.func @transform_0(%arg0: i32) -> (i32, i32) {
    %c0_i32 = arith.constant 0 : i32
    %c0_i32_0 = arith.constant 0 : i32
    return %arg0, %c0_i32 : i32, i32
  }
  func.func @transform_1(%arg0: i32) -> (i32, i32) {
    %c0_i32 = arith.constant 0 : i32
    %c0_i32_0 = arith.constant 0 : i32
    %c0_i32_1 = arith.constant 0 : i32
    return %c0_i32, %c0_i32_0 : i32, i32
  }
  func.func @transform_2(%arg0: i32) -> (i32, i32) {
    %c0_i32 = arith.constant 0 : i32
    %c0_i32_0 = arith.constant 0 : i32
    %c0_i32_1 = arith.constant 0 : i32
    return %c0_i32, %c0_i32_0 : i32, i32
  }
  func.func @transform_3(%arg0: i32) -> (i32, i32) {
    %c0_i32 = arith.constant 0 : i32
    %c0_i32_0 = arith.constant 0 : i32
    return %arg0, %c0_i32 : i32, i32
  }
}

module attributes {stable_mosaic.version = 11 : i64} {
  func.func @_vq_kernel(%arg0: i32, %arg1: memref<32x32xf32, #tpu.memory_space<vmem>>, %arg2: memref<512x32xf32, #tpu.memory_space<vmem>>, %arg3: memref<1x512xf32, #tpu.memory_space<vmem>>, %arg4: memref<32x32xf32, #tpu.memory_space<vmem>>, %arg5: memref<32x1xi32, #tpu.memory_space<vmem>>, %arg6: memref<32x1xf32, #tpu.memory_space<vmem>>) attributes {dimension_semantics = [#tpu.dimension_semantics<parallel>], iteration_bounds = array<i64: 1>, scalar_prefetch = 0 : i64, scratch_operands = 0 : i64, tpu.core_type = #tpu.core_type<tc>, window_params = [{transform_indices = @transform_0, window_bounds = array<i64: 32, 32>}, {pipeline_mode = #tpu.pipeline_mode<synchronous>, transform_indices = @transform_1, window_bounds = array<i64: 512, 32>}, {pipeline_mode = #tpu.pipeline_mode<synchronous>, transform_indices = @transform_2, window_bounds = array<i64: 1, 512>}, {transform_indices = @transform_3, window_bounds = array<i64: 32, 32>}, {transform_indices = @transform_4, window_bounds = array<i64: 32, 1>}, {transform_indices = @transform_5, window_bounds = array<i64: 32, 1>}]} {
    %c0 = arith.constant 0 : index
    %c0_0 = arith.constant 0 : index
    %0 = vector.load %arg1[%c0, %c0_0] : memref<32x32xf32, #tpu.memory_space<vmem>>, vector<32x32xf32>
    %c0_1 = arith.constant 0 : index
    %c0_2 = arith.constant 0 : index
    %1 = vector.load %arg2[%c0_1, %c0_2] : memref<512x32xf32, #tpu.memory_space<vmem>>, vector<512x32xf32>
    %cst = arith.constant dense<0.000000e+00> : vector<32x512xf32>
    %2 = tpu.matmul %0, %1, %cst {dimension_numbers = #tpu.dot_dimension_numbers<[1], [1], [0], [0], [0, 0, 1, 0], [], []>} : vector<32x32xf32>, vector<512x32xf32>, vector<32x512xf32> -> vector<32x512xf32>
    %3 = arith.mulf %0, %0 : vector<32x32xf32>
    %cst_3 = arith.constant dense<0.000000e+00> : vector<32xf32>
    %4 = vector.multi_reduction <add>, %3, %cst_3 [1] : vector<32x32xf32> to vector<32xf32>
    %5 = vector.shape_cast %4 : vector<32xf32> to vector<32x1xf32>
    %cst_4 = arith.constant 2.000000e+00 : f32
    %6 = vector.broadcast %cst_4 : f32 to vector<32x512xf32>
    %7 = arith.mulf %6, %2 : vector<32x512xf32>
    %8 = vector.broadcast %5 : vector<32x1xf32> to vector<32x512xf32>
    %9 = arith.subf %8, %7 : vector<32x512xf32>
    %c0_5 = arith.constant 0 : index
    %c0_6 = arith.constant 0 : index
    %10 = vector.load %arg3[%c0_5, %c0_6] : memref<1x512xf32, #tpu.memory_space<vmem>>, vector<1x512xf32>
    %11 = vector.broadcast %10 : vector<1x512xf32> to vector<32x512xf32>
    %12 = arith.addf %9, %11 : vector<32x512xf32>
    %13 = tpu.iota {dimensions = array<i32: 1>} : vector<32x512xi32>
    %cst_7 = arith.constant dense<0x7F800000> : vector<32xf32>
    %14 = vector.multi_reduction <minimumf>, %12, %cst_7 [1] : vector<32x512xf32> to vector<32xf32>
    %15 = vector.shape_cast %14 : vector<32xf32> to vector<32x1xf32>
    %16 = vector.broadcast %15 : vector<32x1xf32> to vector<32x512xf32>
    %17 = arith.cmpf ole, %12, %16 : vector<32x512xf32>
    %c512_i32 = arith.constant 512 : i32
    %18 = vector.broadcast %c512_i32 : i32 to vector<32x512xi32>
    %19 = arith.select %17, %13, %18 : vector<32x512xi1>, vector<32x512xi32>
    %cst_8 = arith.constant dense<2147483647> : vector<32xi32>
    %20 = vector.multi_reduction <minsi>, %19, %cst_8 [1] : vector<32x512xi32> to vector<32xi32>
    %21 = vector.shape_cast %20 : vector<32xi32> to vector<32x1xi32>
    %c0_9 = arith.constant 0 : index
    %c0_10 = arith.constant 0 : index
    %22 = vector.load %arg5[%c0_9, %c0_10] : memref<32x1xi32, #tpu.memory_space<vmem>>, vector<32x1xi32>
    tpu.vector_store %arg5[%c0_9, %c0_10], %21 {strides = array<i32>} : memref<32x1xi32, #tpu.memory_space<vmem>>, vector<32x1xi32>,
    %23 = vector.broadcast %21 : vector<32x1xi32> to vector<32x512xi32>
    %24 = arith.cmpi eq, %13, %23 : vector<32x512xi32>
    %25 = arith.extui %24 : vector<32x512xi1> to vector<32x512xi32>
    %26 = arith.sitofp %25 : vector<32x512xi32> to vector<32x512xf32>
    %cst_11 = arith.constant dense<0.000000e+00> : vector<32x32xf32>
    %27 = tpu.matmul %26, %1, %cst_11 {dimension_numbers = #tpu.dot_dimension_numbers<[1], [0], [0], [1], [0, 0, 1, 1], [], []>} : vector<32x512xf32>, vector<512x32xf32>, vector<32x32xf32> -> vector<32x32xf32>
    %c0_12 = arith.constant 0 : index
    %c0_13 = arith.constant 0 : index
    %28 = vector.load %arg4[%c0_12, %c0_13] : memref<32x32xf32, #tpu.memory_space<vmem>>, vector<32x32xf32>
    tpu.vector_store %arg4[%c0_12, %c0_13], %27 {strides = array<i32>} : memref<32x32xf32, #tpu.memory_space<vmem>>, vector<32x32xf32>,
    %29 = arith.subf %27, %0 : vector<32x32xf32>
    %30 = arith.mulf %29, %29 : vector<32x32xf32>
    %cst_14 = arith.constant dense<0.000000e+00> : vector<32xf32>
    %31 = vector.multi_reduction <add>, %30, %cst_14 [1] : vector<32x32xf32> to vector<32xf32>
    %32 = vector.shape_cast %31 : vector<32xf32> to vector<32x1xf32>
    %c0_15 = arith.constant 0 : index
    %c0_16 = arith.constant 0 : index
    %33 = vector.load %arg6[%c0_15, %c0_16] : memref<32x1xf32, #tpu.memory_space<vmem>>, vector<32x1xf32>
    tpu.vector_store %arg6[%c0_15, %c0_16], %32 {strides = array<i32>} : memref<32x1xf32, #tpu.memory_space<vmem>>, vector<32x1xf32>,
    return
  }
  func.func @transform_0(%arg0: i32) -> (i32, i32) {
    %c0_i32 = arith.constant 0 : i32
    %c0_i32_0 = arith.constant 0 : i32
    return %arg0, %c0_i32 : i32, i32
  }
  func.func @transform_1(%arg0: i32) -> (i32, i32) {
    %c0_i32 = arith.constant 0 : i32
    %c0_i32_0 = arith.constant 0 : i32
    %c0_i32_1 = arith.constant 0 : i32
    return %c0_i32, %c0_i32_0 : i32, i32
  }
  func.func @transform_2(%arg0: i32) -> (i32, i32) {
    %c0_i32 = arith.constant 0 : i32
    %c0_i32_0 = arith.constant 0 : i32
    %c0_i32_1 = arith.constant 0 : i32
    return %c0_i32, %c0_i32_0 : i32, i32
  }
  func.func @transform_3(%arg0: i32) -> (i32, i32) {
    %c0_i32 = arith.constant 0 : i32
    %c0_i32_0 = arith.constant 0 : i32
    return %arg0, %c0_i32 : i32, i32
  }
  func.func @transform_4(%arg0: i32) -> (i32, i32) {
    %c0_i32 = arith.constant 0 : i32
    %c0_i32_0 = arith.constant 0 : i32
    return %arg0, %c0_i32 : i32, i32
  }
  func.func @transform_5(%arg0: i32) -> (i32, i32) {
    %c0_i32 = arith.constant 0 : i32
    %c0_i32_0 = arith.constant 0 : i32
    return %arg0, %c0_i32 : i32, i32
  }
}

module attributes {stable_mosaic.version = 11 : i64} {
  func.func @_gemm_fused_kernel(%arg0: i32, %arg1: memref<32x288xbf16, #tpu.memory_space<vmem>>, %arg2: memref<288x128xbf16, #tpu.memory_space<vmem>>, %arg3: memref<1x128xf32, #tpu.memory_space<vmem>>, %arg4: memref<32x128xf32, #tpu.memory_space<vmem>>, %arg5: memref<1x2x128xf32, #tpu.memory_space<vmem>>) attributes {dimension_semantics = [#tpu.dimension_semantics<parallel>], iteration_bounds = array<i64: 1>, scalar_prefetch = 0 : i64, scratch_operands = 0 : i64, tpu.core_type = #tpu.core_type<tc>, window_params = [{transform_indices = @transform_0, window_bounds = array<i64: 32, 288>}, {pipeline_mode = #tpu.pipeline_mode<synchronous>, transform_indices = @transform_1, window_bounds = array<i64: 288, 128>}, {pipeline_mode = #tpu.pipeline_mode<synchronous>, transform_indices = @transform_2, window_bounds = array<i64: 1, 128>}, {transform_indices = @transform_3, window_bounds = array<i64: 32, 128>}, {transform_indices = @transform_4, window_bounds = array<i64: 1, 2, 128>}]} {
    %c0 = arith.constant 0 : index
    %c0_0 = arith.constant 0 : index
    %0 = vector.load %arg1[%c0, %c0_0] : memref<32x288xbf16, #tpu.memory_space<vmem>>, vector<32x288xbf16>
    %c0_1 = arith.constant 0 : index
    %c0_2 = arith.constant 0 : index
    %1 = vector.load %arg2[%c0_1, %c0_2] : memref<288x128xbf16, #tpu.memory_space<vmem>>, vector<288x128xbf16>
    %cst = arith.constant dense<0.000000e+00> : vector<32x128xf32>
    %2 = tpu.matmul %0, %1, %cst {dimension_numbers = #tpu.dot_dimension_numbers<[1], [0], [0], [1], [0, 0, 1, 1], [], []>} : vector<32x288xbf16>, vector<288x128xbf16>, vector<32x128xf32> -> vector<32x128xf32>
    %c0_3 = arith.constant 0 : index
    %c0_4 = arith.constant 0 : index
    %3 = vector.load %arg3[%c0_3, %c0_4] : memref<1x128xf32, #tpu.memory_space<vmem>>, vector<1x128xf32>
    %4 = vector.broadcast %3 : vector<1x128xf32> to vector<32x128xf32>
    %5 = arith.addf %2, %4 : vector<32x128xf32>
    %cst_5 = arith.constant dense<0.000000e+00> : vector<128xf32>
    %6 = vector.multi_reduction <add>, %5, %cst_5 [0] : vector<32x128xf32> to vector<128xf32>
    %7 = vector.shape_cast %6 : vector<128xf32> to vector<1x128xf32>
    %8 = arith.mulf %5, %5 : vector<32x128xf32>
    %cst_6 = arith.constant dense<0.000000e+00> : vector<128xf32>
    %9 = vector.multi_reduction <add>, %8, %cst_6 [0] : vector<32x128xf32> to vector<128xf32>
    %10 = vector.shape_cast %9 : vector<128xf32> to vector<1x128xf32>
    %11 = tpu.concatenate %7, %10 in 0 : vector<1x128xf32>, vector<1x128xf32> -> vector<2x128xf32>
    %12 = vector.shape_cast %11 : vector<2x128xf32> to vector<1x2x128xf32>
    %c0_7 = arith.constant 0 : index
    %c0_8 = arith.constant 0 : index
    %c0_9 = arith.constant 0 : index
    %13 = vector.load %arg5[%c0_7, %c0_8, %c0_9] : memref<1x2x128xf32, #tpu.memory_space<vmem>>, vector<1x2x128xf32>
    tpu.vector_store %arg5[%c0_7, %c0_8, %c0_9], %12 {strides = array<i32>} : memref<1x2x128xf32, #tpu.memory_space<vmem>>, vector<1x2x128xf32>,
    %c0_10 = arith.constant 0 : index
    %c0_11 = arith.constant 0 : index
    %14 = vector.load %arg4[%c0_10, %c0_11] : memref<32x128xf32, #tpu.memory_space<vmem>>, vector<32x128xf32>
    tpu.vector_store %arg4[%c0_10, %c0_11], %5 {strides = array<i32>} : memref<32x128xf32, #tpu.memory_space<vmem>>, vector<32x128xf32>,
    return
  }
  func.func @transform_0(%arg0: i32) -> (i32, i32) {
    %c0_i32 = arith.constant 0 : i32
    %c0_i32_0 = arith.constant 0 : i32
    return %arg0, %c0_i32 : i32, i32
  }
  func.func @transform_1(%arg0: i32) -> (i32, i32) {
    %c0_i32 = arith.constant 0 : i32
    %c0_i32_0 = arith.constant 0 : i32
    %c0_i32_1 = arith.constant 0 : i32
    return %c0_i32, %c0_i32_0 : i32, i32
  }
  func.func @transform_2(%arg0: i32) -> (i32, i32) {
    %c0_i32 = arith.constant 0 : i32
    %c0_i32_0 = arith.constant 0 : i32
    %c0_i32_1 = arith.constant 0 : i32
    return %c0_i32, %c0_i32_0 : i32, i32
  }
  func.func @transform_3(%arg0: i32) -> (i32, i32) {
    %c0_i32 = arith.constant 0 : i32
    %c0_i32_0 = arith.constant 0 : i32
    return %arg0, %c0_i32 : i32, i32
  }
  func.func @transform_4(%arg0: i32) -> (i32, i32, i32) {
    %c0_i32 = arith.constant 0 : i32
    %c0_i32_0 = arith.constant 0 : i32
    %c0_i32_1 = arith.constant 0 : i32
    return %arg0, %c0_i32, %c0_i32_0 : i32, i32, i32
  }
}

module attributes {stable_mosaic.version = 11 : i64} {
  func.func @_gemm_fused_kernel(%arg0: i32, %arg1: memref<128x288xbf16, #tpu.memory_space<vmem>>, %arg2: memref<288x16xbf16, #tpu.memory_space<vmem>>, %arg3: memref<1x16xf32, #tpu.memory_space<vmem>>, %arg4: memref<128x16xf32, #tpu.memory_space<vmem>>) attributes {dimension_semantics = [#tpu.dimension_semantics<parallel>], iteration_bounds = array<i64: 1>, scalar_prefetch = 0 : i64, scratch_operands = 0 : i64, tpu.core_type = #tpu.core_type<tc>, window_params = [{transform_indices = @transform_0, window_bounds = array<i64: 128, 288>}, {pipeline_mode = #tpu.pipeline_mode<synchronous>, transform_indices = @transform_1, window_bounds = array<i64: 288, 16>}, {pipeline_mode = #tpu.pipeline_mode<synchronous>, transform_indices = @transform_2, window_bounds = array<i64: 1, 16>}, {transform_indices = @transform_3, window_bounds = array<i64: 128, 16>}]} {
    %c0 = arith.constant 0 : index
    %c0_0 = arith.constant 0 : index
    %0 = vector.load %arg1[%c0, %c0_0] : memref<128x288xbf16, #tpu.memory_space<vmem>>, vector<128x288xbf16>
    %c0_1 = arith.constant 0 : index
    %c0_2 = arith.constant 0 : index
    %1 = vector.load %arg2[%c0_1, %c0_2] : memref<288x16xbf16, #tpu.memory_space<vmem>>, vector<288x16xbf16>
    %cst = arith.constant dense<0.000000e+00> : vector<128x16xf32>
    %2 = tpu.matmul %0, %1, %cst {dimension_numbers = #tpu.dot_dimension_numbers<[1], [0], [0], [1], [0, 0, 1, 1], [], []>} : vector<128x288xbf16>, vector<288x16xbf16>, vector<128x16xf32> -> vector<128x16xf32>
    %c0_3 = arith.constant 0 : index
    %c0_4 = arith.constant 0 : index
    %3 = vector.load %arg3[%c0_3, %c0_4] : memref<1x16xf32, #tpu.memory_space<vmem>>, vector<1x16xf32>
    %4 = vector.broadcast %3 : vector<1x16xf32> to vector<128x16xf32>
    %5 = arith.addf %2, %4 : vector<128x16xf32>
    %6 = math.tanh %5 : vector<128x16xf32>
    %c0_5 = arith.constant 0 : index
    %c0_6 = arith.constant 0 : index
    %7 = vector.load %arg4[%c0_5, %c0_6] : memref<128x16xf32, #tpu.memory_space<vmem>>, vector<128x16xf32>
    tpu.vector_store %arg4[%c0_5, %c0_6], %6 {strides = array<i32>} : memref<128x16xf32, #tpu.memory_space<vmem>>, vector<128x16xf32>,
    return
  }
  func.func @transform_0(%arg0: i32) -> (i32, i32) {
    %c0_i32 = arith.constant 0 : i32
    %c0_i32_0 = arith.constant 0 : i32
    return %arg0, %c0_i32 : i32, i32
  }
  func.func @transform_1(%arg0: i32) -> (i32, i32) {
    %c0_i32 = arith.constant 0 : i32
    %c0_i32_0 = arith.constant 0 : i32
    %c0_i32_1 = arith.constant 0 : i32
    return %c0_i32, %c0_i32_0 : i32, i32
  }
  func.func @transform_2(%arg0: i32) -> (i32, i32) {
    %c0_i32 = arith.constant 0 : i32
    %c0_i32_0 = arith.constant 0 : i32
    %c0_i32_1 = arith.constant 0 : i32
    return %c0_i32, %c0_i32_0 : i32, i32
  }
  func.func @transform_3(%arg0: i32) -> (i32, i32) {
    %c0_i32 = arith.constant 0 : i32
    %c0_i32_0 = arith.constant 0 : i32
    return %arg0, %c0_i32 : i32, i32
  }
}

</mosaic_0001>

<bundles_post_ra>
// kernel: tile.65
= control target key start
LH: loop header
LB: loop body
LE: loop exit
PB: predicated region body
PF: predicated region fallthrough
CT: control target
= control target key end

     0   :  { %s22_s0 = inlined_call_operand.vmem [shape: f32[32], index: 0, kind: input, shape index: {}]   ;;  %s23_s1 = inlined_call_operand.vmem [shape: f32[4,32], index: 1, kind: output, shape index: {}]  }
   0x1   :  { %v4_v0 = vld [vmem:[%s22_s0] ss:$0 sm:$0xff] }
   0x2   :  { %5 = vst [vmem:[%s23_s1] sm:$0xf] %v4_v0 }

// kernel: tile.70
= control target key start
LH: loop header
LB: loop body
LE: loop exit
PB: predicated region body
PF: predicated region fallthrough
CT: control target
= control target key end

     0   :  { %s37_s8 = smov 32   ;;  %s38_s9 = smov 64   ;;  %vm7_vm0 = vcmask 261120   ;;  %vm13_vm1 = vcmask 1048320   ;;  %vm19_vm2 = vcmask 785920   ;;  %vm25_vm3 = vcmask 523520   ;;  %s55_s0 = inlined_call_operand.vmem [shape: f32[4,32], index: 0, kind: input, shape index: {}]   ;;  %s56_s1 = inlined_call_operand.vmem [shape: f32[1,128], index: 1, kind: output, shape index: {}]  }
   0x1   :  { %v4_v0 = vld [vmem:[%s55_s0] sm:$0xf]  ;;  %s36_s0 = smov 96  }
   0x2   :  { %5 = vst [vmem:[#allocation1] sm:$0xf] %v4_v0 }
   0x9   :  { %v10_v1 = vld [vmem:[#allocation1 + $0x3] sm:$0x1]   ;;  %v22_v2 = vld [vmem:[#allocation1 + $0x1] sm:$0x1]   ;;  %v16_v3 = vld [vmem:[#allocation1 + $0x2] sm:$0x1]  }
   0xa   :  { %11 = vrot.lane.b32.xlu0 %v10_v1, %s36_s0  ;;  %23 = vrot.lane.b32.xlu1 %v22_v2, %s37_s8  ;;  %v6_v4 = vld [vmem:[#allocation1] sm:$0x1]  }
   0xb   :  { %8 = vst.msk [vmem:[#allocation0] sm:$0x1] %vm7_vm0, %v6_v4  }
  0x12   :  { %17 = vrot.lane.b32.xlu0 %v16_v3, %s38_s9 }
  0x7c   :  { %v12_v5 = vpop.permute.xlu0 %11   ;;  %v24_v6 = vpop.permute.xlu1 %23  }
  0x7d   :  { %14 = vst.msk [vmem:[#allocation0] sm:$0x1] %vm13_vm1, %v12_v5  }
  0x84   :  { %v18_v7 = vpop.permute.xlu0 %17  }
  0x85   :  { %20 = vst.msk [vmem:[#allocation0] sm:$0x1] %vm19_vm2, %v18_v7  }
  0x86   :  { %26 = vst.msk [vmem:[#allocation0] sm:$0x1] %vm25_vm3, %v24_v6  }
  0x8d   :  { %v29_v8 = vld [vmem:[#allocation0] sm:$0x1] }
  0x8e   :  { %32 = vst [vmem:[%s56_s1] sm:$0x1] %v29_v8 }

// kernel: vqvae_forward.22
= control target key start
LH: loop header
LB: loop body
LE: loop exit
PB: predicated region body
PF: predicated region fallthrough
CT: control target
= control target key end

     0   :  { %s98_s0 = inlined_call_operand.vmem [shape: f32[32,128], index: 0, kind: input, shape index: {}]   ;;  %s99_s1 = inlined_call_operand.vmem [shape: f32[1,128], index: 1, kind: input, shape index: {}]   ;;  %s100_s2 = inlined_call_operand.vmem [shape: f32[1,128], index: 2, kind: input, shape index: {}]   ;;  %s101_s3 = inlined_call_operand.vmem [shape: f32[32,128], index: 3, kind: output, shape index: {}]  }
   0x1   :  { %v14_v0 = vld [vmem:[%s98_s0] sm:$0xff]  ;;  %v15_v3 = vld [vmem:[%s98_s0 + $0x8] sm:$0xff]  ;;  %v16_v6 = vld [vmem:[%s98_s0 + $0x10] sm:$0xff] }
   0x2   :  { %v46_v1 = vld [vmem:[%s99_s1] ss:$0 sm:$0xff]  ;;  %v17_v7 = vld [vmem:[%s98_s0 + $0x18] sm:$0xff] }
   0x3   :  { %v47_v2 = vld [vmem:[%s100_s2] ss:$0 sm:$0xff]  ;;  %v22_v4 = vmul.f32 %v46_v1, %v14_v0  ;;  %v23_v5 = vmul.f32 %v46_v1, %v15_v3  ;;  %v24_v8 = vmul.f32 %v46_v1, %v16_v6  ;;  %v25_v9 = vmul.f32 %v46_v1, %v17_v7 }
   0x5   :  { %v30_v10 = vadd.f32 %v47_v2, %v22_v4  ;;  %v31_v11 = vadd.f32 %v47_v2, %v23_v5  ;;  %v32_v12 = vadd.f32 %v47_v2, %v24_v8  ;;  %v33_v13 = vadd.f32 %v47_v2, %v25_v9 }
   0x7   :  { %v34_v14 = vmax.f32 %v30_v10, 0.0  ;;  %v35_v15 = vmax.f32 %v31_v11, 0.0  ;;  %v36_v16 = vmax.f32 %v32_v12, 0.0  ;;  %v37_v17 = vmax.f32 %v33_v13, 0.0 }
   0x9   :  { %38 = vst [vmem:[%s101_s3] sm:$0xff] %v34_v14 }
   0xa   :  { %39 = vst [vmem:[%s101_s3 + $0x8] sm:$0xff] %v35_v15 }
   0xb   :  { %40 = vst [vmem:[%s101_s3 + $0x10] sm:$0xff] %v36_v16 }
   0xc   :  { %41 = vst [vmem:[%s101_s3 + $0x18] sm:$0xff] %v37_v17 }

// kernel: vqvae_forward.21
= control target key start
LH: loop header
LB: loop body
LE: loop exit
PB: predicated region body
PF: predicated region fallthrough
CT: control target
= control target key end

     0   :  { %vm109_vm0 = vcmask 523264   ;;  %vm183_vm1 = vcmask 261120   ;;  %vm274_vm2 = vcmask 1040384   ;;  %vm276_vm3 = vcmask 254976   ;;  %s602_s1 = inlined_call_operand.vmem [shape: bf16[64,32], index: 1, kind: input, shape index: {}]   ;;  %s603_s2 = inlined_call_operand.vmem [shape: f32[1,32], index: 2, kind: input, shape index: {}]   ;;  %s604_s0 = inlined_call_operand.vmem [shape: bf16[128,64], index: 0, kind: input, shape index: {}]   ;;  %s605_s3 = inlined_call_operand.vmem [shape: f32[128,32], index: 3, kind: output, shape index: {0}]   ;;  %s606_s4 = inlined_call_operand.vmem [shape: f32[1,2,32], index: 4, kind: output, shape index: {1}]  }
   0x1   :  { %v369_v0 = vld [vmem:[%s602_s1 + $0x18] sm:$0xff]  ;;  %v368_v1 = vld [vmem:[%s602_s1 + $0x10] sm:$0xff]  ;;  %v367_v2 = vld [vmem:[%s602_s1 + $0x8] sm:$0xff] }
   0x2   :  { %138 = vmatpush.bf16.msra.mxu0 %v369_v0  ;;  %370 = vmatpush.bf16.msra.mxu1 %v369_v0  ;;  %v366_v3 = vld [vmem:[%s602_s1] sm:$0xff]  ;;  %v360_v5 = vld [vmem:[%s604_s0 + $0x10] sm:$0xff]  ;;  %v359_v8 = vld [vmem:[%s604_s0 + $0x8] sm:$0xff] }
   0x3   :  { %371 = vmatpush.bf16.msra.mxu2 %v369_v0  ;;  %372 = vmatpush.bf16.msra.mxu3 %v369_v0  ;;  %v358_v4 = vld [vmem:[%s604_s0] sm:$0xff]  ;;  %v364_v7 = vld [vmem:[%s604_s0 + $0x30] sm:$0xff]  ;;  %v361_v9 = vld [vmem:[%s604_s0 + $0x18] sm:$0xff] }
   0x4   :  { %v362_v6 = vld [vmem:[%s604_s0 + $0x20] sm:$0xff]  ;;  %v363_v10 = vld [vmem:[%s604_s0 + $0x28] sm:$0xff]  ;;  %v365_v11 = vld [vmem:[%s604_s0 + $0x38] sm:$0xff] }
   0x5   :  { %v455_v12 = vld [vmem:[%s603_s2] ss:$0 sm:$0xff] }
   0x6   :  { %139 = vmatpush.bf16.msra.mxu0 %v368_v1  ;;  %373 = vmatpush.bf16.msra.mxu1 %v368_v1 }
   0x7   :  { %374 = vmatpush.bf16.msra.mxu2 %v368_v1  ;;  %375 = vmatpush.bf16.msra.mxu3 %v368_v1 }
   0xa   :  { %140 = vmatpush.bf16.msra.mxu0 %v367_v2  ;;  %376 = vmatpush.bf16.msra.mxu1 %v367_v2 }
   0xb   :  { %377 = vmatpush.bf16.msra.mxu2 %v367_v2  ;;  %378 = vmatpush.bf16.msra.mxu3 %v367_v2 }
   0xe   :  { %141 = vmatpush.bf16.msra.mxu0 %v366_v3  ;;  %379 = vmatpush.bf16.msra.mxu1 %v366_v3 }
   0xf   :  { %380 = vmatpush.bf16.msra.mxu2 %v366_v3  ;;  %381 = vmatpush.bf16.msra.mxu3 %v366_v3 }
  0x11   :  { %350 = vmatmul.msk.bf16.vlgmr.msra.gmra.mxu0 %vm109_vm0, %v358_v4  ;;  %352 = vmatmul.msk.bf16.vlgmr.msra.gmra.mxu1 %vm109_vm0, %v360_v5 }
  0x12   :  { %354 = vmatmul.msk.bf16.vlgmr.msra.gmra.mxu2 %vm109_vm0, %v362_v6  ;;  %356 = vmatmul.msk.bf16.vlgmr.msra.gmra.mxu3 %vm109_vm0, %v364_v7 }
  0x21   :  { %351 = vmatmul.msk.bf16.gmra.mxu0 %vm109_vm0, %v359_v8  ;;  %353 = vmatmul.msk.bf16.gmra.mxu1 %vm109_vm0, %v361_v9 }
  0x22   :  { %355 = vmatmul.msk.bf16.gmra.mxu2 %vm109_vm0, %v363_v10  ;;  %357 = vmatmul.msk.bf16.gmra.mxu3 %vm109_vm0, %v365_v11 }
  0x8e   :  { %v143_v13 = vpop.f32.mrf.mxu0  ;;  %v153_v14 = vpop.f32.mrf.mxu1 }
  0x8f   :  { %v144_v15 = vadd.f32 %v455_v12, %v143_v13  ;;  %v154_v16 = vadd.f32 %v455_v12, %v153_v14 }
  0x91   :  { %278 = vst.msk [vmem:[%s605_s3] sm:$0xff] %vm183_vm1, %v144_v15  ;;  %v221_v34 = vmul.f32 %v144_v15, %v144_v15  ;;  %v184_v37 = vsel %vm183_vm1, %v144_v15, 0.0  ;;  %v225_v53 = vmul.f32 %v154_v16, %v154_v16  ;;  %v191_v58 = vsel %vm183_vm1, %v154_v16, 0.0 }
  0x92   :  { %282 = vst.msk [vmem:[%s605_s3 + $0x20] sm:$0xff] %vm183_vm1, %v154_v16 }
  0x93   :  { %v237_v42 = vsel %vm183_vm1, %v221_v34, 0.0  ;;  %v244_v63 = vsel %vm183_vm1, %v225_v53, 0.0 }
  0x95   :  { %v163_v17 = vpop.f32.mrf.mxu2  ;;  %v173_v18 = vpop.f32.mrf.mxu3 }
  0x96   :  { %v145_v19 = vpop.f32.mrf.mxu0  ;;  %v155_v20 = vpop.f32.mrf.mxu1  ;;  %v468_v21 = vadd.f32 %v455_v12, %v163_v17  ;;  %v473_v24 = vadd.f32 %v455_v12, %v173_v18 }
  0x97   :  { %v146_v22 = vadd.f32 %v455_v12, %v145_v19  ;;  %v156_v23 = vadd.f32 %v455_v12, %v155_v20 }
  0x98   :  { %286 = vst.msk [vmem:[%s605_s3 + $0x40] sm:$0xff] %vm183_vm1, %v468_v21  ;;  %v229_v14 = vmul.f32 %v468_v21, %v468_v21  ;;  %v199_v18 = vsel %vm183_vm1, %v468_v21, 0.0 }
  0x99   :  { %279 = vst.msk [vmem:[%s605_s3 + $0x8] sm:$0xff] %vm183_vm1, %v146_v22  ;;  %v222_v33 = vmul.f32 %v146_v22, %v146_v22  ;;  %v185_v35 = vsel %vm183_vm1, %v146_v22, 0.0  ;;  %v226_v59 = vmul.f32 %v156_v23, %v156_v23  ;;  %v193_v0 = vsel %vm183_vm1, %v156_v23, 0.0 }
  0x9a   :  { %283 = vst.msk [vmem:[%s605_s3 + $0x28] sm:$0xff] %vm183_vm1, %v156_v23  ;;  %v186_v43 = vadd.f32 %v185_v35, %v184_v37 }
  0x9b   :  { %290 = vst.msk [vmem:[%s605_s3 + $0x60] sm:$0xff] %vm183_vm1, %v473_v24  ;;  %v238_v38 = vsel %vm183_vm1, %v222_v33, 0.0  ;;  %v246_v8 = vsel %vm183_vm1, %v226_v59, 0.0 }
  0x9c   :  { %v239_v51 = vadd.f32 %v238_v38, %v237_v42 }
  0x9d   :  { %v165_v25 = vpop.f32.mrf.mxu2  ;;  %v175_v26 = vpop.f32.mrf.mxu3 }
  0x9e   :  { %v148_v27 = vpop.f32.mrf.mxu0  ;;  %v158_v28 = vpop.f32.mrf.mxu1  ;;  %v494_v29 = vadd.f32 %v455_v12, %v165_v25  ;;  %v499_v32 = vadd.f32 %v455_v12, %v175_v26  ;;  %v252_v25 = vsel %vm183_vm1, %v229_v14, 0.0 }
  0x9f   :  { %v149_v30 = vadd.f32 %v455_v12, %v148_v27  ;;  %v159_v31 = vadd.f32 %v455_v12, %v158_v28 }
  0xa0   :  { %287 = vst.msk [vmem:[%s605_s3 + $0x48] sm:$0xff] %vm183_vm1, %v494_v29  ;;  %v230_v19 = vmul.f32 %v494_v29, %v494_v29  ;;  %v201_v26 = vsel %vm183_vm1, %v494_v29, 0.0  ;;  %v207_v29 = vsel %vm183_vm1, %v473_v24, 0.0 }
  0xa1   :  { %280 = vst.msk [vmem:[%s605_s3 + $0x10] sm:$0xff] %vm183_vm1, %v149_v30  ;;  %v223_v36 = vmul.f32 %v149_v30, %v149_v30  ;;  %v187_v39 = vsel %vm183_vm1, %v149_v30, 0.0  ;;  %v227_v1 = vmul.f32 %v159_v31, %v159_v31  ;;  %v195_v9 = vsel %vm183_vm1, %v159_v31, 0.0 }
  0xa2   :  { %284 = vst.msk [vmem:[%s605_s3 + $0x30] sm:$0xff] %vm183_vm1, %v159_v31  ;;  %v188_v52 = vadd.f32 %v187_v39, %v186_v43  ;;  %v254_v31 = vsel %vm183_vm1, %v230_v19, 0.0 }
  0xa3   :  { %291 = vst.msk [vmem:[%s605_s3 + $0x68] sm:$0xff] %vm183_vm1, %v499_v32  ;;  %v240_v47 = vsel %vm183_vm1, %v223_v36, 0.0  ;;  %v248_v15 = vsel %vm183_vm1, %v227_v1, 0.0  ;;  %v233_v36 = vmul.f32 %v473_v24, %v473_v24 }
  0xa4   :  { %v241_v56 = vadd.f32 %v240_v47, %v239_v51 }
  0xa5   :  { %v168_v40 = vpop.f32.mrf.mxu2  ;;  %v178_v41 = vpop.f32.mrf.mxu3 }
  0xa6   :  { %v150_v44 = vpop.f32.mrf.mxu0  ;;  %v160_v45 = vpop.f32.mrf.mxu1  ;;  %v169_v46 = vadd.f32 %v455_v12, %v168_v40  ;;  %v529_v50 = vadd.f32 %v455_v12, %v178_v41  ;;  %v234_v41 = vmul.f32 %v499_v32, %v499_v32 }
  0xa7   :  { %v151_v48 = vadd.f32 %v455_v12, %v150_v44  ;;  %v161_v49 = vadd.f32 %v455_v12, %v160_v45  ;;  %v260_v45 = vsel %vm183_vm1, %v233_v36, 0.0 }
  0xa8   :  { %288 = vst.msk [vmem:[%s605_s3 + $0x50] sm:$0xff] %vm183_vm1, %v169_v46  ;;  %v231_v27 = vmul.f32 %v169_v46, %v169_v46  ;;  %v203_v33 = vsel %vm183_vm1, %v169_v46, 0.0  ;;  %v209_v46 = vsel %vm183_vm1, %v499_v32, 0.0  ;;  %v235_v47 = vmul.f32 %v529_v50, %v529_v50 }
  0xa9   :  { %v189_v54 = vsel %vm183_vm1, %v151_v48, 0.0  ;;  %v224_v55 = vmul.f32 %v151_v48, %v151_v48  ;;  %281 = vst.msk [vmem:[%s605_s3 + $0x18] sm:$0xff] %vm183_vm1, %v151_v48  ;;  %v228_v10 = vmul.f32 %v161_v49, %v161_v49  ;;  %v197_v16 = vsel %vm183_vm1, %v161_v49, 0.0 }
  0xaa   :  { %v190_v57 = vadd.f32 %v189_v54, %v188_v52  ;;  %285 = vst.msk [vmem:[%s605_s3 + $0x38] sm:$0xff] %vm183_vm1, %v161_v49  ;;  %v256_v37 = vsel %vm183_vm1, %v231_v27, 0.0  ;;  %v262_v51 = vsel %vm183_vm1, %v234_v41, 0.0  ;;  %v211_v24 = vsel %vm183_vm1, %v529_v50, 0.0 }
  0xab   :  { %v242_v60 = vsel %vm183_vm1, %v224_v55, 0.0  ;;  %292 = vst.msk [vmem:[%s605_s3 + $0x70] sm:$0xff] %vm183_vm1, %v529_v50  ;;  %v250_v20 = vsel %vm183_vm1, %v228_v10, 0.0  ;;  %v264_v55 = vsel %vm183_vm1, %v235_v47, 0.0 }
  0xac   :  { %v192_v61 = vadd.f32 %v191_v58, %v190_v57  ;;  %v243_v62 = vadd.f32 %v242_v60, %v241_v56 }
  0xad   :  { %v170_v2 = vpop.f32.mrf.mxu2  ;;  %v180_v3 = vpop.f32.mrf.mxu3 }
  0xae   :  { %v245_v4 = vadd.f32 %v244_v63, %v243_v62  ;;  %v194_v5 = vadd.f32 %v193_v0, %v192_v61  ;;  %v171_v6 = vadd.f32 %v455_v12, %v170_v2  ;;  %v181_v7 = vadd.f32 %v455_v12, %v180_v3 }
  0xb0   :  { %v196_v11 = vadd.f32 %v195_v9, %v194_v5  ;;  %v247_v13 = vadd.f32 %v246_v8, %v245_v4  ;;  %289 = vst.msk [vmem:[%s605_s3 + $0x58] sm:$0xff] %vm183_vm1, %v171_v6  ;;  %v232_v21 = vmul.f32 %v171_v6, %v171_v6  ;;  %v205_v38 = vsel %vm183_vm1, %v171_v6, 0.0 }
  0xb1   :  { %293 = vst.msk [vmem:[%s605_s3 + $0x78] sm:$0xff] %vm183_vm1, %v181_v7  ;;  %v236_v52 = vmul.f32 %v181_v7, %v181_v7  ;;  %v213_v56 = vsel %vm183_vm1, %v181_v7, 0.0 }
  0xb2   :  { %v198_v12 = vadd.f32 %v197_v16, %v196_v11  ;;  %v249_v17 = vadd.f32 %v248_v15, %v247_v13  ;;  %v258_v42 = vsel %vm183_vm1, %v232_v21, 0.0 }
  0xb3   :  { %v266_v32 = vsel %vm183_vm1, %v236_v52, 0.0 }
  0xb4   :  { %v200_v22 = vadd.f32 %v199_v18, %v198_v12  ;;  %v251_v23 = vadd.f32 %v250_v20, %v249_v17 }
  0xb6   :  { %v253_v28 = vadd.f32 %v252_v25, %v251_v23  ;;  %v202_v30 = vadd.f32 %v201_v26, %v200_v22 }
  0xb8   :  { %v204_v34 = vadd.f32 %v203_v33, %v202_v30  ;;  %v255_v35 = vadd.f32 %v254_v31, %v253_v28 }
  0xba   :  { %v257_v39 = vadd.f32 %v256_v37, %v255_v35  ;;  %v206_v40 = vadd.f32 %v205_v38, %v204_v34 }
  0xbc   :  { %v208_v43 = vadd.f32 %v207_v29, %v206_v40  ;;  %v259_v44 = vadd.f32 %v258_v42, %v257_v39 }
  0xbe   :  { %v261_v48 = vadd.f32 %v260_v45, %v259_v44  ;;  %v210_v49 = vadd.f32 %v209_v46, %v208_v43 }
  0xc0   :  { %v212_v53 = vadd.f32 %v211_v24, %v210_v49  ;;  %v263_v54 = vadd.f32 %v262_v51, %v261_v48 }
  0xc2   :  { %v265_v57 = vadd.f32 %v264_v55, %v263_v54  ;;  %v214_v58 = vadd.f32 %v213_v56, %v212_v53 }
  0xc4   :  { %v215_v59 = vrot.slane %v214_v58, 4  ;;  %v267_v60 = vadd.f32 %v266_v32, %v265_v57 }
  0xc6   :  { %v216_v61 = vadd.f32 %v215_v59, %v214_v58  ;;  %v268_v62 = vrot.slane %v267_v60, 4 }
  0xc8   :  { %v217_v63 = vrot.slane %v216_v61, 2  ;;  %v269_v0 = vadd.f32 %v268_v62, %v267_v60 }
  0xca   :  { %v218_v1 = vadd.f32 %v217_v63, %v216_v61  ;;  %v270_v2 = vrot.slane %v269_v0, 2 }
  0xcc   :  { %v219_v50 = vrot.slane %v218_v1, 1  ;;  %v271_v3 = vadd.f32 %v270_v2, %v269_v0 }
  0xce   :  { %v272_v4 = vrot.slane %v271_v3, 1  ;;  %v220_v5 = vadd.f32 %v219_v50, %v218_v1 }
  0xd0   :  { %v273_v6 = vadd.f32 %v272_v4, %v271_v3 }
  0xd2   :  { %v275_v7 = vsel %vm274_vm2, %v220_v5, %v273_v6 }
  0xd3   :  { %277 = vst.msk [vmem:[%s606_s4] sm:$0x3] %vm276_vm3, %v275_v7 }

// kernel: vqvae_forward.23
= control target key start
LH: loop header
LB: loop body
LE: loop exit
PB: predicated region body
PF: predicated region fallthrough
CT: control target
= control target key end

     0   :  { %vm398_vm0 = vcmask 261120   ;;  %s791_s1 = inlined_call_operand.vmem [shape: bf16[512,32], index: 1, kind: input, shape index: {}]   ;;  %s792_s2 = inlined_call_operand.vmem [shape: f32[1,32], index: 2, kind: input, shape index: {}]   ;;  %s793_s0 = inlined_call_operand.vmem [shape: bf16[32,512], index: 0, kind: input, shape index: {}]   ;;  %s794_s3 = inlined_call_operand.vmem [shape: f32[32,32], index: 3, kind: output, shape index: {}]  }
   0x1   :  { %v582_v0 = vld [vmem:[%s791_s1 + $0x38] sm:$0xff]  ;;  %v581_v4 = vld [vmem:[%s791_s1 + $0x30] sm:$0xff]  ;;  %v580_v8 = vld [vmem:[%s791_s1 + $0x28] sm:$0xff] }
   0x2   :  { %v590_v1 = vld [vmem:[%s791_s1 + $0x78] sm:$0xff]  ;;  %322 = vmatpush.bf16.msra.mxu0 %v582_v0  ;;  %v589_v5 = vld [vmem:[%s791_s1 + $0x70] sm:$0xff]  ;;  %v588_v9 = vld [vmem:[%s791_s1 + $0x68] sm:$0xff] }
   0x3   :  { %v598_v2 = vld [vmem:[%s791_s1 + $0xb8] sm:$0xff]  ;;  %341 = vmatpush.bf16.msra.mxu1 %v590_v1  ;;  %v597_v6 = vld [vmem:[%s791_s1 + $0xb0] sm:$0xff]  ;;  %v596_v10 = vld [vmem:[%s791_s1 + $0xa8] sm:$0xff] }
   0x4   :  { %v606_v3 = vld [vmem:[%s791_s1 + $0xf8] sm:$0xff]  ;;  %360 = vmatpush.bf16.msra.mxu2 %v598_v2  ;;  %v605_v7 = vld [vmem:[%s791_s1 + $0xf0] sm:$0xff]  ;;  %v604_v11 = vld [vmem:[%s791_s1 + $0xe8] sm:$0xff] }
   0x5   :  { %379 = vmatpush.bf16.msra.mxu3 %v606_v3  ;;  %v579_v12 = vld [vmem:[%s791_s1 + $0x20] sm:$0xff]  ;;  %v578_v16 = vld [vmem:[%s791_s1 + $0x18] sm:$0xff]  ;;  %v577_v20 = vld [vmem:[%s791_s1 + $0x10] sm:$0xff] }
   0x6   :  { %323 = vmatpush.bf16.msra.mxu0 %v581_v4  ;;  %v587_v13 = vld [vmem:[%s791_s1 + $0x60] sm:$0xff]  ;;  %v586_v17 = vld [vmem:[%s791_s1 + $0x58] sm:$0xff]  ;;  %v585_v21 = vld [vmem:[%s791_s1 + $0x50] sm:$0xff] }
   0x7   :  { %342 = vmatpush.bf16.msra.mxu1 %v589_v5  ;;  %v595_v14 = vld [vmem:[%s791_s1 + $0xa0] sm:$0xff]  ;;  %v594_v18 = vld [vmem:[%s791_s1 + $0x98] sm:$0xff]  ;;  %v593_v22 = vld [vmem:[%s791_s1 + $0x90] sm:$0xff] }
   0x8   :  { %361 = vmatpush.bf16.msra.mxu2 %v597_v6  ;;  %v603_v15 = vld [vmem:[%s791_s1 + $0xe0] sm:$0xff]  ;;  %v602_v19 = vld [vmem:[%s791_s1 + $0xd8] sm:$0xff]  ;;  %v601_v23 = vld [vmem:[%s791_s1 + $0xd0] sm:$0xff] }
   0x9   :  { %380 = vmatpush.bf16.msra.mxu3 %v605_v7  ;;  %v576_v24 = vld [vmem:[%s791_s1 + $0x8] sm:$0xff]  ;;  %v575_v28 = vld [vmem:[%s791_s1] sm:$0xff]  ;;  %v569_v33 = vld [vmem:[%s793_s0 + $0xc] sm:$0xf0] }
   0xa   :  { %324 = vmatpush.bf16.msra.mxu0 %v580_v8  ;;  %v584_v25 = vld [vmem:[%s791_s1 + $0x48] sm:$0xff]  ;;  %v583_v29 = vld [vmem:[%s791_s1 + $0x40] sm:$0xff]  ;;  %v411_v35 = vld [vmem:[%s793_s0 + $0x10] sm:$0xf0] }
   0xb   :  { %343 = vmatpush.bf16.msra.mxu1 %v588_v9  ;;  %v592_v26 = vld [vmem:[%s791_s1 + $0x88] sm:$0xff]  ;;  %v591_v30 = vld [vmem:[%s791_s1 + $0x80] sm:$0xff]  ;;  %v570_v37 = vld [vmem:[%s793_s0 + $0x14] sm:$0xf0] }
   0xc   :  { %362 = vmatpush.bf16.msra.mxu2 %v596_v10  ;;  %v600_v27 = vld [vmem:[%s791_s1 + $0xc8] sm:$0xff]  ;;  %v599_v31 = vld [vmem:[%s791_s1 + $0xc0] sm:$0xff]  ;;  %v419_v39 = vld [vmem:[%s793_s0 + $0x18] sm:$0xf0] }
   0xd   :  { %381 = vmatpush.bf16.msra.mxu3 %v604_v11  ;;  %v409_v32 = vld [vmem:[%s793_s0] sm:$0xf]  ;;  %v567_v34 = vld [vmem:[%s793_s0 + $0x4] sm:$0xf]  ;;  %v417_v36 = vld [vmem:[%s793_s0 + $0x8] sm:$0xf] }
   0xe   :  { %325 = vmatpush.bf16.msra.mxu0 %v579_v12  ;;  %v568_v38 = vld [vmem:[%s793_s0 + $0xc] sm:$0xf]  ;;  %v410_v40 = vor.u32 %v569_v33, %v409_v32  ;;  %v414_v41 = vor.u32 %v567_v34, %v411_v35  ;;  %v418_v42 = vor.u32 %v570_v37, %v417_v36  ;;  %v425_v44 = vld [vmem:[%s793_s0 + $0x20] sm:$0xf]  ;;  %v573_v45 = vld [vmem:[%s793_s0 + $0x2c] sm:$0xf0] }
   0xf   :  { %344 = vmatpush.bf16.msra.mxu1 %v587_v13  ;;  %v422_v43 = vor.u32 %v568_v38, %v419_v39  ;;  %v571_v46 = vld [vmem:[%s793_s0 + $0x24] sm:$0xf]  ;;  %v427_v47 = vld [vmem:[%s793_s0 + $0x30] sm:$0xf0]  ;;  %v433_v48 = vld [vmem:[%s793_s0 + $0x28] sm:$0xf]  ;;  %v426_v52 = vor.u32 %v573_v45, %v425_v44 }
  0x10   :  { %363 = vmatpush.bf16.msra.mxu2 %v595_v14  ;;  %v574_v49 = vld [vmem:[%s793_s0 + $0x34] sm:$0xf0]  ;;  %v572_v50 = vld [vmem:[%s793_s0 + $0x2c] sm:$0xf]  ;;  %v435_v51 = vld [vmem:[%s793_s0 + $0x38] sm:$0xf0]  ;;  %v430_v53 = vor.u32 %v571_v46, %v427_v47 }
  0x11   :  { %382 = vmatpush.bf16.msra.mxu3 %v603_v15  ;;  %v434_v54 = vor.u32 %v574_v49, %v433_v48  ;;  %v438_v55 = vor.u32 %v572_v50, %v435_v51  ;;  %v607_v56 = vld [vmem:[%s792_s2] ss:$0 sm:$0xff] }
  0x12   :  { %326 = vmatpush.bf16.msra.mxu0 %v578_v16 }
  0x13   :  { %345 = vmatpush.bf16.msra.mxu1 %v586_v17 }
  0x14   :  { %364 = vmatpush.bf16.msra.mxu2 %v594_v18 }
  0x15   :  { %383 = vmatpush.bf16.msra.mxu3 %v602_v19 }
  0x16   :  { %327 = vmatpush.bf16.msra.mxu0 %v577_v20 }
  0x17   :  { %346 = vmatpush.bf16.msra.mxu1 %v585_v21 }
  0x18   :  { %365 = vmatpush.bf16.msra.mxu2 %v593_v22 }
  0x19   :  { %384 = vmatpush.bf16.msra.mxu3 %v601_v23 }
  0x1a   :  { %328 = vmatpush.bf16.msra.mxu0 %v576_v24 }
  0x1b   :  { %347 = vmatpush.bf16.msra.mxu1 %v584_v25 }
  0x1c   :  { %366 = vmatpush.bf16.msra.mxu2 %v592_v26 }
  0x1d   :  { %385 = vmatpush.bf16.msra.mxu3 %v600_v27 }
  0x1e   :  { %329 = vmatpush.bf16.msra.mxu0 %v575_v28 }
  0x1f   :  { %348 = vmatpush.bf16.msra.mxu1 %v583_v29 }
  0x20   :  { %367 = vmatpush.bf16.msra.mxu2 %v591_v30 }
  0x21   :  { %386 = vmatpush.bf16.msra.mxu3 %v599_v31  ;;  %330 = vmatmul.bf16.vlgmr.msra.gmra.mxu0 %v410_v40 }
  0x22   :  { %349 = vmatmul.bf16.vlgmr.msra.gmra.mxu1 %v414_v41 }
  0x23   :  { %368 = vmatmul.bf16.vlgmr.msra.gmra.mxu2 %v418_v42 }
  0x24   :  { %387 = vmatmul.bf16.vlgmr.msra.gmra.mxu3 %v422_v43 }
  0x31   :  { %335 = vmatmul.bf16.gmra.mxu0 %v426_v52 }
  0x32   :  { %354 = vmatmul.bf16.gmra.mxu1 %v430_v53 }
  0x33   :  { %373 = vmatmul.bf16.gmra.mxu2 %v434_v54 }
  0x34   :  { %392 = vmatmul.bf16.gmra.mxu3 %v438_v55 }
  0x9e   :  { %v331_v57 = vpop.f32.mrf.mxu0 }
  0x9f   :  { %v350_v58 = vpop.f32.mrf.mxu1  ;;  %v332_v59 = vadd.f32 %v607_v56, %v331_v57 }
  0xa1   :  { %v351_v60 = vadd.f32 %v350_v58, %v332_v59 }
  0xa6   :  { %v369_v61 = vpop.f32.mrf.mxu2  ;;  %v333_v0 = vpop.f32.mrf.mxu0 }
  0xa7   :  { %v388_v62 = vpop.f32.mrf.mxu3  ;;  %v370_v63 = vadd.f32 %v369_v61, %v351_v60  ;;  %v352_v1 = vpop.f32.mrf.mxu1  ;;  %v334_v3 = vadd.f32 %v607_v56, %v333_v0 }
  0xa9   :  { %v389_v2 = vadd.f32 %v388_v62, %v370_v63  ;;  %v353_v4 = vadd.f32 %v352_v1, %v334_v3 }
  0xab   :  { %399 = vst.msk [vmem:[%s794_s3] sm:$0xff] %vm398_vm0, %v389_v2 }
  0xae   :  { %v371_v5 = vpop.f32.mrf.mxu2  ;;  %v336_v8 = vpop.f32.mrf.mxu0 }
  0xaf   :  { %v390_v6 = vpop.f32.mrf.mxu3  ;;  %v372_v7 = vadd.f32 %v371_v5, %v353_v4  ;;  %v337_v9 = vadd.f32 %v607_v56, %v336_v8  ;;  %v355_v11 = vpop.f32.mrf.mxu1 }
  0xb1   :  { %v391_v10 = vadd.f32 %v390_v6, %v372_v7  ;;  %v356_v12 = vadd.f32 %v355_v11, %v337_v9 }
  0xb3   :  { %400 = vst.msk [vmem:[%s794_s3 + $0x8] sm:$0xff] %vm398_vm0, %v391_v10 }
  0xb6   :  { %v374_v13 = vpop.f32.mrf.mxu2  ;;  %v338_v16 = vpop.f32.mrf.mxu0 }
  0xb7   :  { %v393_v14 = vpop.f32.mrf.mxu3  ;;  %v375_v15 = vadd.f32 %v374_v13, %v356_v12  ;;  %v339_v18 = vadd.f32 %v607_v56, %v338_v16  ;;  %v357_v19 = vpop.f32.mrf.mxu1 }
  0xb9   :  { %v394_v17 = vadd.f32 %v393_v14, %v375_v15  ;;  %v358_v20 = vadd.f32 %v357_v19, %v339_v18 }
  0xbb   :  { %401 = vst.msk [vmem:[%s794_s3 + $0x10] sm:$0xff] %vm398_vm0, %v394_v17 }
  0xbe   :  { %v376_v21 = vpop.f32.mrf.mxu2 }
  0xbf   :  { %v377_v22 = vadd.f32 %v376_v21, %v358_v20  ;;  %v395_v23 = vpop.f32.mrf.mxu3 }
  0xc1   :  { %v396_v24 = vadd.f32 %v395_v23, %v377_v22 }
  0xc3   :  { %402 = vst.msk [vmem:[%s794_s3 + $0x18] sm:$0xff] %vm398_vm0, %v396_v24 }

// kernel: vqvae_forward.25
= control target key start
LH: loop header
LB: loop body
LE: loop exit
PB: predicated region body
PF: predicated region fallthrough
CT: control target
= control target key end

     0   :  { %vm69_vm0 = vcmask 261120   ;;  %vm125_vm1 = vcmask 1040384   ;;  %vm127_vm2 = vcmask 254976   ;;  %s249_s1 = inlined_call_operand.vmem [shape: bf16[32,32], index: 1, kind: input, shape index: {}]   ;;  %s250_s0 = inlined_call_operand.vmem [shape: f32[32,32], index: 0, kind: input, shape index: {}]   ;;  %s251_s3 = inlined_call_operand.vmem [shape: f32[1,32], index: 3, kind: input, shape index: {}]   ;;  %s252_s4 = inlined_call_operand.vmem [shape: f32[1,32], index: 4, kind: input, shape index: {}]   ;;  %s253_s2 = inlined_call_operand.vmem [shape: f32[1,32], index: 2, kind: input, shape index: {}]   ;;  %s254_s5 = inlined_call_operand.vmem [shape: f32[32,32], index: 5, kind: output, shape index: {0}]   ;;  %s255_s6 = inlined_call_operand.vmem [shape: f32[1,2,32], index: 6, kind: output, shape index: {1}]  }
   0x1   :  { %v152_v0 = vld [vmem:[%s249_s1 + $0x8] sm:$0xff]  ;;  %v151_v1 = vld [vmem:[%s249_s1] sm:$0xff]  ;;  %v25_v6 = vld [vmem:[%s250_s0 + $0x10] sm:$0xff] }
   0x2   :  { %v23_v2 = vld [vmem:[%s250_s0] sm:$0xff]  ;;  %v24_v3 = vld [vmem:[%s250_s0 + $0x8] sm:$0xff]  ;;  %82 = vmatpush.bf16.msra.mxu0 %v152_v0  ;;  %153 = vmatpush.bf16.msra.mxu1 %v152_v0  ;;  %v26_v9 = vld [vmem:[%s250_s0 + $0x18] sm:$0xff] }
   0x3   :  { %v155_v4 = vld [vmem:[%s251_s3] ss:$0 sm:$0xff] }
   0x4   :  { %v156_v5 = vld [vmem:[%s252_s4] ss:$0 sm:$0xff]  ;;  %v31_v7 = vmul.f32 %v155_v4, %v23_v2  ;;  %v32_v8 = vmul.f32 %v155_v4, %v24_v3  ;;  %v33_v10 = vmul.f32 %v155_v4, %v25_v6  ;;  %v34_v11 = vmul.f32 %v155_v4, %v26_v9 }
   0x5   :  { %v157_v22 = vld [vmem:[%s253_s2] ss:$0 sm:$0xff] }
   0x6   :  { %v39_v12 = vadd.f32 %v156_v5, %v31_v7  ;;  %v40_v13 = vadd.f32 %v156_v5, %v32_v8  ;;  %v41_v14 = vadd.f32 %v156_v5, %v33_v10  ;;  %83 = vmatpush.bf16.msra.mxu0 %v151_v1  ;;  %154 = vmatpush.bf16.msra.mxu1 %v151_v1 }
   0x7   :  { %v42_v15 = vadd.f32 %v156_v5, %v34_v11 }
   0x8   :  { %v43_v16 = vmax.f32 %v39_v12, 0.0  ;;  %v44_v17 = vmax.f32 %v40_v13, 0.0  ;;  %v45_v18 = vmax.f32 %v41_v14, 0.0 }
   0x9   :  { %v46_v19 = vmax.f32 %v42_v15, 0.0 }
   0xa   :  { %v47_v20 = vpack.c.bf16 %v44_v17, %v43_v16 }
   0xb   :  { %v48_v21 = vpack.c.bf16 %v46_v19, %v45_v18 }
   0xc   :  { %149 = vmatmul.msk.bf16.vlgmr.msra.gmra.mxu0 %vm69_vm0, %v47_v20 }
   0xd   :  { %150 = vmatmul.msk.bf16.vlgmr.msra.gmra.mxu1 %vm69_vm0, %v48_v21 }
  0x89   :  { %v85_v23 = vpop.f32.mrf.mxu0 }
  0x8a   :  { %v86_v24 = vadd.f32 %v157_v22, %v85_v23  ;;  %v90_v25 = vpop.f32.mrf.mxu1 }
  0x8b   :  { %v91_v26 = vadd.f32 %v157_v22, %v90_v25 }
  0x8c   :  { %129 = vst.msk [vmem:[%s254_s5] sm:$0xff] %vm69_vm0, %v86_v24  ;;  %v108_v28 = vmul.f32 %v86_v24, %v86_v24  ;;  %v95_v32 = vsel %vm69_vm0, %v86_v24, 0.0 }
  0x8d   :  { %131 = vst.msk [vmem:[%s254_s5 + $0x10] sm:$0xff] %vm69_vm0, %v91_v26  ;;  %v110_v33 = vmul.f32 %v91_v26, %v91_v26  ;;  %v98_v38 = vsel %vm69_vm0, %v91_v26, 0.0 }
  0x8e   :  { %v112_v37 = vsel %vm69_vm0, %v108_v28, 0.0 }
  0x8f   :  { %v115_v43 = vsel %vm69_vm0, %v110_v33, 0.0 }
  0x91   :  { %v87_v27 = vpop.f32.mrf.mxu0 }
  0x92   :  { %v88_v29 = vadd.f32 %v157_v22, %v87_v27  ;;  %v92_v30 = vpop.f32.mrf.mxu1 }
  0x93   :  { %v93_v31 = vadd.f32 %v157_v22, %v92_v30 }
  0x94   :  { %v96_v34 = vsel %vm69_vm0, %v88_v29, 0.0  ;;  %v109_v35 = vmul.f32 %v88_v29, %v88_v29  ;;  %130 = vst.msk [vmem:[%s254_s5 + $0x8] sm:$0xff] %vm69_vm0, %v88_v29 }
  0x95   :  { %v97_v36 = vadd.f32 %v96_v34, %v95_v32  ;;  %132 = vst.msk [vmem:[%s254_s5 + $0x18] sm:$0xff] %vm69_vm0, %v93_v31  ;;  %v111_v40 = vmul.f32 %v93_v31, %v93_v31  ;;  %v100_v44 = vsel %vm69_vm0, %v93_v31, 0.0 }
  0x96   :  { %v113_v39 = vsel %vm69_vm0, %v109_v35, 0.0 }
  0x97   :  { %v114_v41 = vadd.f32 %v113_v39, %v112_v37  ;;  %v99_v42 = vadd.f32 %v98_v38, %v97_v36  ;;  %v117_v47 = vsel %vm69_vm0, %v111_v40, 0.0 }
  0x99   :  { %v101_v45 = vadd.f32 %v100_v44, %v99_v42  ;;  %v116_v46 = vadd.f32 %v115_v43, %v114_v41 }
  0x9b   :  { %v102_v48 = vrot.slane %v101_v45, 4  ;;  %v118_v49 = vadd.f32 %v117_v47, %v116_v46 }
  0x9d   :  { %v103_v50 = vadd.f32 %v102_v48, %v101_v45  ;;  %v119_v51 = vrot.slane %v118_v49, 4 }
  0x9f   :  { %v104_v52 = vrot.slane %v103_v50, 2  ;;  %v120_v53 = vadd.f32 %v119_v51, %v118_v49 }
  0xa1   :  { %v105_v54 = vadd.f32 %v104_v52, %v103_v50  ;;  %v121_v55 = vrot.slane %v120_v53, 2 }
  0xa3   :  { %v106_v56 = vrot.slane %v105_v54, 1  ;;  %v122_v57 = vadd.f32 %v121_v55, %v120_v53 }
  0xa5   :  { %v123_v58 = vrot.slane %v122_v57, 1  ;;  %v107_v59 = vadd.f32 %v106_v56, %v105_v54 }
  0xa7   :  { %v124_v60 = vadd.f32 %v123_v58, %v122_v57 }
  0xa9   :  { %v126_v61 = vsel %vm125_vm1, %v107_v59, %v124_v60 }
  0xaa   :  { %128 = vst.msk [vmem:[%s255_s6] sm:$0x3] %vm127_vm2, %v126_v61 }

// kernel: vqvae_forward.24
= control target key start
LH: loop header
LB: loop body
LE: loop exit
PB: predicated region body
PF: predicated region fallthrough
CT: control target
= control target key end

     0   :  { %vm203_vm0 = vcmask 261120   ;;  %vm297_vm1 = vcmask 1040384   ;;  %vm299_vm2 = vcmask 254976   ;;  %s549_s1 = inlined_call_operand.vmem [shape: bf16[288,32], index: 1, kind: input, shape index: {}]   ;;  %s550_s0 = inlined_call_operand.vmem [shape: bf16[32,288], index: 0, kind: input, shape index: {}]   ;;  %s551_s2 = inlined_call_operand.vmem [shape: f32[1,32], index: 2, kind: input, shape index: {}]   ;;  %s552_s3 = inlined_call_operand.vmem [shape: f32[32,32], index: 3, kind: output, shape index: {0}]   ;;  %s553_s4 = inlined_call_operand.vmem [shape: f32[1,2,32], index: 4, kind: output, shape index: {1}]  }
   0x1   :  { %v394_v0 = vld [vmem:[%s549_s1 + $0x38] sm:$0xff]  ;;  %v393_v2 = vld [vmem:[%s549_s1 + $0x30] sm:$0xff]  ;;  %v404_v3 = vld [vmem:[%s549_s1 + $0x88] sm:$0xff] }
   0x2   :  { %v402_v1 = vld [vmem:[%s549_s1 + $0x78] sm:$0xff]  ;;  %210 = vmatpush.bf16.msra.mxu0 %v394_v0  ;;  %405 = vmatpush.bf16.msra.mxu3 %v394_v0  ;;  %v401_v4 = vld [vmem:[%s549_s1 + $0x70] sm:$0xff]  ;;  %v403_v5 = vld [vmem:[%s549_s1 + $0x80] sm:$0xff] }
   0x3   :  { %229 = vmatpush.bf16.msra.mxu1 %v402_v1  ;;  %254 = vmatpush.bf16.msra.mxu2 %v404_v3  ;;  %v18_v6 = vld [vmem:[%s550_s0 + $0x8] sm:$0xf]  ;;  %v20_v7 = vld [vmem:[%s550_s0 + $0x14] sm:$0xf]  ;;  %v391_v15 = vld [vmem:[%s549_s1 + $0x20] sm:$0xff] }
   0x4   :  { %v27_v8 = vunpack.c.l.bf16 %v18_v6  ;;  %v30_v9 = vunpack.c.l.bf16 %v20_v7  ;;  %v392_v10 = vld [vmem:[%s549_s1 + $0x28] sm:$0xff]  ;;  %v399_v16 = vld [vmem:[%s549_s1 + $0x60] sm:$0xff]  ;;  %v390_v19 = vld [vmem:[%s549_s1 + $0x18] sm:$0xff] }
   0x5   :  { %v400_v11 = vld [vmem:[%s549_s1 + $0x68] sm:$0xff]  ;;  %v22_v17 = vld [vmem:[%s550_s0 + $0x20] sm:$0xf]  ;;  %v398_v20 = vld [vmem:[%s549_s1 + $0x58] sm:$0xff] }
   0x6   :  { %211 = vmatpush.bf16.msra.mxu0 %v393_v2  ;;  %406 = vmatpush.bf16.msra.mxu3 %v393_v2  ;;  %v39_v12 = vmax.f32 %v27_v8, 0.0  ;;  %v42_v13 = vmax.f32 %v30_v9, 0.0  ;;  %v24_v18 = vld [vmem:[%s550_s0 + $0x2c] sm:$0xf]  ;;  %v33_v21 = vunpack.c.l.bf16 %v22_v17  ;;  %v389_v23 = vld [vmem:[%s549_s1 + $0x10] sm:$0xff]  ;;  %v17_v24 = vld [vmem:[%s550_s0] sm:$0xff] }
   0x7   :  { %230 = vmatpush.bf16.msra.mxu1 %v401_v4  ;;  %255 = vmatpush.bf16.msra.mxu2 %v403_v5  ;;  %v36_v22 = vunpack.c.l.bf16 %v24_v18  ;;  %v19_v25 = vld [vmem:[%s550_s0 + $0xc] sm:$0xff]  ;;  %v21_v26 = vld [vmem:[%s550_s0 + $0x18] sm:$0xff]  ;;  %v23_v27 = vld [vmem:[%s550_s0 + $0x24] sm:$0xff]  ;;  %v25_v31 = vunpack.c.l.bf16 %v17_v24  ;;  %v26_v36 = vunpack.c.h.bf16 %v17_v24 }
   0x8   :  { %v51_v14 = vpack.c.bf16 %v42_v13, %v39_v12  ;;  %v397_v28 = vld [vmem:[%s549_s1 + $0x50] sm:$0xff]  ;;  %v45_v29 = vmax.f32 %v33_v21, 0.0  ;;  %v28_v32 = vunpack.c.l.bf16 %v19_v25  ;;  %v31_v33 = vunpack.c.l.bf16 %v21_v26  ;;  %v388_v35 = vld [vmem:[%s549_s1 + $0x8] sm:$0xff]  ;;  %v387_v44 = vld [vmem:[%s549_s1] sm:$0xff] }
   0x9   :  { %v48_v30 = vmax.f32 %v36_v22, 0.0  ;;  %v34_v34 = vunpack.c.l.bf16 %v23_v27  ;;  %v29_v37 = vunpack.c.h.bf16 %v19_v25  ;;  %v396_v38 = vld [vmem:[%s549_s1 + $0x48] sm:$0xff]  ;;  %v37_v40 = vmax.f32 %v25_v31, 0.0  ;;  %v395_v47 = vld [vmem:[%s549_s1 + $0x40] sm:$0xff] }
   0xa   :  { %212 = vmatpush.bf16.msra.mxu0 %v392_v10  ;;  %407 = vmatpush.bf16.msra.mxu3 %v392_v10  ;;  %v40_v41 = vmax.f32 %v28_v32, 0.0  ;;  %v43_v42 = vmax.f32 %v31_v33, 0.0  ;;  %v38_v45 = vmax.f32 %v26_v36, 0.0  ;;  %v32_v51 = vunpack.c.h.bf16 %v21_v26  ;;  %v413_v57 = vld [vmem:[%s551_s2] ss:$0 sm:$0xff] }
   0xb   :  { %231 = vmatpush.bf16.msra.mxu1 %v400_v11  ;;  %385 = vmatmul.msk.bf16.vlgmr.msra.gmra.mxu2 %vm203_vm0, %v51_v14  ;;  %v54_v39 = vpack.c.bf16 %v48_v30, %v45_v29  ;;  %v46_v43 = vmax.f32 %v34_v34, 0.0  ;;  %v41_v46 = vmax.f32 %v29_v37, 0.0  ;;  %v35_v52 = vunpack.c.h.bf16 %v23_v27 }
   0xc   :  { %v49_v48 = vpack.c.bf16 %v40_v41, %v37_v40  ;;  %v44_v53 = vmax.f32 %v32_v51, 0.0 }
   0xd   :  { %v52_v49 = vpack.c.bf16 %v46_v43, %v43_v42  ;;  %v50_v50 = vpack.c.bf16 %v41_v46, %v38_v45  ;;  %v47_v54 = vmax.f32 %v35_v52, 0.0 }
   0xe   :  { %213 = vmatpush.bf16.msra.mxu0 %v391_v15  ;;  %408 = vmatpush.bf16.msra.mxu3 %v391_v15 }
   0xf   :  { %232 = vmatpush.bf16.msra.mxu1 %v399_v16  ;;  %v53_v55 = vpack.c.bf16 %v47_v54, %v44_v53 }
  0x12   :  { %214 = vmatpush.bf16.msra.mxu0 %v390_v19  ;;  %409 = vmatpush.bf16.msra.mxu3 %v390_v19 }
  0x13   :  { %233 = vmatpush.bf16.msra.mxu1 %v398_v20 }
  0x16   :  { %215 = vmatpush.bf16.msra.mxu0 %v389_v23  ;;  %410 = vmatpush.bf16.msra.mxu3 %v389_v23 }
  0x17   :  { %234 = vmatpush.bf16.msra.mxu1 %v397_v28 }
  0x1a   :  { %216 = vmatpush.bf16.msra.mxu0 %v388_v35  ;;  %411 = vmatpush.bf16.msra.mxu3 %v388_v35 }
  0x1b   :  { %235 = vmatpush.bf16.msra.mxu1 %v396_v38  ;;  %386 = vmatmul.msk.bf16.gmra.mxu2 %vm203_vm0, %v54_v39 }
  0x1e   :  { %217 = vmatpush.bf16.msra.mxu0 %v387_v44  ;;  %412 = vmatpush.bf16.msra.mxu3 %v387_v44 }
  0x1f   :  { %236 = vmatpush.bf16.msra.mxu1 %v395_v47 }
  0x21   :  { %218 = vmatmul.bf16.vlgmr.msra.gmra.mxu0 %v49_v48  ;;  %223 = vmatmul.bf16.vlgmr.msra.gmra.mxu3 %v52_v49 }
  0x22   :  { %237 = vmatmul.bf16.vlgmr.msra.gmra.mxu1 %v50_v50 }
  0x32   :  { %242 = vmatmul.bf16.gmra.mxu1 %v53_v55 }
  0x8e   :  { %v257_v56 = vpop.f32.mrf.mxu2 }
  0x96   :  { %v259_v63 = vpop.f32.mrf.mxu2 }
  0x9e   :  { %v219_v58 = vpop.f32.mrf.mxu0  ;;  %v262_v7 = vpop.f32.mrf.mxu2 }
  0x9f   :  { %v220_v59 = vadd.f32 %v413_v57, %v219_v58  ;;  %v238_v60 = vpop.f32.mrf.mxu1 }
  0xa1   :  { %v239_v61 = vadd.f32 %v238_v60, %v220_v59 }
  0xa3   :  { %v258_v62 = vadd.f32 %v257_v56, %v239_v61 }
  0xa4   :  { %v224_v3 = vpop.f32.mrf.mxu3 }
  0xa5   :  { %301 = vst.msk [vmem:[%s552_s3] sm:$0xff] %vm203_vm0, %v258_v62  ;;  %v225_v6 = vadd.f32 %v413_v57, %v224_v3  ;;  %v280_v13 = vmul.f32 %v258_v62, %v258_v62  ;;  %v267_v18 = vsel %vm203_vm0, %v258_v62, 0.0 }
  0xa6   :  { %v221_v0 = vpop.f32.mrf.mxu0  ;;  %v264_v23 = vpop.f32.mrf.mxu2 }
  0xa7   :  { %v222_v1 = vadd.f32 %v413_v57, %v221_v0  ;;  %v240_v2 = vpop.f32.mrf.mxu1  ;;  %v284_v24 = vsel %vm203_vm0, %v280_v13, 0.0 }
  0xa9   :  { %v241_v4 = vadd.f32 %v240_v2, %v222_v1 }
  0xab   :  { %v260_v5 = vadd.f32 %v259_v63, %v241_v4 }
  0xac   :  { %v226_v11 = vpop.f32.mrf.mxu3 }
  0xad   :  { %302 = vst.msk [vmem:[%s552_s3 + $0x8] sm:$0xff] %vm203_vm0, %v260_v5  ;;  %v281_v12 = vmul.f32 %v260_v5, %v260_v5  ;;  %v268_v14 = vsel %vm203_vm0, %v260_v5, 0.0  ;;  %v227_v15 = vadd.f32 %v413_v57, %v226_v11 }
  0xae   :  { %v269_v22 = vadd.f32 %v268_v14, %v267_v18 }
  0xaf   :  { %v243_v8 = vpop.f32.mrf.mxu1  ;;  %v285_v19 = vsel %vm203_vm0, %v281_v12, 0.0 }
  0xb0   :  { %v244_v9 = vadd.f32 %v243_v8, %v225_v6  ;;  %v286_v27 = vadd.f32 %v285_v19, %v284_v24 }
  0xb2   :  { %v263_v10 = vadd.f32 %v262_v7, %v244_v9 }
  0xb4   :  { %303 = vst.msk [vmem:[%s552_s3 + $0x10] sm:$0xff] %vm203_vm0, %v263_v10  ;;  %v282_v16 = vmul.f32 %v263_v10, %v263_v10  ;;  %v270_v20 = vsel %vm203_vm0, %v263_v10, 0.0 }
  0xb5   :  { %v271_v28 = vadd.f32 %v270_v20, %v269_v22 }
  0xb6   :  { %v287_v25 = vsel %vm203_vm0, %v282_v16, 0.0 }
  0xb7   :  { %v245_v17 = vpop.f32.mrf.mxu1  ;;  %v288_v31 = vadd.f32 %v287_v25, %v286_v27 }
  0xb8   :  { %v246_v21 = vadd.f32 %v245_v17, %v227_v15 }
  0xba   :  { %v265_v26 = vadd.f32 %v264_v23, %v246_v21 }
  0xbc   :  { %v272_v29 = vsel %vm203_vm0, %v265_v26, 0.0  ;;  %v283_v30 = vmul.f32 %v265_v26, %v265_v26  ;;  %304 = vst.msk [vmem:[%s552_s3 + $0x18] sm:$0xff] %vm203_vm0, %v265_v26 }
  0xbd   :  { %v273_v32 = vadd.f32 %v272_v29, %v271_v28 }
  0xbe   :  { %v289_v33 = vsel %vm203_vm0, %v283_v30, 0.0 }
  0xbf   :  { %v274_v34 = vrot.slane %v273_v32, 4  ;;  %v290_v35 = vadd.f32 %v289_v33, %v288_v31 }
  0xc1   :  { %v275_v36 = vadd.f32 %v274_v34, %v273_v32  ;;  %v291_v37 = vrot.slane %v290_v35, 4 }
  0xc3   :  { %v276_v38 = vrot.slane %v275_v36, 2  ;;  %v292_v39 = vadd.f32 %v291_v37, %v290_v35 }
  0xc5   :  { %v277_v40 = vadd.f32 %v276_v38, %v275_v36  ;;  %v293_v41 = vrot.slane %v292_v39, 2 }
  0xc7   :  { %v278_v42 = vrot.slane %v277_v40, 1  ;;  %v294_v43 = vadd.f32 %v293_v41, %v292_v39 }
  0xc9   :  { %v295_v44 = vrot.slane %v294_v43, 1  ;;  %v279_v45 = vadd.f32 %v278_v42, %v277_v40 }
  0xcb   :  { %v296_v46 = vadd.f32 %v295_v44, %v294_v43 }
  0xcd   :  { %v298_v47 = vsel %vm297_vm1, %v279_v45, %v296_v46 }
  0xce   :  { %300 = vst.msk [vmem:[%s553_s4] sm:$0x3] %vm299_vm2, %v298_v47 }

// kernel: tile.61
= control target key start
LH: loop header
LB: loop body
LE: loop exit
PB: predicated region body
PF: predicated region fallthrough
CT: control target
= control target key end

     0   :  { %s20_s0 = inlined_call_operand.<no memory space> [shape: f32[], index: 0, kind: input, shape index: {}]   ;;  %s21_s1 = inlined_call_operand.vmem [shape: f32[1,128], index: 1, kind: output, shape index: {}]  }
   0x1   :  { %v2_v0 = vstv %s20_s0 }
   0x2   :  { %3 = vst [vmem:[%s21_s1] sm:$0x1] %v2_v0 }

// kernel: vqvae_forward.26
= control target key start
LH: loop header
LB: loop body
LE: loop exit
PB: predicated region body
PF: predicated region fallthrough
CT: control target
= control target key end

     0   :  { %s78_s0 = inlined_call_operand.vmem [shape: f32[8,128], index: 0, kind: input, shape index: {}]   ;;  %s79_s1 = inlined_call_operand.vmem [shape: f32[1,128], index: 1, kind: input, shape index: {}]   ;;  %s80_s2 = inlined_call_operand.vmem [shape: f32[1,128], index: 2, kind: input, shape index: {}]   ;;  %s81_s3 = inlined_call_operand.vmem [shape: f32[8,128], index: 3, kind: input, shape index: {}]   ;;  %s82_s4 = inlined_call_operand.vmem [shape: f32[8,128], index: 4, kind: output, shape index: {}]  }
   0x1   :  { %v17_v0 = vld [vmem:[%s78_s0] sm:$0xff] }
   0x2   :  { %v36_v1 = vld [vmem:[%s79_s1] ss:$0 sm:$0xff] }
   0x3   :  { %v37_v2 = vld [vmem:[%s80_s2] ss:$0 sm:$0xff]  ;;  %v22_v4 = vmul.f32 %v36_v1, %v17_v0 }
   0x4   :  { %v28_v3 = vld [vmem:[%s81_s3] sm:$0xff] }
   0x5   :  { %v29_v5 = vmax.f32 %v28_v3, 0.0  ;;  %v27_v6 = vadd.f32 %v37_v2, %v22_v4 }
   0x7   :  { %v30_v7 = vadd.f32 %v29_v5, %v27_v6 }
   0x9   :  { %31 = vst [vmem:[%s82_s4] sm:$0xff] %v30_v7 }

// kernel: vqvae_forward.30
= control target key start
LH: loop header
LB: loop body
LE: loop exit
PB: predicated region body
PF: predicated region fallthrough
CT: control target
= control target key end

     0   :  { %vm41_vm0 = vcmask 261120   ;;  %s149_s1 = inlined_call_operand.vmem [shape: bf16[32,32], index: 1, kind: input, shape index: {}]   ;;  %s150_s0 = inlined_call_operand.vmem [shape: f32[32,32], index: 0, kind: input, shape index: {}]   ;;  %s151_s2 = inlined_call_operand.vmem [shape: f32[1,32], index: 2, kind: input, shape index: {}]   ;;  %s152_s3 = inlined_call_operand.vmem [shape: f32[32,32], index: 3, kind: output, shape index: {}]  }
   0x1   :  { %v86_v0 = vld [vmem:[%s149_s1 + $0x8] sm:$0xff]  ;;  %v85_v1 = vld [vmem:[%s149_s1] sm:$0xff]  ;;  %v17_v4 = vld [vmem:[%s150_s0 + $0x10] sm:$0xff] }
   0x2   :  { %v15_v2 = vld [vmem:[%s150_s0] sm:$0xff]  ;;  %v16_v3 = vld [vmem:[%s150_s0 + $0x8] sm:$0xff]  ;;  %54 = vmatpush.bf16.msra.mxu0 %v86_v0  ;;  %87 = vmatpush.bf16.msra.mxu1 %v86_v0  ;;  %v18_v5 = vld [vmem:[%s150_s0 + $0x18] sm:$0xff] }
   0x3   :  { %v19_v6 = vpack.c.bf16 %v16_v3, %v15_v2  ;;  %v20_v7 = vpack.c.bf16 %v18_v5, %v17_v4  ;;  %v89_v8 = vld [vmem:[%s151_s2] ss:$0 sm:$0xff] }
   0x6   :  { %55 = vmatpush.bf16.msra.mxu0 %v85_v1  ;;  %88 = vmatpush.bf16.msra.mxu1 %v85_v1 }
   0x9   :  { %83 = vmatmul.msk.bf16.vlgmr.msra.gmra.mxu0 %vm41_vm0, %v19_v6  ;;  %84 = vmatmul.msk.bf16.vlgmr.msra.gmra.mxu1 %vm41_vm0, %v20_v7 }
  0x86   :  { %v57_v9 = vpop.f32.mrf.mxu0  ;;  %v62_v10 = vpop.f32.mrf.mxu1 }
  0x87   :  { %v58_v11 = vadd.f32 %v89_v8, %v57_v9  ;;  %v63_v12 = vadd.f32 %v89_v8, %v62_v10 }
  0x89   :  { %67 = vst.msk [vmem:[%s152_s3] sm:$0xff] %vm41_vm0, %v58_v11 }
  0x8a   :  { %69 = vst.msk [vmem:[%s152_s3 + $0x10] sm:$0xff] %vm41_vm0, %v63_v12 }
  0x8e   :  { %v59_v13 = vpop.f32.mrf.mxu0  ;;  %v64_v14 = vpop.f32.mrf.mxu1 }
  0x8f   :  { %v60_v15 = vadd.f32 %v89_v8, %v59_v13  ;;  %v65_v16 = vadd.f32 %v89_v8, %v64_v14 }
  0x91   :  { %68 = vst.msk [vmem:[%s152_s3 + $0x8] sm:$0xff] %vm41_vm0, %v60_v15 }
  0x92   :  { %70 = vst.msk [vmem:[%s152_s3 + $0x18] sm:$0xff] %vm41_vm0, %v65_v16 }

// kernel: vqvae_forward.31
= control target key start
LH: loop header
LB: loop body
LE: loop exit
PB: predicated region body
PF: predicated region fallthrough
CT: control target
= control target key end

     0   :  { %vm85_vm0 = vcmask 261120   ;;  %s1736_s1 = inlined_call_operand.vmem [shape: f32[512,32], index: 1, kind: input, shape index: {}]   ;;  %s1737_s0 = inlined_call_operand.vmem [shape: f32[32,32], index: 0, kind: input, shape index: {}]   ;;  %s1738_s2 = inlined_call_operand.vmem [shape: f32[1,512], index: 2, kind: input, shape index: {}]   ;;  %s1739_s4 = inlined_call_operand.vmem [shape: s32[32,1], index: 4, kind: output, shape index: {1}]   ;;  %s1740_s3 = inlined_call_operand.vmem [shape: f32[32,32], index: 3, kind: output, shape index: {0}]   ;;  %s1741_s5 = inlined_call_operand.vmem [shape: f32[32,1], index: 5, kind: output, shape index: {2}]  }
   0x1   :  { %v973_v0 = vld [vmem:[%s1736_s1 + $0x178] sm:$0xff]  ;;  %v1001_v4 = vld [vmem:[%s1736_s1 + $0x170] sm:$0xff]  ;;  %v1029_v8 = vld [vmem:[%s1736_s1 + $0x168] sm:$0xff] }
   0x2   :  { %v978_v1 = vld [vmem:[%s1736_s1 + $0x1f8] sm:$0xff]  ;;  %866 = vmatpush.xpose.msk.msra.mxu2 %vm85_vm0, %v973_v0  ;;  %v1006_v5 = vld [vmem:[%s1736_s1 + $0x1f0] sm:$0xff]  ;;  %v1034_v9 = vld [vmem:[%s1736_s1 + $0x1e8] sm:$0xff] }
   0x3   :  { %v983_v2 = vld [vmem:[%s1736_s1 + $0x78] sm:$0xff]  ;;  %886 = vmatpush.xpose.msk.msra.mxu3 %vm85_vm0, %v978_v1  ;;  %v1011_v6 = vld [vmem:[%s1736_s1 + $0x70] sm:$0xff]  ;;  %v1039_v10 = vld [vmem:[%s1736_s1 + $0x68] sm:$0xff] }
   0x4   :  { %v992_v3 = vld [vmem:[%s1736_s1 + $0xf8] sm:$0xff]  ;;  %826 = vmatpush.xpose.msk.msra.mxu0 %vm85_vm0, %v983_v2  ;;  %v1016_v7 = vld [vmem:[%s1736_s1 + $0xf0] sm:$0xff]  ;;  %v1044_v11 = vld [vmem:[%s1736_s1 + $0xe8] sm:$0xff] }
   0x5   :  { %846 = vmatpush.xpose.msk.msra.mxu1 %vm85_vm0, %v992_v3  ;;  %v1057_v12 = vld [vmem:[%s1736_s1 + $0x160] sm:$0xff]  ;;  %v1085_v16 = vld [vmem:[%s1736_s1 + $0x158] sm:$0xff]  ;;  %v1113_v20 = vld [vmem:[%s1736_s1 + $0x150] sm:$0xff] }
   0x6   :  { %867 = vmatpush.xpose.msk.msra.mxu2 %vm85_vm0, %v1001_v4  ;;  %v1062_v13 = vld [vmem:[%s1736_s1 + $0x1e0] sm:$0xff]  ;;  %v1090_v17 = vld [vmem:[%s1736_s1 + $0x1d8] sm:$0xff]  ;;  %v1118_v21 = vld [vmem:[%s1736_s1 + $0x1d0] sm:$0xff] }
   0x7   :  { %887 = vmatpush.xpose.msk.msra.mxu3 %vm85_vm0, %v1006_v5  ;;  %v1067_v14 = vld [vmem:[%s1736_s1 + $0x60] sm:$0xff]  ;;  %v1095_v18 = vld [vmem:[%s1736_s1 + $0x58] sm:$0xff]  ;;  %v1123_v22 = vld [vmem:[%s1736_s1 + $0x50] sm:$0xff] }
   0x8   :  { %827 = vmatpush.xpose.msk.msra.mxu0 %vm85_vm0, %v1011_v6  ;;  %v1072_v15 = vld [vmem:[%s1736_s1 + $0xe0] sm:$0xff]  ;;  %v1100_v19 = vld [vmem:[%s1736_s1 + $0xd8] sm:$0xff]  ;;  %v1128_v23 = vld [vmem:[%s1736_s1 + $0xd0] sm:$0xff] }
   0x9   :  { %847 = vmatpush.xpose.msk.msra.mxu1 %vm85_vm0, %v1016_v7  ;;  %v1141_v24 = vld [vmem:[%s1736_s1 + $0x148] sm:$0xff]  ;;  %v1169_v28 = vld [vmem:[%s1736_s1 + $0x140] sm:$0xff]  ;;  %v1197_v32 = vld [vmem:[%s1736_s1 + $0x138] sm:$0xff] }
   0xa   :  { %868 = vmatpush.xpose.msk.msra.mxu2 %vm85_vm0, %v1029_v8  ;;  %v1146_v25 = vld [vmem:[%s1736_s1 + $0x1c8] sm:$0xff]  ;;  %v1174_v29 = vld [vmem:[%s1736_s1 + $0x1c0] sm:$0xff]  ;;  %v1202_v33 = vld [vmem:[%s1736_s1 + $0x1b8] sm:$0xff] }
   0xb   :  { %888 = vmatpush.xpose.msk.msra.mxu3 %vm85_vm0, %v1034_v9  ;;  %v1151_v26 = vld [vmem:[%s1736_s1 + $0x48] sm:$0xff]  ;;  %v1179_v30 = vld [vmem:[%s1736_s1 + $0x40] sm:$0xff]  ;;  %v1207_v34 = vld [vmem:[%s1736_s1 + $0x38] sm:$0xff] }
   0xc   :  { %828 = vmatpush.xpose.msk.msra.mxu0 %vm85_vm0, %v1039_v10  ;;  %v1156_v27 = vld [vmem:[%s1736_s1 + $0xc8] sm:$0xff]  ;;  %v1184_v31 = vld [vmem:[%s1736_s1 + $0xc0] sm:$0xff]  ;;  %v1212_v35 = vld [vmem:[%s1736_s1 + $0xb8] sm:$0xff] }
   0xd   :  { %848 = vmatpush.xpose.msk.msra.mxu1 %vm85_vm0, %v1044_v11  ;;  %v1225_v36 = vld [vmem:[%s1736_s1 + $0x130] sm:$0xff]  ;;  %v1253_v40 = vld [vmem:[%s1736_s1 + $0x128] sm:$0xff]  ;;  %v1273_v44 = vld [vmem:[%s1737_s0] sm:$0xff] }
   0xe   :  { %869 = vmatpush.xpose.msk.msra.mxu2 %vm85_vm0, %v1057_v12  ;;  %v1230_v37 = vld [vmem:[%s1736_s1 + $0x1b0] sm:$0xff]  ;;  %v1258_v41 = vld [vmem:[%s1736_s1 + $0x1a8] sm:$0xff]  ;;  %v406_v45 = vmul.f32 %v1273_v44, %v1273_v44  ;;  %v1288_v46 = vld [vmem:[%s1736_s1 + $0x120] sm:$0xff] }
   0xf   :  { %889 = vmatpush.xpose.msk.msra.mxu3 %vm85_vm0, %v1062_v13  ;;  %v1235_v38 = vld [vmem:[%s1736_s1 + $0x30] sm:$0xff]  ;;  %v1263_v42 = vld [vmem:[%s1736_s1 + $0x28] sm:$0xff]  ;;  %v1293_v47 = vld [vmem:[%s1736_s1 + $0x1a0] sm:$0xff] }
  0x10   :  { %829 = vmatpush.xpose.msk.msra.mxu0 %vm85_vm0, %v1067_v14  ;;  %v1240_v39 = vld [vmem:[%s1736_s1 + $0xb0] sm:$0xff]  ;;  %v1268_v43 = vld [vmem:[%s1736_s1 + $0xa8] sm:$0xff]  ;;  %v1298_v48 = vld [vmem:[%s1736_s1 + $0x20] sm:$0xff]  ;;  %v410_v50 = vsel %vm85_vm0, %v406_v45, 0.0 }
  0x11   :  { %849 = vmatpush.xpose.msk.msra.mxu1 %vm85_vm0, %v1072_v15  ;;  %v1303_v49 = vld [vmem:[%s1736_s1 + $0xa0] sm:$0xff]  ;;  %411 = vadd.xlane.f32.xlu0 %v410_v50  ;;  %v1317_v51 = vld [vmem:[%s1736_s1 + $0x118] sm:$0xff]  ;;  %v1337_v55 = vld [vmem:[%s1737_s0 + $0x8] sm:$0xff] }
  0x12   :  { %870 = vmatpush.xpose.msk.msra.mxu2 %vm85_vm0, %v1085_v16  ;;  %v1322_v52 = vld [vmem:[%s1736_s1 + $0x198] sm:$0xff]  ;;  %v407_v56 = vmul.f32 %v1337_v55, %v1337_v55  ;;  %v1352_v57 = vld [vmem:[%s1736_s1 + $0x110] sm:$0xff]  ;;  %v1381_v62 = vld [vmem:[%s1736_s1 + $0x108] sm:$0xff] }
  0x13   :  { %890 = vmatpush.xpose.msk.msra.mxu3 %vm85_vm0, %v1090_v17  ;;  %v1327_v53 = vld [vmem:[%s1736_s1 + $0x18] sm:$0xff]  ;;  %v1357_v58 = vld [vmem:[%s1736_s1 + $0x190] sm:$0xff]  ;;  %1752 = vst [vmem:[#allocation5_spill] sm:$0xff] %v1381_v62  ;;  %v1386_v63 = vld [vmem:[%s1736_s1 + $0x188] sm:$0xff] }
  0x14   :  { %830 = vmatpush.xpose.msk.msra.mxu0 %vm85_vm0, %v1095_v18  ;;  %v1332_v54 = vld [vmem:[%s1736_s1 + $0x98] sm:$0xff]  ;;  %1749 = vst [vmem:[#allocation2_spill] sm:$0xff] %v1357_v58  ;;  %v1362_v59 = vld [vmem:[%s1736_s1 + $0x10] sm:$0xff]  ;;  %v413_v61 = vsel %vm85_vm0, %v407_v56, 0.0  ;;  %v1391_v45 = vld [vmem:[%s1736_s1 + $0x8] sm:$0xff] }
  0x15   :  { %850 = vmatpush.xpose.msk.msra.mxu1 %vm85_vm0, %v1100_v19  ;;  %1750 = vst [vmem:[#allocation3_spill] sm:$0xff] %v1362_v59  ;;  %v1367_v60 = vld [vmem:[%s1736_s1 + $0x90] sm:$0xff]  ;;  %v1396_v50 = vld [vmem:[%s1736_s1 + $0x88] sm:$0xff] }
  0x16   :  { %871 = vmatpush.xpose.msk.msra.mxu2 %vm85_vm0, %v1113_v20  ;;  %1751 = vst [vmem:[#allocation4_spill] sm:$0xff] %v1367_v60  ;;  %v1401_v56 = vld [vmem:[%s1737_s0 + $0x10] sm:$0xff] }
  0x17   :  { %891 = vmatpush.xpose.msk.msra.mxu3 %vm85_vm0, %v1118_v21  ;;  %1753 = vst [vmem:[#allocation6_spill] sm:$0xff] %v1386_v63 }
  0x18   :  { %831 = vmatpush.xpose.msk.msra.mxu0 %vm85_vm0, %v1123_v22  ;;  %1754 = vst [vmem:[#allocation7_spill] sm:$0xff] %v1391_v45 }
  0x19   :  { %851 = vmatpush.xpose.msk.msra.mxu1 %vm85_vm0, %v1128_v23  ;;  %414 = vadd.xlane.f32.xlu0 %v413_v61  ;;  %1755 = vst [vmem:[#allocation8_spill] sm:$0xff] %v1396_v50  ;;  %v408_v61 = vmul.f32 %v1401_v56, %v1401_v56 }
  0x1a   :  { %872 = vmatpush.xpose.msk.msra.mxu2 %vm85_vm0, %v1141_v24 }
  0x1b   :  { %892 = vmatpush.xpose.msk.msra.mxu3 %vm85_vm0, %v1146_v25 }
  0x1c   :  { %832 = vmatpush.xpose.msk.msra.mxu0 %vm85_vm0, %v1151_v26 }
  0x1d   :  { %852 = vmatpush.xpose.msk.msra.mxu1 %vm85_vm0, %v1156_v27 }
  0x1e   :  { %873 = vmatpush.xpose.msk.msra.mxu2 %vm85_vm0, %v1169_v28 }
  0x1f   :  { %893 = vmatpush.xpose.msk.msra.mxu3 %vm85_vm0, %v1174_v29 }
  0x20   :  { %833 = vmatpush.xpose.msk.msra.mxu0 %vm85_vm0, %v1179_v30 }
  0x21   :  { %853 = vmatpush.xpose.msk.msra.mxu1 %vm85_vm0, %v1184_v31 }
  0x22   :  { %874 = vmatpush.xpose.msk.msra.mxu2 %vm85_vm0, %v1197_v32 }
  0x23   :  { %894 = vmatpush.xpose.msk.msra.mxu3 %vm85_vm0, %v1202_v33 }
  0x24   :  { %834 = vmatpush.xpose.msk.msra.mxu0 %vm85_vm0, %v1207_v34 }
  0x25   :  { %854 = vmatpush.xpose.msk.msra.mxu1 %vm85_vm0, %v1212_v35 }
  0x26   :  { %875 = vmatpush.xpose.msk.msra.mxu2 %vm85_vm0, %v1225_v36 }
  0x27   :  { %895 = vmatpush.xpose.msk.msra.mxu3 %vm85_vm0, %v1230_v37 }
  0x28   :  { %835 = vmatpush.xpose.msk.msra.mxu0 %vm85_vm0, %v1235_v38 }
  0x29   :  { %855 = vmatpush.xpose.msk.msra.mxu1 %vm85_vm0, %v1240_v39 }
  0x2a   :  { %876 = vmatpush.xpose.msk.msra.mxu2 %vm85_vm0, %v1253_v40 }
  0x2b   :  { %896 = vmatpush.xpose.msk.msra.mxu3 %vm85_vm0, %v1258_v41 }
  0x2c   :  { %836 = vmatpush.xpose.msk.msra.mxu0 %vm85_vm0, %v1263_v42 }
  0x2d   :  { %856 = vmatpush.xpose.msk.msra.mxu1 %vm85_vm0, %v1268_v43 }
  0x2e   :  { %877 = vmatpush.xpose.msk.msra.mxu2 %vm85_vm0, %v1288_v46 }
  0x2f   :  { %897 = vmatpush.xpose.msk.msra.mxu3 %vm85_vm0, %v1293_v47 }
  0x30   :  { %837 = vmatpush.xpose.msk.msra.mxu0 %vm85_vm0, %v1298_v48 }
  0x31   :  { %857 = vmatpush.xpose.msk.msra.mxu1 %vm85_vm0, %v1303_v49 }
  0x32   :  { %878 = vmatpush.xpose.msk.msra.mxu2 %vm85_vm0, %v1317_v51 }
  0x33   :  { %898 = vmatpush.xpose.msk.msra.mxu3 %vm85_vm0, %v1322_v52 }
  0x34   :  { %838 = vmatpush.xpose.msk.msra.mxu0 %vm85_vm0, %v1327_v53 }
  0x35   :  { %858 = vmatpush.xpose.msk.msra.mxu1 %vm85_vm0, %v1332_v54 }
  0x36   :  { %879 = vmatpush.xpose.msk.msra.mxu2 %vm85_vm0, %v1352_v57 }
  0x37   :  { %899 = vmatpush.xpose.msk.msra.mxu3 %vm85_vm0, %v1357_v58  ;;  %v1416_v58 = vld [vmem:[%s1736_s1 + $0x100] sm:$0xff] }
  0x38   :  { %839 = vmatpush.xpose.msk.msra.mxu0 %vm85_vm0, %v1362_v59 }
  0x39   :  { %859 = vmatpush.xpose.msk.msra.mxu1 %vm85_vm0, %v1367_v60  ;;  %v1437_v60 = vld [vmem:[%s1737_s0 + $0x18] sm:$0xff] }
  0x3a   :  { %880 = vmatpush.xpose.msk.msra.mxu2 %vm85_vm0, %v1381_v62  ;;  %v1421_v62 = vld [vmem:[%s1736_s1 + $0x180] sm:$0xff]  ;;  %v409_v59 = vmul.f32 %v1437_v60, %v1437_v60 }
  0x3b   :  { %900 = vmatpush.xpose.msk.msra.mxu3 %vm85_vm0, %v1386_v63  ;;  %v1426_v63 = vld [vmem:[%s1736_s1] sm:$0xff] }
  0x3c   :  { %840 = vmatpush.xpose.msk.msra.mxu0 %vm85_vm0, %v1391_v45  ;;  %v1431_v45 = vld [vmem:[%s1736_s1 + $0x80] sm:$0xff] }
  0x3d   :  { %860 = vmatpush.xpose.msk.msra.mxu1 %vm85_vm0, %v1396_v50  ;;  %v416_v50 = vsel %vm85_vm0, %v408_v61, 0.0 }
  0x3e   :  { %417 = vadd.xlane.f32.xlu1 %v416_v50  ;;  %881 = vmatpush.xpose.msk.msra.mxu2 %vm85_vm0, %v1416_v58  ;;  %v419_v50 = vsel %vm85_vm0, %v409_v59, 0.0 }
  0x3f   :  { %901 = vmatpush.xpose.msk.msra.mxu3 %vm85_vm0, %v1421_v62 }
  0x40   :  { %841 = vmatpush.xpose.msk.msra.mxu0 %vm85_vm0, %v1426_v63 }
  0x41   :  { %861 = vmatpush.xpose.msk.msra.mxu1 %vm85_vm0, %v1431_v45  ;;  %882 = vmatmul.msk.f32.vlgmr.msra.gmra.mxu2 %vm85_vm0, %v1273_v44 }
  0x42   :  { %728 = vmatpush.msrb.mxu2 %v973_v0  ;;  %902 = vmatmul.msk.f32.vlgmr.msra.gmra.mxu3 %vm85_vm0, %v1273_v44  ;;  %v1756_v0 = vld [vmem:[#allocation3_spill] sm:$0xff] }
  0x43   :  { %842 = vmatmul.msk.f32.vlgmr.msra.gmra.mxu0 %vm85_vm0, %v1273_v44  ;;  %757 = vmatpush.msrb.mxu3 %v978_v1  ;;  %v1757_v1 = vld [vmem:[#allocation4_spill] sm:$0xff] }
  0x44   :  { %670 = vmatpush.msrb.mxu0 %v983_v2  ;;  %862 = vmatmul.msk.f32.vlgmr.msra.gmra.mxu1 %vm85_vm0, %v1273_v44  ;;  %v1758_v2 = vld [vmem:[#allocation2_spill] sm:$0xff] }
  0x45   :  { %699 = vmatpush.msrb.mxu1 %v992_v3  ;;  %729 = vmatpush.msrb.mxu2 %v1001_v4  ;;  %v1759_v3 = vld [vmem:[#allocation5_spill] sm:$0xff]  ;;  %v1760_v4 = vld [vmem:[#allocation7_spill] sm:$0xff] }
  0x46   :  { %671 = vmatpush.msrb.mxu0 %v1011_v6  ;;  %420 = vadd.xlane.f32.xlu1 %v419_v50  ;;  %v1762_v6 = vld [vmem:[#allocation6_spill] sm:$0xff] }
  0x47   :  { %700 = vmatpush.msrb.mxu1 %v1016_v7  ;;  %758 = vmatpush.msrb.mxu3 %v1006_v5  ;;  %v1761_v5 = vld [vmem:[#allocation8_spill] sm:$0xff] }
  0x48   :  { %730 = vmatpush.msrb.mxu2 %v1029_v8  ;;  %672 = vmatpush.msrb.mxu0 %v1039_v10  ;;  %v454_v8 = vld [vmem:[%s1738_s2] sm:$0xf] }
  0x49   :  { %701 = vmatpush.msrb.mxu1 %v1044_v11  ;;  %759 = vmatpush.msrb.mxu3 %v1034_v9 }
  0x4a   :  { %731 = vmatpush.msrb.mxu2 %v1057_v12  ;;  %903 = vmatmul.msk.f32.gmra.mxu3 %vm85_vm0, %v1337_v55 }
  0x4b   :  { %883 = vmatmul.msk.f32.gmra.mxu2 %vm85_vm0, %v1337_v55  ;;  %843 = vmatmul.msk.f32.gmra.mxu0 %vm85_vm0, %v1337_v55 }
  0x4c   :  { %863 = vmatmul.msk.f32.gmra.mxu1 %vm85_vm0, %v1337_v55  ;;  %673 = vmatpush.msrb.mxu0 %v1067_v14  ;;  %v1551_v14 = vperm.slane %v454_v8, 1 }
  0x4d   :  { %702 = vmatpush.msrb.mxu1 %v1072_v15  ;;  %760 = vmatpush.msrb.mxu3 %v1062_v13  ;;  %v1549_v13 = vperm.slane %v454_v8, 0 }
  0x4e   :  { %732 = vmatpush.msrb.mxu2 %v1085_v16  ;;  %674 = vmatpush.msrb.mxu0 %v1095_v18 }
  0x4f   :  { %703 = vmatpush.msrb.mxu1 %v1100_v19  ;;  %761 = vmatpush.msrb.mxu3 %v1090_v17 }
  0x50   :  { %733 = vmatpush.msrb.mxu2 %v1113_v20  ;;  %675 = vmatpush.msrb.mxu0 %v1123_v22 }
  0x51   :  { %704 = vmatpush.msrb.mxu1 %v1128_v23  ;;  %762 = vmatpush.msrb.mxu3 %v1118_v21  ;;  %v1559_v23 = vperm.slane %v454_v8, 2 }
  0x52   :  { %734 = vmatpush.msrb.mxu2 %v1141_v24  ;;  %904 = vmatmul.msk.f32.gmra.mxu3 %vm85_vm0, %v1401_v56 }
  0x53   :  { %884 = vmatmul.msk.f32.gmra.mxu2 %vm85_vm0, %v1401_v56  ;;  %844 = vmatmul.msk.f32.gmra.mxu0 %vm85_vm0, %v1401_v56 }
  0x54   :  { %864 = vmatmul.msk.f32.gmra.mxu1 %vm85_vm0, %v1401_v56  ;;  %676 = vmatpush.msrb.mxu0 %v1151_v26 }
  0x55   :  { %705 = vmatpush.msrb.mxu1 %v1156_v27  ;;  %763 = vmatpush.msrb.mxu3 %v1146_v25 }
  0x56   :  { %735 = vmatpush.msrb.mxu2 %v1169_v28  ;;  %677 = vmatpush.msrb.mxu0 %v1179_v30 }
  0x57   :  { %706 = vmatpush.msrb.mxu1 %v1184_v31  ;;  %764 = vmatpush.msrb.mxu3 %v1174_v29  ;;  %v1561_v29 = vperm.slane %v454_v8, 3 }
  0x58   :  { %736 = vmatpush.msrb.mxu2 %v1197_v32  ;;  %678 = vmatpush.msrb.mxu0 %v1207_v34 }
  0x59   :  { %707 = vmatpush.msrb.mxu1 %v1212_v35  ;;  %765 = vmatpush.msrb.mxu3 %v1202_v33 }
  0x5a   :  { %737 = vmatpush.msrb.mxu2 %v1225_v36  ;;  %905 = vmatmul.msk.f32.gmra.mxu3 %vm85_vm0, %v1437_v60 }
  0x5b   :  { %885 = vmatmul.msk.f32.gmra.mxu2 %vm85_vm0, %v1437_v60  ;;  %845 = vmatmul.msk.f32.gmra.mxu0 %vm85_vm0, %v1437_v60 }
  0x5c   :  { %865 = vmatmul.msk.f32.gmra.mxu1 %vm85_vm0, %v1437_v60  ;;  %679 = vmatpush.msrb.mxu0 %v1235_v38 }
  0x5d   :  { %708 = vmatpush.msrb.mxu1 %v1240_v39  ;;  %766 = vmatpush.msrb.mxu3 %v1230_v37 }
  0x5e   :  { %738 = vmatpush.msrb.mxu2 %v1253_v40  ;;  %680 = vmatpush.msrb.mxu0 %v1263_v42 }
  0x5f   :  { %709 = vmatpush.msrb.mxu1 %v1268_v43  ;;  %767 = vmatpush.msrb.mxu3 %v1258_v41 }
  0x60   :  { %739 = vmatpush.msrb.mxu2 %v1288_v46  ;;  %681 = vmatpush.msrb.mxu0 %v1298_v48 }
  0x61   :  { %710 = vmatpush.msrb.mxu1 %v1303_v49  ;;  %768 = vmatpush.msrb.mxu3 %v1293_v47 }
  0x62   :  { %740 = vmatpush.msrb.mxu2 %v1317_v51  ;;  %682 = vmatpush.msrb.mxu0 %v1327_v53 }
  0x63   :  { %711 = vmatpush.msrb.mxu1 %v1332_v54  ;;  %769 = vmatpush.msrb.mxu3 %v1322_v52 }
  0x64   :  { %741 = vmatpush.msrb.mxu2 %v1352_v57  ;;  %683 = vmatpush.msrb.mxu0 %v1756_v0 }
  0x65   :  { %712 = vmatpush.msrb.mxu1 %v1757_v1  ;;  %770 = vmatpush.msrb.mxu3 %v1758_v2 }
  0x66   :  { %742 = vmatpush.msrb.mxu2 %v1759_v3  ;;  %684 = vmatpush.msrb.mxu0 %v1760_v4 }
  0x67   :  { %713 = vmatpush.msrb.mxu1 %v1761_v5  ;;  %771 = vmatpush.msrb.mxu3 %v1762_v6 }
  0x68   :  { %743 = vmatpush.msrb.mxu2 %v1416_v58  ;;  %685 = vmatpush.msrb.mxu0 %v1426_v63 }
  0x69   :  { %714 = vmatpush.msrb.mxu1 %v1431_v45  ;;  %772 = vmatpush.msrb.mxu3 %v1421_v62 }
  0x84   :  { %v412_v7 = vpop.xlane.xlu0 %411 }
  0x8c   :  { %v415_v24 = vpop.xlane.xlu0 %414 }
  0xb1   :  { %v418_v38 = vpop.xlane.xlu1 %417 }
  0xb9   :  { %v421_v5 = vpop.xlane.xlu1 %420 }
  0xc0   :  { %v307_v9 = vpop.f32.mrf.mxu0 }
  0xc1   :  { %v336_v10 = vpop.f32.mrf.mxu1  ;;  %v422_v11 = vmul.f32 2.0, %v307_v9 }
  0xc2   :  { %v423_v12 = vmul.f32 2.0, %v336_v10 }
  0xc3   :  { %v438_v15 = vsub.f32 %v412_v7, %v422_v11 }
  0xc4   :  { %v439_v16 = vsub.f32 %v412_v7, %v423_v12  ;;  %v365_v17 = vpop.f32.mrf.mxu2 }
  0xc5   :  { %v394_v18 = vpop.f32.mrf.mxu3  ;;  %v1554_v19 = vadd.f32 %v1549_v13, %v438_v15  ;;  %v424_v21 = vmul.f32 2.0, %v365_v17 }
  0xc6   :  { %v1557_v20 = vadd.f32 %v1551_v14, %v439_v16  ;;  %v425_v22 = vmul.f32 2.0, %v394_v18 }
  0xc7   :  { %v440_v25 = vsub.f32 %v412_v7, %v424_v21 }
  0xc8   :  { %v441_v26 = vsub.f32 %v412_v7, %v425_v22  ;;  %v310_v27 = vpop.f32.mrf.mxu0  ;;  %v485_v30 = vmin.f32 %v1554_v19, %v1557_v20 }
  0xc9   :  { %v339_v28 = vpop.f32.mrf.mxu1  ;;  %v426_v31 = vmul.f32 2.0, %v310_v27  ;;  %v1566_v33 = vadd.f32 %v1559_v23, %v440_v25 }
  0xca   :  { %v427_v32 = vmul.f32 2.0, %v339_v28  ;;  %v1569_v36 = vadd.f32 %v1561_v29, %v441_v26 }
  0xcb   :  { %v442_v34 = vsub.f32 %v415_v24, %v426_v31  ;;  %v486_v37 = vmin.f32 %v485_v30, %v1566_v33 }
  0xcc   :  { %v443_v35 = vsub.f32 %v415_v24, %v427_v32 }
  0xcd   :  { %v397_v40 = vpop.f32.mrf.mxu3  ;;  %v1573_v41 = vadd.f32 %v1549_v13, %v442_v34  ;;  %v487_v47 = vmin.f32 %v486_v37, %v1569_v36 }
  0xce   :  { %v368_v39 = vpop.f32.mrf.mxu2  ;;  %v1576_v42 = vadd.f32 %v1551_v14, %v443_v35  ;;  %v429_v46 = vmul.f32 2.0, %v397_v40 }
  0xcf   :  { %v428_v43 = vmul.f32 2.0, %v368_v39  ;;  %488 = vmin.xlane.f32.xlu2 %v487_v47 }
  0xd0   :  { %v445_v49 = vsub.f32 %v415_v24, %v429_v46  ;;  %v313_v51 = vpop.f32.mrf.mxu0  ;;  %v490_v53 = vmin.f32 %v1573_v41, %v1576_v42 }
  0xd1   :  { %v444_v48 = vsub.f32 %v415_v24, %v428_v43  ;;  %v342_v52 = vpop.f32.mrf.mxu1  ;;  %v430_v54 = vmul.f32 2.0, %v313_v51 }
  0xd2   :  { %v431_v57 = vmul.f32 2.0, %v342_v52  ;;  %v1585_v63 = vadd.f32 %v1561_v29, %v445_v49 }
  0xd3   :  { %v1582_v58 = vadd.f32 %v1559_v23, %v444_v48  ;;  %v446_v59 = vsub.f32 %v418_v38, %v430_v54 }
  0xd4   :  { %v447_v62 = vsub.f32 %v418_v38, %v431_v57 }
  0xd5   :  { %v491_v45 = vmin.f32 %v490_v53, %v1582_v58  ;;  %v400_v50 = vpop.f32.mrf.mxu3  ;;  %v1589_v0 = vadd.f32 %v1549_v13, %v446_v59 }
  0xd6   :  { %v371_v61 = vpop.f32.mrf.mxu2  ;;  %v1592_v1 = vadd.f32 %v1551_v14, %v447_v62  ;;  %v433_v3 = vmul.f32 2.0, %v400_v50 }
  0xd7   :  { %v432_v2 = vmul.f32 2.0, %v371_v61  ;;  %v492_v4 = vmin.f32 %v491_v45, %v1585_v63 }
  0xd8   :  { %v449_v7 = vsub.f32 %v418_v38, %v433_v3  ;;  %v316_v8 = vpop.f32.mrf.mxu0  ;;  %v495_v10 = vmin.f32 %v1589_v0, %v1592_v1 }
  0xd9   :  { %v448_v6 = vsub.f32 %v418_v38, %v432_v2  ;;  %493 = vmin.xlane.f32.xlu2 %v492_v4  ;;  %v345_v9 = vpop.f32.mrf.mxu1  ;;  %v434_v11 = vmul.f32 2.0, %v316_v8  ;;  %v480_v38 = vlaneseq }
  0xda   :  { %v435_v12 = vmul.f32 2.0, %v345_v9  ;;  %v1601_v18 = vadd.f32 %v1561_v29, %v449_v7 }
  0xdb   :  { %v1598_v15 = vadd.f32 %v1559_v23, %v448_v6  ;;  %v450_v16 = vsub.f32 %v421_v5, %v434_v11  ;;  %v1621_v39 = vand.u32 127, %v480_v38 }
  0xdc   :  { %v451_v17 = vsub.f32 %v421_v5, %v435_v12 }
  0xdd   :  { %v496_v21 = vmin.f32 %v495_v10, %v1598_v15  ;;  %v403_v24 = vpop.f32.mrf.mxu3  ;;  %v1605_v25 = vadd.f32 %v1549_v13, %v450_v16  ;;  %v1624_v40 = vadd.s32 128, %v1621_v39  ;;  %v1627_v43 = vadd.s32 256, %v1621_v39 }
  0xde   :  { %v374_v22 = vpop.f32.mrf.mxu2  ;;  %v1608_v26 = vadd.f32 %v1551_v14, %v451_v17  ;;  %v437_v28 = vmul.f32 2.0, %v403_v24  ;;  %v1635_v47 = vadd.s32 384, %v1621_v39 }
  0xdf   :  { %v436_v27 = vmul.f32 2.0, %v374_v22  ;;  %v497_v30 = vmin.f32 %v496_v21, %v1601_v18 }
  0xe0   :  { %v453_v32 = vsub.f32 %v421_v5, %v437_v28  ;;  %v500_v34 = vmin.f32 %v1605_v25, %v1608_v26 }
  0xe1   :  { %v452_v31 = vsub.f32 %v421_v5, %v436_v27  ;;  %498 = vmin.xlane.f32.xlu0 %v497_v30 }
  0xe2   :  { %v1617_v37 = vadd.f32 %v1561_v29, %v453_v32 }
  0xe3   :  { %v1614_v35 = vadd.f32 %v1559_v23, %v452_v31 }
  0xe5   :  { %v501_v13 = vmin.f32 %v500_v34, %v1614_v35 }
  0xe7   :  { %v502_v14 = vmin.f32 %v501_v13, %v1617_v37 }
  0xe9   :  { %503 = vmin.xlane.f32.xlu1 %v502_v14 }
 0x142   :  { %v489_v46 = vpop.xlane.xlu2 %488 }
 0x143   :  { %vm505_vm1 = vcmp.le.f32.partialorder %v1554_v19, %v489_v46  ;;  %vm506_vm2 = vcmp.le.f32.partialorder %v1557_v20, %v489_v46  ;;  %vm507_vm3 = vcmp.le.f32.partialorder %v1566_v33, %v489_v46  ;;  %vm508_vm4 = vcmp.le.f32.partialorder %v1569_v36, %v489_v46 }
 0x144   :  { %v521_v23 = vsel %vm505_vm1, %v1621_v39, 512  ;;  %v522_v29 = vsel %vm506_vm2, %v1624_v40, 512  ;;  %v523_v48 = vsel %vm507_vm3, %v1627_v43, 512  ;;  %v524_v19 = vsel %vm508_vm4, %v1635_v47, 512 }
 0x145   :  { %vm537_vm5 = vcmp.lt.s32.totalorder %v521_v23, %v522_v29 }
 0x146   :  { %v538_v49 = vsel %vm537_vm5, %v521_v23, %v522_v29 }
 0x147   :  { %vm539_vm6 = vcmp.lt.s32.totalorder %v538_v49, %v523_v48 }
 0x148   :  { %v540_v51 = vsel %vm539_vm6, %v538_v49, %v523_v48 }
 0x149   :  { %vm541_vm7 = vcmp.lt.s32.totalorder %v540_v51, %v524_v19 }
 0x14a   :  { %v542_v33 = vsel %vm541_vm7, %v540_v51, %v524_v19  ;;  %v939_v51 = vmov 1.0  }
 0x14b   :  { %v544_v53 = vshra.s32 %v542_v33, 16  ;;  %v543_v21 = vand.u32 65535, %v542_v33 }
 0x14c   :  { %v494_v20 = vpop.xlane.xlu2 %493 }
 0x14d   :  { %vm509_vm8 = vcmp.le.f32.partialorder %v1573_v41, %v494_v20  ;;  %vm510_vm9 = vcmp.le.f32.partialorder %v1576_v42, %v494_v20  ;;  %vm511_vm10 = vcmp.le.f32.partialorder %v1582_v58, %v494_v20  ;;  %vm512_vm11 = vcmp.le.f32.partialorder %v1585_v63, %v494_v20 }
 0x14e   :  { %v525_v52 = vsel %vm509_vm8, %v1621_v39, 512  ;;  %v526_v36 = vsel %vm510_vm9, %v1624_v40, 512  ;;  %v527_v54 = vsel %vm511_vm10, %v1627_v43, 512  ;;  %v546_v57 = vcvt.s32.f32 %v544_v53 }
 0x14f   :  { %vm557_vm12 = vcmp.lt.s32.totalorder %v525_v52, %v526_v36  ;;  %v528_v41 = vsel %vm512_vm11, %v1635_v47, 512  ;;  %v545_v24 = vcvt.s32.f32 %v543_v21 }
 0x150   :  { %v558_v59 = vsel %vm557_vm12, %v525_v52, %v526_v36  ;;  %547 = vmin.xlane.f32.xlu2 %v546_v57 }
 0x151   :  { %vm559_vm13 = vcmp.lt.s32.totalorder %v558_v59, %v527_v54 }
 0x152   :  { %v560_v62 = vsel %vm559_vm13, %v558_v59, %v527_v54 }
 0x153   :  { %vm561_vm14 = vcmp.lt.s32.totalorder %v560_v62, %v528_v41 }
 0x154   :  { %v499_v42 = vpop.xlane.xlu0 %498  ;;  %v562_v58 = vsel %vm561_vm14, %v560_v62, %v528_v41 }
 0x155   :  { %vm513_vm15 = vcmp.le.f32.partialorder %v1589_v0, %v499_v42  ;;  %vm514_vm1 = vcmp.le.f32.partialorder %v1592_v1, %v499_v42  ;;  %vm515_vm2 = vcmp.le.f32.partialorder %v1598_v15, %v499_v42  ;;  %v564_v61 = vshra.s32 %v562_v58, 16 }
 0x156   :  { %v529_v63 = vsel %vm513_vm15, %v1621_v39, 512  ;;  %v530_v45 = vsel %vm514_vm1, %v1624_v40, 512  ;;  %vm516_vm3 = vcmp.le.f32.partialorder %v1601_v18, %v499_v42  ;;  %v531_v50 = vsel %vm515_vm2, %v1627_v43, 512 }
 0x157   :  { %vm577_vm4 = vcmp.lt.s32.totalorder %v529_v63, %v530_v45  ;;  %v566_v2 = vcvt.s32.f32 %v564_v61  ;;  %v532_v0 = vsel %vm516_vm3, %v1635_v47, 512  ;;  %vm617_vm3 = vcmask 7168  }
 0x158   :  { %v578_v3 = vsel %vm577_vm4, %v529_v63, %v530_v45 }
 0x159   :  { %vm579_vm5 = vcmp.lt.s32.totalorder %v578_v3, %v531_v50  ;;  %567 = vmin.xlane.f32.xlu0 %v566_v2 }
 0x15a   :  { %v580_v4 = vsel %vm579_vm5, %v578_v3, %v531_v50 }
 0x15b   :  { %vm581_vm6 = vcmp.lt.s32.totalorder %v580_v4, %v532_v0 }
 0x15c   :  { %v504_v1 = vpop.xlane.xlu1 %503  ;;  %v582_v5 = vsel %vm581_vm6, %v580_v4, %v532_v0 }
 0x15d   :  { %vm517_vm7 = vcmp.le.f32.partialorder %v1605_v25, %v504_v1  ;;  %vm518_vm8 = vcmp.le.f32.partialorder %v1608_v26, %v504_v1  ;;  %vm519_vm9 = vcmp.le.f32.partialorder %v1614_v35, %v504_v1  ;;  %v584_v8 = vshra.s32 %v582_v5, 16 }
 0x15e   :  { %v533_v6 = vsel %vm517_vm7, %v1621_v39, 512  ;;  %v534_v7 = vsel %vm518_vm8, %v1624_v40, 512  ;;  %vm520_vm10 = vcmp.le.f32.partialorder %v1617_v37, %v504_v1  ;;  %v535_v9 = vsel %vm519_vm9, %v1627_v43, 512 }
 0x15f   :  { %vm597_vm11 = vcmp.lt.s32.totalorder %v533_v6, %v534_v7  ;;  %v586_v10 = vcvt.s32.f32 %v584_v8  ;;  %v536_v12 = vsel %vm520_vm10, %v1635_v47, 512  ;;  %v563_v26 = vand.u32 65535, %v562_v58 }
 0x160   :  { %v598_v11 = vsel %vm597_vm11, %v533_v6, %v534_v7  ;;  %v583_v31 = vand.u32 65535, %v582_v5 }
 0x161   :  { %vm599_vm12 = vcmp.lt.s32.totalorder %v598_v11, %v535_v9  ;;  %587 = vmin.xlane.f32.xlu1 %v586_v10  ;;  %v565_v28 = vcvt.s32.f32 %v563_v26 }
 0x162   :  { %v600_v15 = vsel %vm599_vm12, %v598_v11, %v535_v9  ;;  %v585_v34 = vcvt.s32.f32 %v583_v31 }
 0x163   :  { %vm601_vm13 = vcmp.lt.s32.totalorder %v600_v15, %v536_v12 }
 0x164   :  { %v602_v16 = vsel %vm601_vm13, %v600_v15, %v536_v12 }
 0x165   :  { %v604_v17 = vshra.s32 %v602_v16, 16  ;;  %v603_v37 = vand.u32 65535, %v602_v16 }
 0x167   :  { %v606_v18 = vcvt.s32.f32 %v604_v17  ;;  %v605_v14 = vcvt.s32.f32 %v603_v37 }
 0x169   :  { %607 = vmin.xlane.f32.xlu2 %v606_v18 }
 0x1c3   :  { %v548_v22 = vpop.xlane.xlu2 %547 }
 0x1c4   :  { %vm549_vm14 = vcmp.eq.f32.partialorder %v546_v57, %v548_v22  ;;  %v554_v46 = vcvt.f32.s32 %v548_v22 }
 0x1c5   :  { %v550_v25 = vsel %vm549_vm14, %v545_v24, inf }
 0x1c6   :  { %551 = vmin.xlane.f32.xlu0 %v550_v25  ;;  %v555_v29 = vshll.u32 %v554_v46, 16 }
 0x1cc   :  { %v568_v27 = vpop.xlane.xlu0 %567 }
 0x1cd   :  { %vm569_vm15 = vcmp.eq.f32.partialorder %v566_v2, %v568_v27  ;;  %v574_v19 = vcvt.f32.s32 %v568_v27 }
 0x1ce   :  { %v570_v30 = vsel %vm569_vm15, %v565_v28, inf }
 0x1cf   :  { %571 = vmin.xlane.f32.xlu1 %v570_v30  ;;  %v575_v33 = vshll.u32 %v574_v19, 16 }
 0x1d4   :  { %v588_v32 = vpop.xlane.xlu1 %587 }
 0x1d5   :  { %vm589_vm1 = vcmp.eq.f32.partialorder %v586_v10, %v588_v32  ;;  %v594_v53 = vcvt.f32.s32 %v588_v32 }
 0x1d6   :  { %v590_v35 = vsel %vm589_vm1, %v585_v34, inf }
 0x1d7   :  { %591 = vmin.xlane.f32.xlu2 %v590_v35  ;;  %v595_v57 = vshll.u32 %v594_v53, 16 }
 0x1dc   :  { %v608_v13 = vpop.xlane.xlu2 %607 }
 0x1dd   :  { %vm609_vm2 = vcmp.eq.f32.partialorder %v606_v18, %v608_v13  ;;  %v614_v62 = vcvt.f32.s32 %v608_v13 }
 0x1de   :  { %v610_v38 = vsel %vm609_vm2, %v605_v14, inf }
 0x1df   :  { %611 = vmin.xlane.f32.xlu0 %v610_v38  ;;  %v615_v58 = vshll.u32 %v614_v62, 16 }
 0x239   :  { %v552_v23 = vpop.xlane.xlu0 %551 }
 0x23a   :  { %v553_v48 = vcvt.f32.s32 %v552_v23 }
 0x23c   :  { %v556_v49 = vadd.s32 %v555_v29, %v553_v48 }
 0x23e   :  { %618 = vst.msk [vmem:[%s1739_s4] sm:$0xff] %vm617_vm3, %v556_v49  ;;  %vm622_vm4 = vcmp.eq.s32.totalorder %v1621_v39, %v556_v49  ;;  %vm623_vm5 = vcmp.eq.s32.totalorder %v1624_v40, %v556_v49  ;;  %vm624_vm6 = vcmp.eq.s32.totalorder %v1627_v43, %v556_v49  ;;  %vm625_vm7 = vcmp.eq.s32.totalorder %v1635_v47, %v556_v49 }
 0x23f   :  { %922 = vmatmul.msk.f32.vlgmr.msrb.gmra.mxu0 %vm622_vm4, %v939_v51  ;;  %926 = vmatmul.msk.f32.vlgmr.msrb.gmra.mxu1 %vm623_vm5, %v939_v51 }
 0x240   :  { %930 = vmatmul.msk.f32.vlgmr.msrb.gmra.mxu2 %vm624_vm6, %v939_v51  ;;  %934 = vmatmul.msk.f32.vlgmr.msrb.gmra.mxu3 %vm625_vm7, %v939_v51 }
 0x242   :  { %v572_v20 = vpop.xlane.xlu1 %571 }
 0x243   :  { %v573_v52 = vcvt.f32.s32 %v572_v20 }
 0x245   :  { %v576_v36 = vadd.s32 %v575_v33, %v573_v52 }
 0x247   :  { %619 = vst.msk [vmem:[%s1739_s4 + $0x8] sm:$0xff] %vm617_vm3, %v576_v36  ;;  %vm626_vm8 = vcmp.eq.s32.totalorder %v1621_v39, %v576_v36  ;;  %vm627_vm9 = vcmp.eq.s32.totalorder %v1624_v40, %v576_v36  ;;  %vm628_vm10 = vcmp.eq.s32.totalorder %v1627_v43, %v576_v36  ;;  %vm629_vm11 = vcmp.eq.s32.totalorder %v1635_v47, %v576_v36 }
 0x248   :  { %923 = vmatmul.msk.f32.gmra.mxu0 %vm626_vm8, %v939_v51  ;;  %927 = vmatmul.msk.f32.gmra.mxu1 %vm627_vm9, %v939_v51 }
 0x249   :  { %931 = vmatmul.msk.f32.gmra.mxu2 %vm628_vm10, %v939_v51  ;;  %935 = vmatmul.msk.f32.gmra.mxu3 %vm629_vm11, %v939_v51 }
 0x24a   :  { %v592_v54 = vpop.xlane.xlu2 %591 }
 0x24b   :  { %v593_v59 = vcvt.f32.s32 %v592_v54 }
 0x24d   :  { %v596_v41 = vadd.s32 %v595_v57, %v593_v59 }
 0x24f   :  { %620 = vst.msk [vmem:[%s1739_s4 + $0x10] sm:$0xff] %vm617_vm3, %v596_v41  ;;  %vm630_vm12 = vcmp.eq.s32.totalorder %v1621_v39, %v596_v41  ;;  %vm631_vm13 = vcmp.eq.s32.totalorder %v1624_v40, %v596_v41  ;;  %vm632_vm14 = vcmp.eq.s32.totalorder %v1627_v43, %v596_v41  ;;  %vm633_vm15 = vcmp.eq.s32.totalorder %v1635_v47, %v596_v41 }
 0x250   :  { %924 = vmatmul.msk.f32.gmra.mxu0 %vm630_vm12, %v939_v51  ;;  %928 = vmatmul.msk.f32.gmra.mxu1 %vm631_vm13, %v939_v51 }
 0x251   :  { %932 = vmatmul.msk.f32.gmra.mxu2 %vm632_vm14, %v939_v51  ;;  %936 = vmatmul.msk.f32.gmra.mxu3 %vm633_vm15, %v939_v51 }
 0x252   :  { %v612_v42 = vpop.xlane.xlu0 %611 }
 0x253   :  { %v613_v63 = vcvt.f32.s32 %v612_v42 }
 0x255   :  { %v616_v45 = vadd.s32 %v615_v58, %v613_v63 }
 0x257   :  { %621 = vst.msk [vmem:[%s1739_s4 + $0x18] sm:$0xff] %vm617_vm3, %v616_v45  ;;  %vm634_vm1 = vcmp.eq.s32.totalorder %v1621_v39, %v616_v45  ;;  %vm635_vm2 = vcmp.eq.s32.totalorder %v1624_v40, %v616_v45  ;;  %vm636_vm4 = vcmp.eq.s32.totalorder %v1627_v43, %v616_v45  ;;  %vm637_vm5 = vcmp.eq.s32.totalorder %v1635_v47, %v616_v45 }
 0x258   :  { %925 = vmatmul.msk.f32.gmra.mxu0 %vm634_vm1, %v939_v51  ;;  %929 = vmatmul.msk.f32.gmra.mxu1 %vm635_vm2, %v939_v51 }
 0x259   :  { %933 = vmatmul.msk.f32.gmra.mxu2 %vm636_vm4, %v939_v51  ;;  %937 = vmatmul.msk.f32.gmra.mxu3 %vm637_vm5, %v939_v51 }
 0x2bc   :  { %v687_v61 = vpop.f32.mrf.mxu0  ;;  %v716_v50 = vpop.f32.mrf.mxu1 }
 0x2bd   :  { %v717_v2 = vadd.f32 %v716_v50, %v687_v61 }
 0x2c3   :  { %v745_v3 = vpop.f32.mrf.mxu2  ;;  %v774_v0 = vpop.f32.mrf.mxu3 }
 0x2c4   :  { %v746_v4 = vadd.f32 %v745_v3, %v717_v2 }
 0x2c5   :  { %v690_v1 = vpop.f32.mrf.mxu0  ;;  %v719_v5 = vpop.f32.mrf.mxu1 }
 0x2c6   :  { %v775_v6 = vadd.f32 %v774_v0, %v746_v4  ;;  %v720_v40 = vadd.f32 %v719_v5, %v690_v1 }
 0x2c8   :  { %786 = vst.msk [vmem:[%s1740_s3] sm:$0xff] %vm85_vm0, %v775_v6  ;;  %v790_v39 = vsub.f32 %v775_v6, %v1273_v44 }
 0x2ca   :  { %v794_v43 = vmul.f32 %v790_v39, %v790_v39 }
 0x2cc   :  { %v748_v47 = vpop.f32.mrf.mxu2  ;;  %v777_v7 = vpop.f32.mrf.mxu3  ;;  %v798_v9 = vsel %vm85_vm0, %v794_v43, 0.0 }
 0x2cd   :  { %v749_v8 = vadd.f32 %v748_v47, %v720_v40  ;;  %799 = vadd.xlane.f32.xlu1 %v798_v9  ;;  %v693_v10 = vpop.f32.mrf.mxu0  ;;  %v722_v11 = vpop.f32.mrf.mxu1 }
 0x2ce   :  { %v723_v16 = vadd.f32 %v722_v11, %v693_v10 }
 0x2cf   :  { %v778_v12 = vadd.f32 %v777_v7, %v749_v8 }
 0x2d1   :  { %787 = vst.msk [vmem:[%s1740_s3 + $0x8] sm:$0xff] %vm85_vm0, %v778_v12  ;;  %v791_v15 = vsub.f32 %v778_v12, %v1337_v55 }
 0x2d3   :  { %v795_v44 = vmul.f32 %v791_v15, %v791_v15 }
 0x2d4   :  { %v751_v17 = vpop.f32.mrf.mxu2  ;;  %v780_v18 = vpop.f32.mrf.mxu3 }
 0x2d5   :  { %v752_v21 = vadd.f32 %v751_v17, %v723_v16  ;;  %v801_v22 = vsel %vm85_vm0, %v795_v44, 0.0  ;;  %v725_v25 = vpop.f32.mrf.mxu1  ;;  %v696_v26 = vpop.f32.mrf.mxu0 }
 0x2d6   :  { %802 = vadd.xlane.f32.xlu2 %v801_v22  ;;  %v726_v28 = vadd.f32 %v725_v25, %v696_v26 }
 0x2d7   :  { %v781_v24 = vadd.f32 %v780_v18, %v752_v21 }
 0x2d9   :  { %788 = vst.msk [vmem:[%s1740_s3 + $0x10] sm:$0xff] %vm85_vm0, %v781_v24  ;;  %v792_v27 = vsub.f32 %v781_v24, %v1401_v56 }
 0x2db   :  { %v796_v55 = vmul.f32 %v792_v27, %v792_v27 }
 0x2dc   :  { %v754_v30 = vpop.f32.mrf.mxu2  ;;  %v783_v34 = vpop.f32.mrf.mxu3 }
 0x2dd   :  { %v755_v31 = vadd.f32 %v754_v30, %v726_v28  ;;  %v804_v32 = vsel %vm85_vm0, %v796_v55, 0.0 }
 0x2de   :  { %805 = vadd.xlane.f32.xlu0 %v804_v32 }
 0x2df   :  { %v784_v35 = vadd.f32 %v783_v34, %v755_v31 }
 0x2e1   :  { %789 = vst.msk [vmem:[%s1740_s3 + $0x18] sm:$0xff] %vm85_vm0, %v784_v35  ;;  %v793_v37 = vsub.f32 %v784_v35, %v1437_v60 }
 0x2e3   :  { %v797_v13 = vmul.f32 %v793_v37, %v793_v37 }
 0x2e5   :  { %v807_v14 = vsel %vm85_vm0, %v797_v13, 0.0 }
 0x2e6   :  { %808 = vadd.xlane.f32.xlu1 %v807_v14 }
 0x340   :  { %v800_v56 = vpop.xlane.xlu1 %799 }
 0x341   :  { %810 = vst.msk [vmem:[%s1741_s5] sm:$0xff] %vm617_vm3, %v800_v56 }
 0x349   :  { %v803_v38 = vpop.xlane.xlu2 %802 }
 0x34a   :  { %811 = vst.msk [vmem:[%s1741_s5 + $0x8] sm:$0xff] %vm617_vm3, %v803_v38 }
 0x351   :  { %v806_v46 = vpop.xlane.xlu0 %805 }
 0x352   :  { %812 = vst.msk [vmem:[%s1741_s5 + $0x10] sm:$0xff] %vm617_vm3, %v806_v46 }
 0x359   :  { %v809_v60 = vpop.xlane.xlu1 %808 }
 0x35a   :  { %813 = vst.msk [vmem:[%s1741_s5 + $0x18] sm:$0xff] %vm617_vm3, %v809_v60 }

// kernel: vqvae_forward.39
= control target key start
LH: loop header
LB: loop body
LE: loop exit
PB: predicated region body
PF: predicated region fallthrough
CT: control target
= control target key end

     0   :  { %vm203_vm0 = vcmask 261120   ;;  %vm289_vm1 = vcmask 1040384   ;;  %s570_s1 = inlined_call_operand.vmem [shape: bf16[288,128], index: 1, kind: input, shape index: {}]   ;;  %s571_s0 = inlined_call_operand.vmem [shape: bf16[32,288], index: 0, kind: input, shape index: {}]   ;;  %s572_s2 = inlined_call_operand.vmem [shape: f32[1,128], index: 2, kind: input, shape index: {}]   ;;  %s573_s3 = inlined_call_operand.vmem [shape: f32[32,128], index: 3, kind: output, shape index: {0}]   ;;  %s574_s4 = inlined_call_operand.vmem [shape: f32[1,2,128], index: 4, kind: output, shape index: {1}]  }
   0x1   :  { %v415_v0 = vld [vmem:[%s570_s1 + $0x38] sm:$0xff]  ;;  %v414_v2 = vld [vmem:[%s570_s1 + $0x30] sm:$0xff]  ;;  %v425_v3 = vld [vmem:[%s570_s1 + $0x88] sm:$0xff] }
   0x2   :  { %v423_v1 = vld [vmem:[%s570_s1 + $0x78] sm:$0xff]  ;;  %210 = vmatpush.bf16.msra.mxu0 %v415_v0  ;;  %426 = vmatpush.bf16.msra.mxu3 %v415_v0  ;;  %v422_v4 = vld [vmem:[%s570_s1 + $0x70] sm:$0xff]  ;;  %v424_v5 = vld [vmem:[%s570_s1 + $0x80] sm:$0xff] }
   0x3   :  { %229 = vmatpush.bf16.msra.mxu1 %v423_v1  ;;  %254 = vmatpush.bf16.msra.mxu2 %v425_v3  ;;  %v314_v6 = vld [vmem:[%s571_s0 + $0x8] sm:$0xf]  ;;  %v404_v7 = vld [vmem:[%s571_s0 + $0x10] sm:$0xf0]  ;;  %v412_v11 = vld [vmem:[%s570_s1 + $0x20] sm:$0xff] }
   0x4   :  { %v413_v8 = vld [vmem:[%s570_s1 + $0x28] sm:$0xff]  ;;  %v315_v10 = vor.u32 %v404_v7, %v314_v6  ;;  %v420_v12 = vld [vmem:[%s570_s1 + $0x60] sm:$0xff]  ;;  %v411_v13 = vld [vmem:[%s570_s1 + $0x18] sm:$0xff] }
   0x5   :  { %v421_v9 = vld [vmem:[%s570_s1 + $0x68] sm:$0xff]  ;;  %v419_v14 = vld [vmem:[%s570_s1 + $0x58] sm:$0xff]  ;;  %v410_v15 = vld [vmem:[%s570_s1 + $0x10] sm:$0xff] }
   0x6   :  { %211 = vmatpush.bf16.msra.mxu0 %v414_v2  ;;  %427 = vmatpush.bf16.msra.mxu3 %v414_v2  ;;  %v418_v16 = vld [vmem:[%s570_s1 + $0x50] sm:$0xff]  ;;  %v326_v17 = vld [vmem:[%s571_s0 + $0x20] sm:$0xf]  ;;  %v407_v18 = vld [vmem:[%s571_s0 + $0x28] sm:$0xf0] }
   0x7   :  { %230 = vmatpush.bf16.msra.mxu1 %v422_v4  ;;  %255 = vmatpush.bf16.msra.mxu2 %v424_v5  ;;  %v409_v19 = vld [vmem:[%s570_s1 + $0x8] sm:$0xff]  ;;  %v327_v21 = vor.u32 %v407_v18, %v326_v17  ;;  %v408_v22 = vld [vmem:[%s570_s1] sm:$0xff]  ;;  %v318_v25 = vld [vmem:[%s571_s0 + $0x18] sm:$0xf] }
   0x8   :  { %v417_v20 = vld [vmem:[%s570_s1 + $0x48] sm:$0xff]  ;;  %v306_v23 = vld [vmem:[%s571_s0] sm:$0xf]  ;;  %v406_v26 = vld [vmem:[%s571_s0 + $0x20] sm:$0xf0] }
   0x9   :  { %v403_v24 = vld [vmem:[%s571_s0 + $0x8] sm:$0xf0]  ;;  %v416_v27 = vld [vmem:[%s570_s1 + $0x40] sm:$0xff]  ;;  %v308_v29 = vld [vmem:[%s571_s0 + $0xc] sm:$0xf0]  ;;  %v319_v31 = vor.u32 %v406_v26, %v318_v25 }
   0xa   :  { %212 = vmatpush.bf16.msra.mxu0 %v413_v8  ;;  %428 = vmatpush.bf16.msra.mxu3 %v413_v8  ;;  %v402_v28 = vld [vmem:[%s571_s0 + $0x4] sm:$0xf]  ;;  %v307_v30 = vor.u32 %v403_v24, %v306_v23  ;;  %v405_v33 = vld [vmem:[%s571_s0 + $0x1c] sm:$0xf]  ;;  %v320_v34 = vld [vmem:[%s571_s0 + $0x24] sm:$0xf0] }
   0xb   :  { %231 = vmatpush.bf16.msra.mxu1 %v421_v9  ;;  %400 = vmatmul.msk.bf16.vlgmr.msra.gmra.mxu2 %vm203_vm0, %v315_v10  ;;  %v311_v32 = vor.u32 %v402_v28, %v308_v29  ;;  %v323_v35 = vor.u32 %v405_v33, %v320_v34  ;;  %v434_v37 = vld [vmem:[%s572_s2] ss:$0 sm:$0xff] }
   0xe   :  { %213 = vmatpush.bf16.msra.mxu0 %v412_v11  ;;  %429 = vmatpush.bf16.msra.mxu3 %v412_v11 }
   0xf   :  { %232 = vmatpush.bf16.msra.mxu1 %v420_v12 }
  0x12   :  { %214 = vmatpush.bf16.msra.mxu0 %v411_v13  ;;  %430 = vmatpush.bf16.msra.mxu3 %v411_v13 }
  0x13   :  { %233 = vmatpush.bf16.msra.mxu1 %v419_v14 }
  0x16   :  { %215 = vmatpush.bf16.msra.mxu0 %v410_v15  ;;  %431 = vmatpush.bf16.msra.mxu3 %v410_v15 }
  0x17   :  { %234 = vmatpush.bf16.msra.mxu1 %v418_v16 }
  0x1a   :  { %216 = vmatpush.bf16.msra.mxu0 %v409_v19  ;;  %432 = vmatpush.bf16.msra.mxu3 %v409_v19 }
  0x1b   :  { %235 = vmatpush.bf16.msra.mxu1 %v417_v20  ;;  %401 = vmatmul.msk.bf16.gmra.mxu2 %vm203_vm0, %v327_v21 }
  0x1e   :  { %217 = vmatpush.bf16.msra.mxu0 %v408_v22  ;;  %433 = vmatpush.bf16.msra.mxu3 %v408_v22 }
  0x1f   :  { %236 = vmatpush.bf16.msra.mxu1 %v416_v27 }
  0x21   :  { %218 = vmatmul.bf16.vlgmr.msra.gmra.mxu0 %v307_v30  ;;  %223 = vmatmul.bf16.vlgmr.msra.gmra.mxu3 %v319_v31 }
  0x22   :  { %237 = vmatmul.bf16.vlgmr.msra.gmra.mxu1 %v311_v32 }
  0x32   :  { %242 = vmatmul.bf16.gmra.mxu1 %v323_v35 }
  0x8e   :  { %v257_v36 = vpop.f32.mrf.mxu2 }
  0x96   :  { %v259_v43 = vpop.f32.mrf.mxu2 }
  0x9e   :  { %v219_v38 = vpop.f32.mrf.mxu0  ;;  %v262_v51 = vpop.f32.mrf.mxu2 }
  0x9f   :  { %v220_v39 = vadd.f32 %v434_v37, %v219_v38  ;;  %v238_v40 = vpop.f32.mrf.mxu1 }
  0xa1   :  { %v239_v41 = vadd.f32 %v238_v40, %v220_v39 }
  0xa3   :  { %v258_v42 = vadd.f32 %v257_v36, %v239_v41 }
  0xa4   :  { %v224_v47 = vpop.f32.mrf.mxu3 }
  0xa5   :  { %292 = vst [vmem:[%s573_s3] sm:$0xff] %v258_v42  ;;  %v225_v50 = vadd.f32 %v434_v37, %v224_v47  ;;  %v276_v59 = vmul.f32 %v258_v42, %v258_v42 }
  0xa6   :  { %v221_v44 = vpop.f32.mrf.mxu0  ;;  %v264_v63 = vpop.f32.mrf.mxu2 }
  0xa7   :  { %v222_v45 = vadd.f32 %v434_v37, %v221_v44  ;;  %v240_v46 = vpop.f32.mrf.mxu1 }
  0xa9   :  { %v241_v48 = vadd.f32 %v240_v46, %v222_v45 }
  0xab   :  { %v260_v49 = vadd.f32 %v259_v43, %v241_v48 }
  0xac   :  { %v226_v55 = vpop.f32.mrf.mxu3 }
  0xad   :  { %293 = vst [vmem:[%s573_s3 + $0x8] sm:$0xff] %v260_v49  ;;  %v277_v56 = vmul.f32 %v260_v49, %v260_v49  ;;  %v227_v57 = vadd.f32 %v434_v37, %v226_v55  ;;  %v267_v60 = vadd.f32 %v260_v49, %v258_v42 }
  0xaf   :  { %v243_v52 = vpop.f32.mrf.mxu1  ;;  %v280_v0 = vadd.f32 %v277_v56, %v276_v59 }
  0xb0   :  { %v244_v53 = vadd.f32 %v243_v52, %v225_v50 }
  0xb2   :  { %v263_v54 = vadd.f32 %v262_v51, %v244_v53 }
  0xb4   :  { %294 = vst [vmem:[%s573_s3 + $0x10] sm:$0xff] %v263_v54  ;;  %v278_v61 = vmul.f32 %v263_v54, %v263_v54  ;;  %v268_v1 = vadd.f32 %v267_v60, %v263_v54 }
  0xb6   :  { %v281_v3 = vadd.f32 %v280_v0, %v278_v61 }
  0xb7   :  { %v245_v58 = vpop.f32.mrf.mxu1 }
  0xb8   :  { %v246_v62 = vadd.f32 %v245_v58, %v227_v57 }
  0xba   :  { %v265_v2 = vadd.f32 %v264_v63, %v246_v62 }
  0xbc   :  { %v269_v4 = vadd.f32 %v268_v1, %v265_v2  ;;  %v279_v5 = vmul.f32 %v265_v2, %v265_v2  ;;  %295 = vst [vmem:[%s573_s3 + $0x18] sm:$0xff] %v265_v2 }
  0xbe   :  { %v270_v6 = vrot.slane %v269_v4, 4  ;;  %v282_v7 = vadd.f32 %v281_v3, %v279_v5 }
  0xc0   :  { %v271_v8 = vadd.f32 %v270_v6, %v269_v4  ;;  %v283_v9 = vrot.slane %v282_v7, 4 }
  0xc2   :  { %v272_v10 = vrot.slane %v271_v8, 2  ;;  %v284_v11 = vadd.f32 %v283_v9, %v282_v7 }
  0xc4   :  { %v273_v12 = vadd.f32 %v272_v10, %v271_v8  ;;  %v285_v13 = vrot.slane %v284_v11, 2 }
  0xc6   :  { %v274_v14 = vrot.slane %v273_v12, 1  ;;  %v286_v15 = vadd.f32 %v285_v13, %v284_v11 }
  0xc8   :  { %v287_v16 = vrot.slane %v286_v15, 1  ;;  %v275_v17 = vadd.f32 %v274_v14, %v273_v12 }
  0xca   :  { %v288_v18 = vadd.f32 %v287_v16, %v286_v15 }
  0xcc   :  { %v290_v19 = vsel %vm289_vm1, %v275_v17, %v288_v18 }
  0xcd   :  { %291 = vst [vmem:[%s574_s4] sm:$0x3] %v290_v19 }

// kernel: squeeze.31
= control target key start
LH: loop header
LB: loop body
LE: loop exit
PB: predicated region body
PF: predicated region fallthrough
CT: control target
= control target key end

     0   :  { %s142_s0 = inlined_call_operand.vmem [shape: s32[32], index: 0, kind: input, shape index: {}]   ;;  %s143_s1 = inlined_call_operand.hbm [shape: s32[2,4,4], index: 1, kind: output, shape index: {}]  }
   0x1   :  { %v5_v0 = vld [vmem:[%s142_s0] sm:$0x1] }
   0x2   :  { %6 = vst [vmem:[#allocation3] sm:$0x1] %v5_v0 }
   0x3   :  { %2 = vsyncpa [#allocation1], 0  ;;  %s110_s0 = smov 124   ;;  %s111_s8 = smov 116   ;;  %vm8_vm0 = vcmask 31744  }
   0x4   :  { %s112_s9 = smov 108   ;;  %s113_s10 = smov 120  }
   0x5   :  { %s114_s11 = smov 112   ;;  %s115_s12 = smov 104  }
   0x6   :  { %s116_s13 = smov 100   ;;  %s117_s14 = smov [#allocation0]  }
   0x7   :  { %s67_s15 = sshll.u32 %s117_s14, 4  ;;  %s69_s1 = sshll.u32 %s143_s1, 4  ;;  %s68_s15 = int_to_ptr.vmem [resolvable:$true] %s67_s15  ;;  %s70_s1 = int_to_ptr.hbm [resolvable:$true] %s69_s1 }
   0x9   :  { %v10_v1 = vld [vmem:[#allocation3] sm:$0x1]  }
   0xa   :  { %v22_v2 = vld [vmem:[#allocation3] sm:$0x1]   ;;  %11 = vrot.lane.b32.xlu0 %v10_v1, %s110_s0 }
   0xb   :  { %23 = vrot.lane.b32.xlu1 %v22_v2, %s111_s8  ;;  %v34_v3 = vld [vmem:[#allocation3] sm:$0x1]  }
   0xc   :  { %35 = vrot.lane.b32.xlu2 %v34_v3, %s112_s9  ;;  %v16_v4 = vld [vmem:[#allocation3] sm:$0x1]  }
   0xd   :  { %v28_v5 = vld [vmem:[#allocation3] sm:$0x1]  }
   0xe   :  { %v40_v6 = vld [vmem:[#allocation3] sm:$0x1]  }
   0xf   :  { %v46_v7 = vld [vmem:[#allocation3] sm:$0x1]  }
  0x10   :  { %v7_v8 = vld [vmem:[#allocation3] sm:$0x1]  }
  0x11   :  { %9 = vst.msk [vmem:[#allocation2] sm:$0x1] %vm8_vm0, %v7_v8  }
  0x12   :  { %17 = vrot.lane.b32.xlu0 %v16_v4, %s113_s10 }
  0x13   :  { %29 = vrot.lane.b32.xlu1 %v28_v5, %s114_s11 }
  0x14   :  { %41 = vrot.lane.b32.xlu2 %v40_v6, %s115_s12 }
  0x1a   :  { %47 = vrot.lane.b32.xlu0 %v46_v7, %s116_s13 }
  0x66   :  { %v36_v9 = vpop.permute.xlu2 %35  }
  0x67   :  { %39 = vst.msk [vmem:[#allocation2 + $0x9] sm:$0x1] %vm8_vm0, %v36_v9  }
  0x6e   :  { %v42_v10 = vpop.permute.xlu2 %41  }
  0x6f   :  { %45 = vst.msk [vmem:[#allocation2 + $0xa] sm:$0x1] %vm8_vm0, %v42_v10  }
  0x7c   :  { %v12_v11 = vpop.permute.xlu0 %11  }
  0x7d   :  { %v24_v12 = vpop.permute.xlu1 %23   ;;  %15 = vst.msk [vmem:[#allocation2 + $0x1] sm:$0x1] %vm8_vm0, %v12_v11  }
  0x7e   :  { %27 = vst.msk [vmem:[#allocation2 + $0x3] sm:$0x1] %vm8_vm0, %v24_v12  }
  0x84   :  { %v18_v13 = vpop.permute.xlu0 %17  }
  0x85   :  { %v30_v14 = vpop.permute.xlu1 %29   ;;  %21 = vst.msk [vmem:[#allocation2 + $0x2] sm:$0x1] %vm8_vm0, %v18_v13  }
  0x86   :  { %33 = vst.msk [vmem:[#allocation2 + $0x8] sm:$0x1] %vm8_vm0, %v30_v14  }
  0x8c   :  { %v48_v15 = vpop.permute.xlu0 %47   ;;  %v54_v16 = vld [vmem:[#allocation2] sm:$0xf] }
  0x8d   :  { %51 = vst.msk [vmem:[#allocation2 + $0xb] sm:$0x1] %vm8_vm0, %v48_v15  }
  0x8e   :  { %57 = vst [vmem:[#allocation0] sm:$0xf] %v54_v16 }
  0x94   :  { %v59_v17 = vld [vmem:[#allocation2 + $0x8] sm:$0xf] }
  0x95   :  { %63 = vst [vmem:[#allocation0 + $0x4] sm:$0xf] %v59_v17 }
  0x96   :  { %72 = dma.vmem_to_hbm [thread:$0]  %s68_s15, 128, %s70_s1, [#allocation1]  }
  0x97   :  { %108 = dma.done.wait [#allocation1], 128  }
  0x98   :  { %109 = vsyncadd [#allocation1], 4294967168 }
  0x99   :  { %75 = vsyncpa [#allocation1], 1 }

// kernel: vqvae_forward.41
= control target key start
LH: loop header
LB: loop body
LE: loop exit
PB: predicated region body
PF: predicated region fallthrough
CT: control target
= control target key end

     0   :  { %vm315_vm0 = vcmask 261120   ;;  %vm503_vm1 = vcmask 130048   ;;  %s1102_s1 = inlined_call_operand.vmem [shape: bf16[288,16], index: 1, kind: input, shape index: {}]   ;;  %s1103_s0 = inlined_call_operand.vmem [shape: bf16[128,288], index: 0, kind: input, shape index: {}]   ;;  %s1104_s2 = inlined_call_operand.vmem [shape: f32[1,16], index: 2, kind: input, shape index: {}]   ;;  %s1105_s3 = inlined_call_operand.vmem [shape: f32[128,16], index: 3, kind: output, shape index: {}]  }
   0x1   :  { %v731_v0 = vld [vmem:[%s1102_s1 + $0x38] sm:$0xff]  ;;  %v741_v1 = vld [vmem:[%s1102_s1 + $0x88] sm:$0xff]  ;;  %v730_v3 = vld [vmem:[%s1102_s1 + $0x30] sm:$0xff] }
   0x2   :  { %v739_v2 = vld [vmem:[%s1102_s1 + $0x78] sm:$0xff]  ;;  %340 = vmatpush.bf16.msra.mxu0 %v731_v0  ;;  %742 = vmatpush.bf16.msra.mxu3 %v731_v0  ;;  %v740_v4 = vld [vmem:[%s1102_s1 + $0x80] sm:$0xff]  ;;  %v738_v5 = vld [vmem:[%s1102_s1 + $0x70] sm:$0xff] }
   0x3   :  { %444 = vmatpush.bf16.msra.mxu2 %v741_v1  ;;  %389 = vmatpush.bf16.msra.mxu1 %v739_v2  ;;  %v534_v6 = vld [vmem:[%s1103_s0 + $0x8] sm:$0xf]  ;;  %v702_v7 = vld [vmem:[%s1103_s0 + $0x10] sm:$0xf0]  ;;  %v728_v11 = vld [vmem:[%s1102_s1 + $0x20] sm:$0xff] }
   0x4   :  { %v535_v8 = vor.u32 %v702_v7, %v534_v6  ;;  %v729_v9 = vld [vmem:[%s1102_s1 + $0x28] sm:$0xff]  ;;  %v736_v12 = vld [vmem:[%s1102_s1 + $0x60] sm:$0xff]  ;;  %v727_v13 = vld [vmem:[%s1102_s1 + $0x18] sm:$0xff] }
   0x5   :  { %v737_v10 = vld [vmem:[%s1102_s1 + $0x68] sm:$0xff]  ;;  %v735_v14 = vld [vmem:[%s1102_s1 + $0x58] sm:$0xff]  ;;  %v726_v15 = vld [vmem:[%s1102_s1 + $0x10] sm:$0xff] }
   0x6   :  { %341 = vmatpush.bf16.msra.mxu0 %v730_v3  ;;  %743 = vmatpush.bf16.msra.mxu3 %v730_v3  ;;  %v734_v16 = vld [vmem:[%s1102_s1 + $0x50] sm:$0xff]  ;;  %v546_v17 = vld [vmem:[%s1103_s0 + $0x20] sm:$0xf]  ;;  %v705_v18 = vld [vmem:[%s1103_s0 + $0x28] sm:$0xf0] }
   0x7   :  { %445 = vmatpush.bf16.msra.mxu2 %v740_v4  ;;  %390 = vmatpush.bf16.msra.mxu1 %v738_v5  ;;  %v547_v19 = vor.u32 %v705_v18, %v546_v17  ;;  %v725_v20 = vld [vmem:[%s1102_s1 + $0x8] sm:$0xff]  ;;  %v724_v22 = vld [vmem:[%s1102_s1] sm:$0xff]  ;;  %v598_v26 = vld [vmem:[%s1103_s0 + $0x90] sm:$0xf] }
   0x8   :  { %v733_v21 = vld [vmem:[%s1102_s1 + $0x48] sm:$0xff]  ;;  %v732_v23 = vld [vmem:[%s1102_s1 + $0x40] sm:$0xff]  ;;  %v719_v27 = vld [vmem:[%s1103_s0 + $0x98] sm:$0xf0] }
   0x9   :  { %v526_v24 = vld [vmem:[%s1103_s0] sm:$0xf]  ;;  %v701_v25 = vld [vmem:[%s1103_s0 + $0x8] sm:$0xf0]  ;;  %v700_v28 = vld [vmem:[%s1103_s0 + $0x4] sm:$0xf]  ;;  %v599_v31 = vor.u32 %v719_v27, %v598_v26 }
   0xa   :  { %692 = vmatmul.msk.bf16.vlgmr.msra.gmra.mxu2 %vm315_vm0, %v535_v8  ;;  %342 = vmatpush.bf16.msra.mxu0 %v729_v9  ;;  %v528_v29 = vld [vmem:[%s1103_s0 + $0xc] sm:$0xf0]  ;;  %v527_v30 = vor.u32 %v701_v25, %v526_v24  ;;  %v558_v33 = vld [vmem:[%s1103_s0 + $0x38] sm:$0xf]  ;;  %v708_v34 = vld [vmem:[%s1103_s0 + $0x40] sm:$0xf0] }
   0xb   :  { %744 = vmatpush.bf16.msra.mxu3 %v729_v9  ;;  %391 = vmatpush.bf16.msra.mxu1 %v737_v10  ;;  %v531_v32 = vor.u32 %v700_v28, %v528_v29  ;;  %v559_v35 = vor.u32 %v708_v34, %v558_v33  ;;  %v538_v36 = vld [vmem:[%s1103_s0 + $0x18] sm:$0xf]  ;;  %v704_v37 = vld [vmem:[%s1103_s0 + $0x20] sm:$0xf0]  ;;  %v610_v38 = vld [vmem:[%s1103_s0 + $0xa8] sm:$0xf] }
   0xc   :  { %v722_v39 = vld [vmem:[%s1103_s0 + $0xb0] sm:$0xf0]  ;;  %v703_v40 = vld [vmem:[%s1103_s0 + $0x1c] sm:$0xf]  ;;  %v540_v41 = vld [vmem:[%s1103_s0 + $0x24] sm:$0xf0]  ;;  %v539_v42 = vor.u32 %v704_v37, %v538_v36 }
   0xd   :  { %v611_v43 = vor.u32 %v722_v39, %v610_v38  ;;  %v543_v44 = vor.u32 %v703_v40, %v540_v41  ;;  %v570_v45 = vld [vmem:[%s1103_s0 + $0x50] sm:$0xf]  ;;  %v711_v46 = vld [vmem:[%s1103_s0 + $0x58] sm:$0xf0]  ;;  %v718_v50 = vld [vmem:[%s1103_s0 + $0x94] sm:$0xf] }
   0xe   :  { %343 = vmatpush.bf16.msra.mxu0 %v728_v11  ;;  %v571_v47 = vor.u32 %v711_v46, %v570_v45  ;;  %v550_v48 = vld [vmem:[%s1103_s0 + $0x30] sm:$0xf]  ;;  %v707_v49 = vld [vmem:[%s1103_s0 + $0x38] sm:$0xf0]  ;;  %v600_v51 = vld [vmem:[%s1103_s0 + $0x9c] sm:$0xf0] }
   0xf   :  { %745 = vmatpush.bf16.msra.mxu3 %v728_v11  ;;  %392 = vmatpush.bf16.msra.mxu1 %v736_v12  ;;  %v706_v52 = vld [vmem:[%s1103_s0 + $0x34] sm:$0xf]  ;;  %v552_v53 = vld [vmem:[%s1103_s0 + $0x3c] sm:$0xf0]  ;;  %v551_v54 = vor.u32 %v707_v49, %v550_v48  ;;  %v603_v55 = vor.u32 %v718_v50, %v600_v51  ;;  %v582_v57 = vld [vmem:[%s1103_s0 + $0x68] sm:$0xf] }
  0x10   :  { %v555_v56 = vor.u32 %v706_v52, %v552_v53  ;;  %v714_v58 = vld [vmem:[%s1103_s0 + $0x70] sm:$0xf0]  ;;  %v562_v60 = vld [vmem:[%s1103_s0 + $0x48] sm:$0xf]  ;;  %v721_v62 = vld [vmem:[%s1103_s0 + $0xac] sm:$0xf] }
  0x11   :  { %v583_v59 = vor.u32 %v714_v58, %v582_v57  ;;  %v710_v61 = vld [vmem:[%s1103_s0 + $0x50] sm:$0xf0]  ;;  %v612_v63 = vld [vmem:[%s1103_s0 + $0xb4] sm:$0xf0]  ;;  %v709_v0 = vld [vmem:[%s1103_s0 + $0x4c] sm:$0xf] }
  0x12   :  { %344 = vmatpush.bf16.msra.mxu0 %v727_v13  ;;  %v564_v1 = vld [vmem:[%s1103_s0 + $0x54] sm:$0xf0]  ;;  %v615_v3 = vor.u32 %v721_v62, %v612_v63  ;;  %v717_v6 = vld [vmem:[%s1103_s0 + $0x88] sm:$0xf0]  ;;  %v574_v8 = vld [vmem:[%s1103_s0 + $0x60] sm:$0xf] }
  0x13   :  { %746 = vmatpush.bf16.msra.mxu3 %v727_v13  ;;  %393 = vmatpush.bf16.msra.mxu1 %v735_v14  ;;  %v567_v4 = vor.u32 %v709_v0, %v564_v1  ;;  %v713_v9 = vld [vmem:[%s1103_s0 + $0x68] sm:$0xf0]  ;;  %v576_v11 = vld [vmem:[%s1103_s0 + $0x6c] sm:$0xf0]  ;;  %v586_v17 = vld [vmem:[%s1103_s0 + $0x78] sm:$0xf] }
  0x14   :  { %v716_v18 = vld [vmem:[%s1103_s0 + $0x80] sm:$0xf0]  ;;  %v723_v24 = vld [vmem:[%s1103_s0 + $0xb8] sm:$0xf0]  ;;  %v1020_v28 = vld [vmem:[%s1104_s2] ss:$0 sm:$0xff] }
  0x16   :  { %345 = vmatpush.bf16.msra.mxu0 %v726_v15 }
  0x17   :  { %747 = vmatpush.bf16.msra.mxu3 %v726_v15  ;;  %394 = vmatpush.bf16.msra.mxu1 %v734_v16  ;;  %v720_v15 = vld [vmem:[%s1103_s0 + $0xa0] sm:$0xf0] }
  0x1a   :  { %693 = vmatmul.msk.bf16.gmra.mxu2 %vm315_vm0, %v547_v19  ;;  %346 = vmatpush.bf16.msra.mxu0 %v725_v20  ;;  %v715_v19 = vld [vmem:[%s1103_s0 + $0x7c] sm:$0xf] }
  0x1b   :  { %748 = vmatpush.bf16.msra.mxu3 %v725_v20  ;;  %395 = vmatpush.bf16.msra.mxu1 %v733_v21  ;;  %v588_v20 = vld [vmem:[%s1103_s0 + $0x84] sm:$0xf0] }
  0x1e   :  { %347 = vmatpush.bf16.msra.mxu0 %v724_v22 }
  0x1f   :  { %749 = vmatpush.bf16.msra.mxu3 %v724_v22  ;;  %396 = vmatpush.bf16.msra.mxu1 %v732_v23  ;;  %v591_v22 = vor.u32 %v715_v19, %v588_v20 }
  0x21   :  { %348 = vmatmul.bf16.vlgmr.msra.gmra.mxu0 %v527_v30 }
  0x22   :  { %378 = vmatmul.bf16.vlgmr.msra.gmra.mxu3 %v599_v31  ;;  %397 = vmatmul.bf16.vlgmr.msra.gmra.mxu1 %v531_v32 }
  0x23   :  { %750 = vmatpush.bf16.msrb.mxu3 %v739_v2  ;;  %v563_v2 = vor.u32 %v710_v61, %v562_v60 }
  0x27   :  { %751 = vmatpush.bf16.msrb.mxu3 %v738_v5  ;;  %v594_v5 = vld [vmem:[%s1103_s0 + $0x80] sm:$0xf] }
  0x28   :  { %v595_v7 = vor.u32 %v717_v6, %v594_v5 }
  0x2a   :  { %694 = vmatmul.msk.bf16.gmra.mxu2 %vm315_vm0, %v559_v35 }
  0x2b   :  { %752 = vmatpush.bf16.msrb.mxu3 %v737_v10  ;;  %v712_v10 = vld [vmem:[%s1103_s0 + $0x64] sm:$0xf] }
  0x2c   :  { %v579_v13 = vor.u32 %v712_v10, %v576_v11 }
  0x2f   :  { %753 = vmatpush.bf16.msrb.mxu3 %v736_v12  ;;  %v575_v12 = vor.u32 %v713_v9, %v574_v8 }
  0x31   :  { %353 = vmatmul.bf16.gmra.mxu0 %v539_v42 }
  0x32   :  { %383 = vmatmul.bf16.gmra.mxu3 %v611_v43  ;;  %402 = vmatmul.bf16.gmra.mxu1 %v543_v44 }
  0x33   :  { %754 = vmatpush.bf16.msrb.mxu3 %v735_v14  ;;  %v606_v14 = vld [vmem:[%s1103_s0 + $0x98] sm:$0xf] }
  0x37   :  { %755 = vmatpush.bf16.msrb.mxu3 %v734_v16  ;;  %v607_v16 = vor.u32 %v720_v15, %v606_v14 }
  0x3a   :  { %695 = vmatmul.msk.bf16.gmra.mxu2 %vm315_vm0, %v571_v47 }
  0x3b   :  { %756 = vmatpush.bf16.msrb.mxu3 %v733_v21  ;;  %v587_v21 = vor.u32 %v716_v18, %v586_v17 }
  0x3f   :  { %757 = vmatpush.bf16.msrb.mxu3 %v732_v23  ;;  %v618_v23 = vld [vmem:[%s1103_s0 + $0xb0] sm:$0xf] }
  0x40   :  { %v619_v25 = vor.u32 %v723_v24, %v618_v23 }
  0x41   :  { %358 = vmatmul.bf16.gmra.mxu0 %v551_v54 }
  0x42   :  { %427 = vmatmul.bf16.vlgmr.msrb.gmra.mxu3 %v603_v55  ;;  %407 = vmatmul.bf16.gmra.mxu1 %v555_v56 }
  0x4a   :  { %696 = vmatmul.msk.bf16.gmra.mxu2 %vm315_vm0, %v583_v59 }
  0x51   :  { %363 = vmatmul.bf16.gmra.mxu0 %v563_v2 }
  0x52   :  { %432 = vmatmul.bf16.gmra.mxu3 %v615_v3  ;;  %412 = vmatmul.bf16.gmra.mxu1 %v567_v4 }
  0x5a   :  { %697 = vmatmul.msk.bf16.gmra.mxu2 %vm315_vm0, %v595_v7 }
  0x61   :  { %368 = vmatmul.bf16.gmra.mxu0 %v575_v12 }
  0x62   :  { %417 = vmatmul.bf16.gmra.mxu1 %v579_v13 }
  0x6a   :  { %698 = vmatmul.msk.bf16.gmra.mxu2 %vm315_vm0, %v607_v16 }
  0x71   :  { %373 = vmatmul.bf16.gmra.mxu0 %v587_v21 }
  0x72   :  { %422 = vmatmul.bf16.gmra.mxu1 %v591_v22 }
  0x7a   :  { %699 = vmatmul.msk.bf16.gmra.mxu2 %vm315_vm0, %v619_v25 }
  0x8d   :  { %v447_v26 = vpop.f32.mrf.mxu2 }
  0x95   :  { %v449_v27 = vpop.f32.mrf.mxu2 }
  0x9d   :  { %v452_v29 = vpop.f32.mrf.mxu2 }
  0x9e   :  { %v349_v30 = vpop.f32.mrf.mxu0 }
  0x9f   :  { %v350_v31 = vadd.f32 %v1020_v28, %v349_v30  ;;  %v398_v32 = vpop.f32.mrf.mxu1 }
  0xa1   :  { %v399_v33 = vadd.f32 %v398_v32, %v350_v31 }
  0xa3   :  { %v448_v34 = vadd.f32 %v447_v26, %v399_v33 }
  0xa5   :  { %759 = vtanh.f32 %v448_v34  ;;  %v454_v35 = vpop.f32.mrf.mxu2  ;;  %v379_v55 = vpop.f32.mrf.mxu3 }
  0xa6   :  { %v351_v36 = vpop.f32.mrf.mxu0 }
  0xa7   :  { %v352_v37 = vadd.f32 %v1020_v28, %v351_v36  ;;  %v400_v38 = vpop.f32.mrf.mxu1 }
  0xa9   :  { %v401_v39 = vadd.f32 %v400_v38, %v352_v37  ;;  %v380_v37 = vadd.f32 %v1020_v28, %v379_v55 }
  0xab   :  { %v760_v40 = vpop.eup %759  ;;  %v450_v41 = vadd.f32 %v449_v27, %v401_v39 }
  0xac   :  { %504 = vst.msk [vmem:[%s1105_s3] sm:$0xff] %vm503_vm1, %v760_v40 }
  0xad   :  { %761 = vtanh.f32 %v450_v41  ;;  %v457_v42 = vpop.f32.mrf.mxu2  ;;  %v381_v0 = vpop.f32.mrf.mxu3 }
  0xae   :  { %v354_v43 = vpop.f32.mrf.mxu0 }
  0xaf   :  { %v355_v44 = vadd.f32 %v1020_v28, %v354_v43  ;;  %v403_v45 = vpop.f32.mrf.mxu1 }
  0xb1   :  { %v404_v46 = vadd.f32 %v403_v45, %v355_v44 }
  0xb3   :  { %v762_v47 = vpop.eup %761  ;;  %v453_v48 = vadd.f32 %v452_v29, %v404_v46 }
  0xb4   :  { %505 = vst.msk [vmem:[%s1105_s3 + $0x8] sm:$0xff] %vm503_vm1, %v762_v47 }
  0xb5   :  { %763 = vtanh.f32 %v453_v48  ;;  %v459_v49 = vpop.f32.mrf.mxu2  ;;  %v384_v10 = vpop.f32.mrf.mxu3  ;;  %v382_v48 = vadd.f32 %v1020_v28, %v381_v0 }
  0xb6   :  { %v356_v50 = vpop.f32.mrf.mxu0 }
  0xb7   :  { %v357_v51 = vadd.f32 %v1020_v28, %v356_v50  ;;  %v405_v52 = vpop.f32.mrf.mxu1 }
  0xb9   :  { %v406_v53 = vadd.f32 %v405_v52, %v357_v51 }
  0xbb   :  { %v764_v54 = vpop.eup %763  ;;  %v455_v56 = vadd.f32 %v454_v35, %v406_v53 }
  0xbc   :  { %506 = vst.msk [vmem:[%s1105_s3 + $0x10] sm:$0xff] %vm503_vm1, %v764_v54 }
  0xbd   :  { %765 = vtanh.f32 %v455_v56  ;;  %v462_v57 = vpop.f32.mrf.mxu2  ;;  %v386_v20 = vpop.f32.mrf.mxu3 }
  0xbe   :  { %v359_v58 = vpop.f32.mrf.mxu0 }
  0xbf   :  { %v360_v59 = vadd.f32 %v1020_v28, %v359_v58  ;;  %v408_v60 = vpop.f32.mrf.mxu1 }
  0xc1   :  { %v409_v61 = vadd.f32 %v408_v60, %v360_v59  ;;  %v385_v60 = vadd.f32 %v1020_v28, %v384_v10 }
  0xc3   :  { %v766_v62 = vpop.eup %765  ;;  %v458_v63 = vadd.f32 %v457_v42, %v409_v61 }
  0xc4   :  { %507 = vst.msk [vmem:[%s1105_s3 + $0x18] sm:$0xff] %vm503_vm1, %v766_v62 }
  0xc5   :  { %767 = vtanh.f32 %v458_v63  ;;  %v464_v1 = vpop.f32.mrf.mxu2  ;;  %v428_v31 = vpop.f32.mrf.mxu3 }
  0xc6   :  { %v361_v2 = vpop.f32.mrf.mxu0  ;;  %v429_v41 = vadd.f32 %v428_v31, %v380_v37 }
  0xc7   :  { %v362_v3 = vadd.f32 %v1020_v28, %v361_v2  ;;  %v410_v4 = vpop.f32.mrf.mxu1 }
  0xc9   :  { %v411_v5 = vadd.f32 %v410_v4, %v362_v3  ;;  %v387_v4 = vadd.f32 %v1020_v28, %v386_v20 }
  0xcb   :  { %v768_v6 = vpop.eup %767  ;;  %v460_v7 = vadd.f32 %v459_v49, %v411_v5 }
  0xcc   :  { %508 = vst.msk [vmem:[%s1105_s3 + $0x20] sm:$0xff] %vm503_vm1, %v768_v6 }
  0xcd   :  { %769 = vtanh.f32 %v460_v7  ;;  %v467_v8 = vpop.f32.mrf.mxu2  ;;  %v430_v42 = vpop.f32.mrf.mxu3 }
  0xce   :  { %v364_v9 = vpop.f32.mrf.mxu0  ;;  %v431_v52 = vadd.f32 %v430_v42, %v382_v48 }
  0xcf   :  { %v365_v11 = vadd.f32 %v1020_v28, %v364_v9  ;;  %v413_v12 = vpop.f32.mrf.mxu1 }
  0xd1   :  { %v414_v13 = vadd.f32 %v413_v12, %v365_v11 }
  0xd3   :  { %v770_v14 = vpop.eup %769  ;;  %v463_v15 = vadd.f32 %v462_v57, %v414_v13 }
  0xd4   :  { %509 = vst.msk [vmem:[%s1105_s3 + $0x28] sm:$0xff] %vm503_vm1, %v770_v14 }
  0xd5   :  { %771 = vtanh.f32 %v463_v15  ;;  %v469_v16 = vpop.f32.mrf.mxu2  ;;  %v433_v57 = vpop.f32.mrf.mxu3 }
  0xd6   :  { %v366_v17 = vpop.f32.mrf.mxu0  ;;  %v434_v0 = vadd.f32 %v433_v57, %v385_v60 }
  0xd7   :  { %v367_v18 = vadd.f32 %v1020_v28, %v366_v17  ;;  %v415_v19 = vpop.f32.mrf.mxu1 }
  0xd9   :  { %v416_v21 = vadd.f32 %v415_v19, %v367_v18 }
  0xdb   :  { %v772_v22 = vpop.eup %771  ;;  %v465_v23 = vadd.f32 %v464_v1, %v416_v21 }
  0xdc   :  { %510 = vst.msk [vmem:[%s1105_s3 + $0x30] sm:$0xff] %vm503_vm1, %v772_v22 }
  0xdd   :  { %773 = vtanh.f32 %v465_v23  ;;  %v472_v24 = vpop.f32.mrf.mxu2  ;;  %v435_v5 = vpop.f32.mrf.mxu3 }
  0xde   :  { %v369_v25 = vpop.f32.mrf.mxu0  ;;  %v436_v7 = vadd.f32 %v435_v5, %v387_v4 }
  0xdf   :  { %v370_v26 = vadd.f32 %v1020_v28, %v369_v25  ;;  %v418_v27 = vpop.f32.mrf.mxu1 }
  0xe1   :  { %v419_v29 = vadd.f32 %v418_v27, %v370_v26 }
  0xe3   :  { %v774_v30 = vpop.eup %773  ;;  %v468_v32 = vadd.f32 %v467_v8, %v419_v29 }
  0xe4   :  { %511 = vst.msk [vmem:[%s1105_s3 + $0x38] sm:$0xff] %vm503_vm1, %v774_v30 }
  0xe5   :  { %775 = vtanh.f32 %v468_v32  ;;  %v474_v33 = vpop.f32.mrf.mxu2 }
  0xe6   :  { %v371_v34 = vpop.f32.mrf.mxu0 }
  0xe7   :  { %v372_v35 = vadd.f32 %v1020_v28, %v371_v34  ;;  %v420_v36 = vpop.f32.mrf.mxu1 }
  0xe9   :  { %v421_v38 = vadd.f32 %v420_v36, %v372_v35 }
  0xeb   :  { %v776_v39 = vpop.eup %775  ;;  %v470_v40 = vadd.f32 %v469_v16, %v421_v38 }
  0xec   :  { %512 = vst.msk [vmem:[%s1105_s3 + $0x40] sm:$0xff] %vm503_vm1, %v776_v39 }
  0xed   :  { %777 = vtanh.f32 %v470_v40  ;;  %v477_v43 = vpop.f32.mrf.mxu2 }
  0xee   :  { %v478_v44 = vadd.f32 %v477_v43, %v429_v41  ;;  %v374_v45 = vpop.f32.mrf.mxu0 }
  0xef   :  { %v375_v46 = vadd.f32 %v1020_v28, %v374_v45  ;;  %v423_v47 = vpop.f32.mrf.mxu1 }
  0xf0   :  { %779 = vtanh.f32 %v478_v44 }
  0xf1   :  { %v424_v49 = vadd.f32 %v423_v47, %v375_v46 }
  0xf3   :  { %v778_v50 = vpop.eup %777  ;;  %v473_v51 = vadd.f32 %v472_v24, %v424_v49 }
  0xf4   :  { %513 = vst.msk [vmem:[%s1105_s3 + $0x48] sm:$0xff] %vm503_vm1, %v778_v50 }
  0xf5   :  { %781 = vtanh.f32 %v473_v51  ;;  %v479_v53 = vpop.f32.mrf.mxu2 }
  0xf6   :  { %v780_v54 = vpop.eup %779  ;;  %v480_v55 = vadd.f32 %v479_v53, %v431_v52  ;;  %v376_v56 = vpop.f32.mrf.mxu0 }
  0xf7   :  { %516 = vst.msk [vmem:[%s1105_s3 + $0x60] sm:$0xff] %vm503_vm1, %v780_v54  ;;  %v377_v58 = vadd.f32 %v1020_v28, %v376_v56  ;;  %v425_v59 = vpop.f32.mrf.mxu1 }
  0xf8   :  { %783 = vtanh.f32 %v480_v55 }
  0xf9   :  { %v426_v61 = vadd.f32 %v425_v59, %v377_v58 }
  0xfb   :  { %v782_v62 = vpop.eup %781  ;;  %v475_v63 = vadd.f32 %v474_v33, %v426_v61 }
  0xfc   :  { %514 = vst.msk [vmem:[%s1105_s3 + $0x50] sm:$0xff] %vm503_vm1, %v782_v62 }
  0xfd   :  { %785 = vtanh.f32 %v475_v63  ;;  %v482_v1 = vpop.f32.mrf.mxu2 }
  0xfe   :  { %v784_v2 = vpop.eup %783  ;;  %v483_v3 = vadd.f32 %v482_v1, %v434_v0 }
  0xff   :  { %517 = vst.msk [vmem:[%s1105_s3 + $0x68] sm:$0xff] %vm503_vm1, %v784_v2 }
 0x100   :  { %787 = vtanh.f32 %v483_v3 }
 0x103   :  { %v786_v6 = vpop.eup %785 }
 0x104   :  { %515 = vst.msk [vmem:[%s1105_s3 + $0x58] sm:$0xff] %vm503_vm1, %v786_v6 }
 0x105   :  { %v484_v8 = vpop.f32.mrf.mxu2 }
 0x106   :  { %v788_v9 = vpop.eup %787  ;;  %v485_v10 = vadd.f32 %v484_v8, %v436_v7 }
 0x107   :  { %518 = vst.msk [vmem:[%s1105_s3 + $0x70] sm:$0xff] %vm503_vm1, %v788_v9 }
 0x108   :  { %789 = vtanh.f32 %v485_v10 }
 0x10e   :  { %v790_v11 = vpop.eup %789 }
 0x10f   :  { %519 = vst.msk [vmem:[%s1105_s3 + $0x78] sm:$0xff] %vm503_vm1, %v790_v11 }

</bundles_post_ra>
